<compile_context>
chip_gen: v5e
topology: v5e:2x2
jax: 0.10.0
libtpu: 0.0.40
codegen_flags: <defaults>
</compile_context>

<pallas_src>
from functools import partial

import jax
import jax.numpy as jnp
from jax.experimental import pallas as pl
from jax.experimental.pallas import tpu as pltpu


_VMEM_LIMIT = 32 * 1024 * 1024  # explicit scoped-VMEM limit, safe on v5e/v6e/v7x
_NEG_INF = float(jnp.finfo(jnp.float32).min)


def _round_up(x, m):
    return (x + m - 1) // m * m


# ----------------------------------------------------------------------------
# Pallas kernels
# ----------------------------------------------------------------------------
def _gemm_bias_clamp_kernel(a_ref, b_ref, bias_ref, clamp_ref, o_ref):
    """o = max(A @ B + bias, clamp). B is fully resident (no K grid axis).

    clamp is a per-column vector: 0.0 for columns that get ReLU, -FLT_MAX for
    columns that must pass through unclamped (used to fuse conv1 + shortcut
    into one GEMM with different epilogues per column group).
    """
    y = jnp.dot(a_ref[...], b_ref[...], preferred_element_type=jnp.float32)
    y = y + bias_ref[...]
    y = jnp.maximum(y, clamp_ref[...])
    o_ref[...] = y.astype(o_ref.dtype)


def _conv3x3_s1_kernel(*refs, Wp, Mb, apply_relu, has_residual):
    """Direct 3x3 stride-1 conv for one image (no VMEM accumulator scratch).

    The input ref holds the flattened, spatially padded image with the 3 column
    (kw) shifts pre-concatenated along channels.  The 3 row (kh) shifts are
    tile-aligned static slices (offsets kh*Wp, Wp a multiple of 16) feeding 3
    bf16 matmuls whose f32 results are chained as values.  Epilogue adds bias
    (+ bf16 residual) (+ ReLU) and stores the bf16 output tile exactly once.
    """
    if has_residual:
        x_ref, w_ref, b_ref, r_ref, o_ref = refs
    else:
        x_ref, w_ref, b_ref, o_ref = refs

    y = jnp.dot(x_ref[0, 0:Mb, :], w_ref[0], preferred_element_type=jnp.float32)
    y = y + jnp.dot(x_ref[0, Wp:Wp + Mb, :], w_ref[1],
                    preferred_element_type=jnp.float32)
    y = y + jnp.dot(x_ref[0, 2 * Wp:2 * Wp + Mb, :], w_ref[2],
                    preferred_element_type=jnp.float32)
    y = y + b_ref[...]
    if has_residual:
        y = y + r_ref[0].astype(jnp.float32)
    if apply_relu:
        y = jnp.maximum(y, 0.0)
    o_ref[0] = y.astype(o_ref.dtype)


# ----------------------------------------------------------------------------
# Pallas wrappers
# ----------------------------------------------------------------------------
def matmul_bias_clamp(a, b, bias, clamp):
    """a: (M, K), b: (K, Nout), bias/clamp: (Nout,).  Returns bf16 max(a@b+bias, clamp)."""
    M, K = a.shape
    Nout = b.shape[1]

    Kp = _round_up(K, 128)                 # full-K resident block: no over-padding
    Np = _round_up(Nout, 128)
    tm = min(512, _round_up(M, 16))        # large M tiles feed the v6e/v7x MXU
    Mp = _round_up(M, tm)

    a_p = jnp.pad(a.astype(jnp.bfloat16), ((0, Mp - M), (0, Kp - K)))
    b_p = jnp.pad(b.astype(jnp.bfloat16), ((0, Kp - K), (0, Np - Nout)))
    bias_p = jnp.pad(bias.astype(jnp.float32).reshape(1, -1),
                     ((0, 0), (0, Np - Nout)))
    clamp_p = jnp.pad(clamp.astype(jnp.float32).reshape(1, -1),
                      ((0, 0), (0, Np - Nout)))

    cost = pl.CostEstimate(
        flops=int(2 * M * K * Nout),
        transcendentals=0,
        bytes_accessed=int(Mp * Kp * 2 + Kp * Np * 2 + Mp * Np * 2 + 2 * Np * 4),
    )

    out = pl.pallas_call(
        _gemm_bias_clamp_kernel,
        out_shape=jax.ShapeDtypeStruct((Mp, Np), jnp.bfloat16),
        grid_spec=pltpu.PrefetchScalarGridSpec(
            num_scalar_prefetch=0,
            grid=(Mp // tm,),
            in_specs=[
                pl.BlockSpec((tm, Kp), lambda i: (i, 0)),
                pl.BlockSpec((Kp, Np), lambda i: (0, 0)),   # B resident, DMA'd once
                pl.BlockSpec((1, Np), lambda i: (0, 0)),
                pl.BlockSpec((1, Np), lambda i: (0, 0)),
            ],
            out_specs=pl.BlockSpec((tm, Np), lambda i: (i, 0)),
        ),
        compiler_params=pltpu.CompilerParams(
            dimension_semantics=("parallel",),
            vmem_limit_bytes=_VMEM_LIMIT,
            allow_input_fusion=[True, False, False, False],
        ),
        cost_estimate=cost,
    )(a_p, b_p, bias_p, clamp_p)
    return out[:M, :Nout]


def conv3x3_s1_bn_act(x, w_folded, bias, residual=None, relu=True):
    """3x3 stride-1 pad-1 conv (BN folded into w/bias) with fused residual/ReLU.

    x: (N, H, W, Cin), w_folded: (3, 3, Cin, Cout) f32, bias: (Cout,),
    residual: (N, H, W, Cout) or None.  Returns (N, H, W, Cout) bf16.
    """
    N, H, W, Cin = x.shape
    Cout = w_folded.shape[3]
    OH, OW = H, W

    Wp = _round_up(W + 2, 16)      # padded width, bf16 sublane-tile aligned
    Hp = H + 2
    Mb = OH * Wp                   # output rows computed per image (incl. pad cols)
    Lw = Hp * Wp                   # rows of the shifted operand per image
    Kc = 3 * Cin                   # 3 column taps concatenated along channels
    Kp = _round_up(Kc, 128)
    Cout_p = _round_up(Cout, 128)

    # Spatial zero-pad (1 top/bottom, 1 left, Wp-W-1 right) and flatten rows.
    xb = x.astype(jnp.bfloat16)
    xp = jnp.pad(xb, ((0, 0), (1, 1), (1, Wp - W - 1), (0, 0)))
    x_flat = xp.reshape(N, Lw, Cin)
    x_flat = jnp.pad(x_flat, ((0, 0), (0, 2), (0, 0)))   # room for kw = 1, 2 shifts
    # Column (kw) shifts concatenated along channels -> (N, Lw, 3*Cin), bf16.
    x_sh = jnp.concatenate([x_flat[:, kw:kw + Lw, :] for kw in range(3)], axis=-1)
    x_sh = jnp.pad(x_sh, ((0, 0), (0, 0), (0, Kp - Kc)))

    # Weights: per row-tap kh, a (3*Cin, Cout) matrix ordered (kw, cin) to match x_sh.
    wk = w_folded.reshape(3, Kc, Cout).astype(jnp.bfloat16)
    wk = jnp.pad(wk, ((0, 0), (0, Kp - Kc), (0, Cout_p - Cout)))
    bias_p = jnp.pad(bias.astype(jnp.float32).reshape(1, -1),
                     ((0, 0), (0, Cout_p - Cout)))

    args = [x_sh, wk, bias_p]
    in_specs = [
        pl.BlockSpec((1, Lw, Kp), lambda n: (n, 0, 0)),
        pl.BlockSpec((3, Kp, Cout_p), lambda n: (0, 0, 0)),
        pl.BlockSpec((1, Cout_p), lambda n: (0, 0)),
    ]
    fuse = [True, False, False]

    has_res = residual is not None
    if has_res:
        # Residual streamed as bf16 (upcast inside the kernel for the f32 add).
        r = jnp.pad(residual.astype(jnp.bfloat16),
                    ((0, 0), (0, 0), (0, Wp - OW), (0, Cout_p - Cout)))
        r = r.reshape(N, Mb, Cout_p)
        args.append(r)
        in_specs.append(pl.BlockSpec((1, Mb, Cout_p), lambda n: (n, 0, 0)))
        fuse.append(True)

    cost = pl.CostEstimate(
        flops=int(2 * N * OH * OW * 9 * Cin * Cout),
        transcendentals=0,
        bytes_accessed=int(N * Lw * Kp * 2 + 3 * Kp * Cout_p * 2
                           + N * Mb * Cout_p * 2
                           + (N * Mb * Cout_p * 2 if has_res else 0)),
    )

    out = pl.pallas_call(
        partial(_conv3x3_s1_kernel, Wp=Wp, Mb=Mb,
                apply_relu=relu, has_residual=has_res),
        out_shape=jax.ShapeDtypeStruct((N, Mb, Cout_p), jnp.bfloat16),
        grid_spec=pltpu.PrefetchScalarGridSpec(
            num_scalar_prefetch=0,
            grid=(N,),
            in_specs=in_specs,
            out_specs=pl.BlockSpec((1, Mb, Cout_p), lambda n: (n, 0, 0)),
        ),
        compiler_params=pltpu.CompilerParams(
            dimension_semantics=("parallel",),
            vmem_limit_bytes=_VMEM_LIMIT,
            allow_input_fusion=fuse,
        ),
        cost_estimate=cost,
    )(*args)

    out = out.reshape(N, OH, Wp, Cout_p)[:, :, :OW, :Cout]
    return out


def conv3x3_strided_fused_shortcut(x, w1, b1, w_sc, b_sc, stride):
    """Strided 3x3 conv1 (+BN+ReLU) and the 1x1 shortcut (+BN) fused into ONE
    im2col GEMM.  w_sc lives in the centre-tap (kh=1, kw=1) rows of a widened
    (9*Cin, 2*Cout) weight matrix; a per-column clamp applies ReLU only to the
    conv1 half.  Returns (conv1_out, shortcut_out), both (N, OH, OW, Cout) bf16.
    """
    N, H, W, Cin = x.shape
    Cout = w1.shape[3]
    OH = (H + 2 - 3) // stride + 1
    OW = (W + 2 - 3) // stride + 1

    xp = jnp.pad(x.astype(jnp.bfloat16), ((0, 0), (1, 1), (1, 1), (0, 0)))
    cols = [xp[:, kh:kh + stride * (OH - 1) + 1:stride,
                  kw:kw + stride * (OW - 1) + 1:stride, :]
            for kh in range(3) for kw in range(3)]
    patches = jnp.stack(cols, axis=3)                     # (N, OH, OW, 9, Cin)
    a = patches.reshape(N * OH * OW, 9 * Cin)

    w1_mat = w1.reshape(9 * Cin, Cout)
    wsc_mat = jnp.zeros((9 * Cin, Cout), w1.dtype)
    wsc_mat = wsc_mat.at[4 * Cin:5 * Cin, :].set(w_sc.reshape(Cin, Cout))
    b_comb = jnp.concatenate([b1, b_sc]).astype(jnp.float32)
    clamp = jnp.concatenate([jnp.zeros((Cout,), jnp.float32),       # ReLU on conv1
                             jnp.full((Cout,), _NEG_INF, jnp.float32)])  # pass-through

    y = matmul_bias_clamp(a, jnp.concatenate([w1_mat, wsc_mat], axis=1),
                          b_comb, clamp)
    y = y.reshape(N, OH, OW, 2 * Cout)
    return y[..., :Cout], y[..., Cout:]


def conv1x1_bn(x, w_sc, b_sc, stride):
    """1x1 strided conv (shortcut projection) + folded BN via the fused GEMM."""
    N, H, W, Cin = x.shape
    Cout = w_sc.shape[3]
    xs = x[:, ::stride, ::stride, :]
    OHs, OWs = xs.shape[1], xs.shape[2]
    clamp = jnp.full((Cout,), _NEG_INF, jnp.float32)      # no ReLU on the shortcut
    y = matmul_bias_clamp(xs.reshape(N * OHs * OWs, Cin),
                          w_sc.reshape(Cin, Cout), b_sc, clamp)
    return y.reshape(N, OHs, OWs, Cout)


# ----------------------------------------------------------------------------
# Parameters (BN folded into conv weights once, at construction time)
# ----------------------------------------------------------------------------
def fold_bn_into_conv(w, gamma, beta, mean, var, eps=1e-5):
    """General eval-mode BN fold: w*(g/sqrt(v+eps)), bias = beta - mean*scale."""
    scale = gamma / jnp.sqrt(var + eps)
    return w * scale, beta - mean * scale


def make_basic_block_params(key, in_planes, planes, stride):
    k1, k2, k3 = jax.random.split(key, 3)

    def conv_w(k, kh, kw, cin, cout):
        fan_in = cin * kh * kw
        bound = 1.0 / (fan_in ** 0.5)
        return jax.random.uniform(k, (kh, kw, cin, cout), jnp.float32, -bound, bound)

    def fresh_bn(c):
        # eval-mode stats of a freshly constructed nn.BatchNorm2d
        return (jnp.ones((c,), jnp.float32), jnp.zeros((c,), jnp.float32),
                jnp.zeros((c,), jnp.float32), jnp.ones((c,), jnp.float32))

    p = {"stride": stride}
    p["w1"], p["b1"] = fold_bn_into_conv(conv_w(k1, 3, 3, in_planes, planes),
                                         *fresh_bn(planes))
    p["w2"], p["b2"] = fold_bn_into_conv(conv_w(k2, 3, 3, planes, planes),
                                         *fresh_bn(planes))
    if stride != 1 or in_planes != planes:
        p["w_sc"], p["b_sc"] = fold_bn_into_conv(conv_w(k3, 1, 1, in_planes, planes),
                                                 *fresh_bn(planes))
    return p


# ----------------------------------------------------------------------------
# BasicBlock forward (matches the PyTorch module semantics, NCHW in / NCHW out)
# ----------------------------------------------------------------------------
def basic_block_forward(x_nchw, p):
    x = jnp.transpose(x_nchw, (0, 2, 3, 1)).astype(jnp.bfloat16)   # -> NHWC bf16
    stride = p["stride"]

    if stride == 1:
        # conv1 -> bn1 -> relu (direct, fused)
        out = conv3x3_s1_bn_act(x, p["w1"], p["b1"], residual=None, relu=True)
        # shortcut branch
        sc = conv1x1_bn(x, p["w_sc"], p["b_sc"], stride=1) if "w_sc" in p else x
    else:
        # strided conv1 + 1x1 shortcut projection fused into one GEMM
        out, sc = conv3x3_strided_fused_shortcut(x, p["w1"], p["b1"],
                                                 p["w_sc"], p["b_sc"], stride)

    # conv2 -> bn2 -> (+shortcut) -> relu, all fused in one Pallas kernel
    out = conv3x3_s1_bn_act(out, p["w2"], p["b2"], residual=sc, relu=True)
    return jnp.transpose(out, (0, 3, 1, 2)).astype(jnp.float32)    # -> NCHW f32


# ----------------------------------------------------------------------------
if __name__ == "__main__":
    key = jax.random.PRNGKey(0)
    k_a, k_b, k_x = jax.random.split(key, 3)

    # Block A: downsampling block (stride 2, channel expansion) -> conv shortcut.
    params_down = make_basic_block_params(k_a, in_planes=16, planes=32, stride=2)
    # Block B: identity-shortcut block (stride 1, same planes).
    params_id = make_basic_block_params(k_b, in_planes=32, planes=32, stride=1)

    x = jax.random.normal(k_x, (2, 16, 16, 16), jnp.float32)      # NCHW

    @jax.jit
    def run(inp):
        y = basic_block_forward(inp, params_down)    # (2, 32, 8, 8)
        return basic_block_forward(y, params_id)     # (2, 32, 8, 8)

    out = jax.block_until_ready(run(x))
    assert out.shape == (2, 32, 8, 8), out.shape
    print("KERNEL_OK")
</pallas_src>

<mosaic_0001>
module attributes {stable_mosaic.version = 11 : i64} {
  func.func @_gemm_bias_clamp_kernel(%arg0: i32, %arg1: memref<128x256xbf16, #tpu.memory_space<vmem>>, %arg2: memref<256x128xbf16, #tpu.memory_space<vmem>>, %arg3: memref<1x128xf32, #tpu.memory_space<vmem>>, %arg4: memref<1x128xf32, #tpu.memory_space<vmem>>, %arg5: memref<128x128xbf16, #tpu.memory_space<vmem>>) attributes {dimension_semantics = [#tpu.dimension_semantics<parallel>], iteration_bounds = array<i64: 1>, scalar_prefetch = 0 : i64, scratch_operands = 0 : i64, tpu.core_type = #tpu.core_type<tc>, window_params = [{transform_indices = @transform_0, window_bounds = array<i64: 128, 256>}, {pipeline_mode = #tpu.pipeline_mode<synchronous>, transform_indices = @transform_1, window_bounds = array<i64: 256, 128>}, {pipeline_mode = #tpu.pipeline_mode<synchronous>, transform_indices = @transform_2, window_bounds = array<i64: 1, 128>}, {pipeline_mode = #tpu.pipeline_mode<synchronous>, transform_indices = @transform_3, window_bounds = array<i64: 1, 128>}, {transform_indices = @transform_4, window_bounds = array<i64: 128, 128>}]} {
    %c0 = arith.constant 0 : index
    %c0_0 = arith.constant 0 : index
    %0 = vector.load %arg1[%c0, %c0_0] : memref<128x256xbf16, #tpu.memory_space<vmem>>, vector<128x256xbf16>
    %c0_1 = arith.constant 0 : index
    %c0_2 = arith.constant 0 : index
    %1 = vector.load %arg2[%c0_1, %c0_2] : memref<256x128xbf16, #tpu.memory_space<vmem>>, vector<256x128xbf16>
    %cst = arith.constant dense<0.000000e+00> : vector<128x128xf32>
    %2 = tpu.matmul %0, %1, %cst {dimension_numbers = #tpu.dot_dimension_numbers<[1], [0], [0], [1], [0, 0, 1, 1], [], []>} : vector<128x256xbf16>, vector<256x128xbf16>, vector<128x128xf32> -> vector<128x128xf32>
    %c0_3 = arith.constant 0 : index
    %c0_4 = arith.constant 0 : index
    %3 = vector.load %arg3[%c0_3, %c0_4] : memref<1x128xf32, #tpu.memory_space<vmem>>, vector<1x128xf32>
    %4 = vector.broadcast %3 : vector<1x128xf32> to vector<128x128xf32>
    %5 = arith.addf %2, %4 : vector<128x128xf32>
    %c0_5 = arith.constant 0 : index
    %c0_6 = arith.constant 0 : index
    %6 = vector.load %arg4[%c0_5, %c0_6] : memref<1x128xf32, #tpu.memory_space<vmem>>, vector<1x128xf32>
    %7 = vector.broadcast %6 : vector<1x128xf32> to vector<128x128xf32>
    %8 = arith.maximumf %5, %7 : vector<128x128xf32>
    %9 = arith.truncf %8 : vector<128x128xf32> to vector<128x128xbf16>
    %c0_7 = arith.constant 0 : index
    %c0_8 = arith.constant 0 : index
    %10 = vector.load %arg5[%c0_7, %c0_8] : memref<128x128xbf16, #tpu.memory_space<vmem>>, vector<128x128xbf16>
    tpu.vector_store %arg5[%c0_7, %c0_8], %9 {strides = array<i32>} : memref<128x128xbf16, #tpu.memory_space<vmem>>, vector<128x128xbf16>,
    return
  }
  func.func @transform_0(%arg0: i32) -> (i32, i32) {
    %c0_i32 = arith.constant 0 : i32
    %c0_i32_0 = arith.constant 0 : i32
    return %arg0, %c0_i32 : i32, i32
  }
  func.func @transform_1(%arg0: i32) -> (i32, i32) {
    %c0_i32 = arith.constant 0 : i32
    %c0_i32_0 = arith.constant 0 : i32
    %c0_i32_1 = arith.constant 0 : i32
    return %c0_i32, %c0_i32_0 : i32, i32
  }
  func.func @transform_2(%arg0: i32) -> (i32, i32) {
    %c0_i32 = arith.constant 0 : i32
    %c0_i32_0 = arith.constant 0 : i32
    %c0_i32_1 = arith.constant 0 : i32
    return %c0_i32, %c0_i32_0 : i32, i32
  }
  func.func @transform_3(%arg0: i32) -> (i32, i32) {
    %c0_i32 = arith.constant 0 : i32
    %c0_i32_0 = arith.constant 0 : i32
    %c0_i32_1 = arith.constant 0 : i32
    return %c0_i32, %c0_i32_0 : i32, i32
  }
  func.func @transform_4(%arg0: i32) -> (i32, i32) {
    %c0_i32 = arith.constant 0 : i32
    %c0_i32_0 = arith.constant 0 : i32
    return %arg0, %c0_i32 : i32, i32
  }
}

module attributes {stable_mosaic.version = 11 : i64} {
  func.func @_conv3x3_s1_kernel(%arg0: i32, %arg1: memref<1x160x128xbf16, #tpu.memory_space<vmem>>, %arg2: memref<3x128x128xbf16, #tpu.memory_space<vmem>>, %arg3: memref<1x128xf32, #tpu.memory_space<vmem>>, %arg4: memref<1x128x128xbf16, #tpu.memory_space<vmem>>, %arg5: memref<1x128x128xbf16, #tpu.memory_space<vmem>>) attributes {dimension_semantics = [#tpu.dimension_semantics<parallel>], iteration_bounds = array<i64: 2>, scalar_prefetch = 0 : i64, scratch_operands = 0 : i64, tpu.core_type = #tpu.core_type<tc>, window_params = [{transform_indices = @transform_0, window_bounds = array<i64: 1, 160, 128>}, {pipeline_mode = #tpu.pipeline_mode<synchronous>, transform_indices = @transform_1, window_bounds = array<i64: 3, 128, 128>}, {pipeline_mode = #tpu.pipeline_mode<synchronous>, transform_indices = @transform_2, window_bounds = array<i64: 1, 128>}, {transform_indices = @transform_3, window_bounds = array<i64: 1, 128, 128>}, {transform_indices = @transform_4, window_bounds = array<i64: 1, 128, 128>}]} {
    %c0 = arith.constant 0 : index
    %c0_0 = arith.constant 0 : index
    %c0_1 = arith.constant 0 : index
    %0 = vector.load %arg1[%c0, %c0_0, %c0_1] : memref<1x160x128xbf16, #tpu.memory_space<vmem>>, vector<1x128x128xbf16>
    %1 = vector.shape_cast %0 : vector<1x128x128xbf16> to vector<128x128xbf16>
    %c0_2 = arith.constant 0 : index
    %c0_3 = arith.constant 0 : index
    %c0_4 = arith.constant 0 : index
    %2 = vector.load %arg2[%c0_2, %c0_3, %c0_4] : memref<3x128x128xbf16, #tpu.memory_space<vmem>>, vector<1x128x128xbf16>
    %3 = vector.shape_cast %2 : vector<1x128x128xbf16> to vector<128x128xbf16>
    %cst = arith.constant dense<0.000000e+00> : vector<128x128xf32>
    %4 = tpu.matmul %1, %3, %cst {dimension_numbers = #tpu.dot_dimension_numbers<[1], [0], [0], [1], [0, 0, 1, 1], [], []>} : vector<128x128xbf16>, vector<128x128xbf16>, vector<128x128xf32> -> vector<128x128xf32>
    %c0_5 = arith.constant 0 : index
    %c16 = arith.constant 16 : index
    %c0_6 = arith.constant 0 : index
    %5 = vector.load %arg1[%c0_5, %c16, %c0_6] : memref<1x160x128xbf16, #tpu.memory_space<vmem>>, vector<1x128x128xbf16>
    %6 = vector.shape_cast %5 : vector<1x128x128xbf16> to vector<128x128xbf16>
    %c1 = arith.constant 1 : index
    %c0_7 = arith.constant 0 : index
    %c0_8 = arith.constant 0 : index
    %7 = vector.load %arg2[%c1, %c0_7, %c0_8] : memref<3x128x128xbf16, #tpu.memory_space<vmem>>, vector<1x128x128xbf16>
    %8 = vector.shape_cast %7 : vector<1x128x128xbf16> to vector<128x128xbf16>
    %cst_9 = arith.constant dense<0.000000e+00> : vector<128x128xf32>
    %9 = tpu.matmul %6, %8, %cst_9 {dimension_numbers = #tpu.dot_dimension_numbers<[1], [0], [0], [1], [0, 0, 1, 1], [], []>} : vector<128x128xbf16>, vector<128x128xbf16>, vector<128x128xf32> -> vector<128x128xf32>
    %10 = arith.addf %4, %9 : vector<128x128xf32>
    %c0_10 = arith.constant 0 : index
    %c32 = arith.constant 32 : index
    %c0_11 = arith.constant 0 : index
    %11 = vector.load %arg1[%c0_10, %c32, %c0_11] : memref<1x160x128xbf16, #tpu.memory_space<vmem>>, vector<1x128x128xbf16>
    %12 = vector.shape_cast %11 : vector<1x128x128xbf16> to vector<128x128xbf16>
    %c2 = arith.constant 2 : index
    %c0_12 = arith.constant 0 : index
    %c0_13 = arith.constant 0 : index
    %13 = vector.load %arg2[%c2, %c0_12, %c0_13] : memref<3x128x128xbf16, #tpu.memory_space<vmem>>, vector<1x128x128xbf16>
    %14 = vector.shape_cast %13 : vector<1x128x128xbf16> to vector<128x128xbf16>
    %cst_14 = arith.constant dense<0.000000e+00> : vector<128x128xf32>
    %15 = tpu.matmul %12, %14, %cst_14 {dimension_numbers = #tpu.dot_dimension_numbers<[1], [0], [0], [1], [0, 0, 1, 1], [], []>} : vector<128x128xbf16>, vector<128x128xbf16>, vector<128x128xf32> -> vector<128x128xf32>
    %16 = arith.addf %10, %15 : vector<128x128xf32>
    %c0_15 = arith.constant 0 : index
    %c0_16 = arith.constant 0 : index
    %17 = vector.load %arg3[%c0_15, %c0_16] : memref<1x128xf32, #tpu.memory_space<vmem>>, vector<1x128xf32>
    %18 = vector.broadcast %17 : vector<1x128xf32> to vector<128x128xf32>
    %19 = arith.addf %16, %18 : vector<128x128xf32>
    %c0_17 = arith.constant 0 : index
    %c0_18 = arith.constant 0 : index
    %c0_19 = arith.constant 0 : index
    %20 = vector.load %arg4[%c0_17, %c0_18, %c0_19] : memref<1x128x128xbf16, #tpu.memory_space<vmem>>, vector<1x128x128xbf16>
    %21 = vector.shape_cast %20 : vector<1x128x128xbf16> to vector<128x128xbf16>
    %22 = arith.extf %21 : vector<128x128xbf16> to vector<128x128xf32>
    %23 = arith.addf %19, %22 : vector<128x128xf32>
    %cst_20 = arith.constant 0.000000e+00 : f32
    %24 = vector.broadcast %cst_20 : f32 to vector<128x128xf32>
    %25 = arith.maximumf %23, %24 : vector<128x128xf32>
    %26 = arith.truncf %25 : vector<128x128xf32> to vector<128x128xbf16>
    %c0_21 = arith.constant 0 : index
    %c0_22 = arith.constant 0 : index
    %c0_23 = arith.constant 0 : index
    %27 = vector.load %arg5[%c0_21, %c0_22, %c0_23] : memref<1x128x128xbf16, #tpu.memory_space<vmem>>, vector<1x128x128xbf16>
    %28 = vector.shape_cast %27 : vector<1x128x128xbf16> to vector<128x128xbf16>
    %29 = vector.shape_cast %26 : vector<128x128xbf16> to vector<1x128x128xbf16>
    tpu.vector_store %arg5[%c0_21, %c0_22, %c0_23], %29 {strides = array<i32>} : memref<1x128x128xbf16, #tpu.memory_space<vmem>>, vector<1x128x128xbf16>,
    return
  }
  func.func @transform_0(%arg0: i32) -> (i32, i32, i32) {
    %c0_i32 = arith.constant 0 : i32
    %c0_i32_0 = arith.constant 0 : i32
    %c0_i32_1 = arith.constant 0 : i32
    return %arg0, %c0_i32, %c0_i32_0 : i32, i32, i32
  }
  func.func @transform_1(%arg0: i32) -> (i32, i32, i32) {
    %c0_i32 = arith.constant 0 : i32
    %c0_i32_0 = arith.constant 0 : i32
    %c0_i32_1 = arith.constant 0 : i32
    %c0_i32_2 = arith.constant 0 : i32
    return %c0_i32, %c0_i32_0, %c0_i32_1 : i32, i32, i32
  }
  func.func @transform_2(%arg0: i32) -> (i32, i32) {
    %c0_i32 = arith.constant 0 : i32
    %c0_i32_0 = arith.constant 0 : i32
    %c0_i32_1 = arith.constant 0 : i32
    return %c0_i32, %c0_i32_0 : i32, i32
  }
  func.func @transform_3(%arg0: i32) -> (i32, i32, i32) {
    %c0_i32 = arith.constant 0 : i32
    %c0_i32_0 = arith.constant 0 : i32
    %c0_i32_1 = arith.constant 0 : i32
    return %arg0, %c0_i32, %c0_i32_0 : i32, i32, i32
  }
  func.func @transform_4(%arg0: i32) -> (i32, i32, i32) {
    %c0_i32 = arith.constant 0 : i32
    %c0_i32_0 = arith.constant 0 : i32
    %c0_i32_1 = arith.constant 0 : i32
    return %arg0, %c0_i32, %c0_i32_0 : i32, i32, i32
  }
}

module attributes {stable_mosaic.version = 11 : i64} {
  func.func @_conv3x3_s1_kernel(%arg0: i32, %arg1: memref<1x160x128xbf16, #tpu.memory_space<vmem>>, %arg2: memref<3x128x128xbf16, #tpu.memory_space<vmem>>, %arg3: memref<1x128xf32, #tpu.memory_space<vmem>>, %arg4: memref<1x128x128xbf16, #tpu.memory_space<vmem>>) attributes {dimension_semantics = [#tpu.dimension_semantics<parallel>], iteration_bounds = array<i64: 2>, scalar_prefetch = 0 : i64, scratch_operands = 0 : i64, tpu.core_type = #tpu.core_type<tc>, window_params = [{transform_indices = @transform_0, window_bounds = array<i64: 1, 160, 128>}, {pipeline_mode = #tpu.pipeline_mode<synchronous>, transform_indices = @transform_1, window_bounds = array<i64: 3, 128, 128>}, {pipeline_mode = #tpu.pipeline_mode<synchronous>, transform_indices = @transform_2, window_bounds = array<i64: 1, 128>}, {transform_indices = @transform_3, window_bounds = array<i64: 1, 128, 128>}]} {
    %c0 = arith.constant 0 : index
    %c0_0 = arith.constant 0 : index
    %c0_1 = arith.constant 0 : index
    %0 = vector.load %arg1[%c0, %c0_0, %c0_1] : memref<1x160x128xbf16, #tpu.memory_space<vmem>>, vector<1x128x128xbf16>
    %1 = vector.shape_cast %0 : vector<1x128x128xbf16> to vector<128x128xbf16>
    %c0_2 = arith.constant 0 : index
    %c0_3 = arith.constant 0 : index
    %c0_4 = arith.constant 0 : index
    %2 = vector.load %arg2[%c0_2, %c0_3, %c0_4] : memref<3x128x128xbf16, #tpu.memory_space<vmem>>, vector<1x128x128xbf16>
    %3 = vector.shape_cast %2 : vector<1x128x128xbf16> to vector<128x128xbf16>
    %cst = arith.constant dense<0.000000e+00> : vector<128x128xf32>
    %4 = tpu.matmul %1, %3, %cst {dimension_numbers = #tpu.dot_dimension_numbers<[1], [0], [0], [1], [0, 0, 1, 1], [], []>} : vector<128x128xbf16>, vector<128x128xbf16>, vector<128x128xf32> -> vector<128x128xf32>
    %c0_5 = arith.constant 0 : index
    %c16 = arith.constant 16 : index
    %c0_6 = arith.constant 0 : index
    %5 = vector.load %arg1[%c0_5, %c16, %c0_6] : memref<1x160x128xbf16, #tpu.memory_space<vmem>>, vector<1x128x128xbf16>
    %6 = vector.shape_cast %5 : vector<1x128x128xbf16> to vector<128x128xbf16>
    %c1 = arith.constant 1 : index
    %c0_7 = arith.constant 0 : index
    %c0_8 = arith.constant 0 : index
    %7 = vector.load %arg2[%c1, %c0_7, %c0_8] : memref<3x128x128xbf16, #tpu.memory_space<vmem>>, vector<1x128x128xbf16>
    %8 = vector.shape_cast %7 : vector<1x128x128xbf16> to vector<128x128xbf16>
    %cst_9 = arith.constant dense<0.000000e+00> : vector<128x128xf32>
    %9 = tpu.matmul %6, %8, %cst_9 {dimension_numbers = #tpu.dot_dimension_numbers<[1], [0], [0], [1], [0, 0, 1, 1], [], []>} : vector<128x128xbf16>, vector<128x128xbf16>, vector<128x128xf32> -> vector<128x128xf32>
    %10 = arith.addf %4, %9 : vector<128x128xf32>
    %c0_10 = arith.constant 0 : index
    %c32 = arith.constant 32 : index
    %c0_11 = arith.constant 0 : index
    %11 = vector.load %arg1[%c0_10, %c32, %c0_11] : memref<1x160x128xbf16, #tpu.memory_space<vmem>>, vector<1x128x128xbf16>
    %12 = vector.shape_cast %11 : vector<1x128x128xbf16> to vector<128x128xbf16>
    %c2 = arith.constant 2 : index
    %c0_12 = arith.constant 0 : index
    %c0_13 = arith.constant 0 : index
    %13 = vector.load %arg2[%c2, %c0_12, %c0_13] : memref<3x128x128xbf16, #tpu.memory_space<vmem>>, vector<1x128x128xbf16>
    %14 = vector.shape_cast %13 : vector<1x128x128xbf16> to vector<128x128xbf16>
    %cst_14 = arith.constant dense<0.000000e+00> : vector<128x128xf32>
    %15 = tpu.matmul %12, %14, %cst_14 {dimension_numbers = #tpu.dot_dimension_numbers<[1], [0], [0], [1], [0, 0, 1, 1], [], []>} : vector<128x128xbf16>, vector<128x128xbf16>, vector<128x128xf32> -> vector<128x128xf32>
    %16 = arith.addf %10, %15 : vector<128x128xf32>
    %c0_15 = arith.constant 0 : index
    %c0_16 = arith.constant 0 : index
    %17 = vector.load %arg3[%c0_15, %c0_16] : memref<1x128xf32, #tpu.memory_space<vmem>>, vector<1x128xf32>
    %18 = vector.broadcast %17 : vector<1x128xf32> to vector<128x128xf32>
    %19 = arith.addf %16, %18 : vector<128x128xf32>
    %cst_17 = arith.constant 0.000000e+00 : f32
    %20 = vector.broadcast %cst_17 : f32 to vector<128x128xf32>
    %21 = arith.maximumf %19, %20 : vector<128x128xf32>
    %22 = arith.truncf %21 : vector<128x128xf32> to vector<128x128xbf16>
    %c0_18 = arith.constant 0 : index
    %c0_19 = arith.constant 0 : index
    %c0_20 = arith.constant 0 : index
    %23 = vector.load %arg4[%c0_18, %c0_19, %c0_20] : memref<1x128x128xbf16, #tpu.memory_space<vmem>>, vector<1x128x128xbf16>
    %24 = vector.shape_cast %23 : vector<1x128x128xbf16> to vector<128x128xbf16>
    %25 = vector.shape_cast %22 : vector<128x128xbf16> to vector<1x128x128xbf16>
    tpu.vector_store %arg4[%c0_18, %c0_19, %c0_20], %25 {strides = array<i32>} : memref<1x128x128xbf16, #tpu.memory_space<vmem>>, vector<1x128x128xbf16>,
    return
  }
  func.func @transform_0(%arg0: i32) -> (i32, i32, i32) {
    %c0_i32 = arith.constant 0 : i32
    %c0_i32_0 = arith.constant 0 : i32
    %c0_i32_1 = arith.constant 0 : i32
    return %arg0, %c0_i32, %c0_i32_0 : i32, i32, i32
  }
  func.func @transform_1(%arg0: i32) -> (i32, i32, i32) {
    %c0_i32 = arith.constant 0 : i32
    %c0_i32_0 = arith.constant 0 : i32
    %c0_i32_1 = arith.constant 0 : i32
    %c0_i32_2 = arith.constant 0 : i32
    return %c0_i32, %c0_i32_0, %c0_i32_1 : i32, i32, i32
  }
  func.func @transform_2(%arg0: i32) -> (i32, i32) {
    %c0_i32 = arith.constant 0 : i32
    %c0_i32_0 = arith.constant 0 : i32
    %c0_i32_1 = arith.constant 0 : i32
    return %c0_i32, %c0_i32_0 : i32, i32
  }
  func.func @transform_3(%arg0: i32) -> (i32, i32, i32) {
    %c0_i32 = arith.constant 0 : i32
    %c0_i32_0 = arith.constant 0 : i32
    %c0_i32_1 = arith.constant 0 : i32
    return %arg0, %c0_i32, %c0_i32_0 : i32, i32, i32
  }
}

module attributes {stable_mosaic.version = 11 : i64} {
  func.func @_conv3x3_s1_kernel(%arg0: i32, %arg1: memref<1x160x128xbf16, #tpu.memory_space<vmem>>, %arg2: memref<3x128x128xbf16, #tpu.memory_space<vmem>>, %arg3: memref<1x128xf32, #tpu.memory_space<vmem>>, %arg4: memref<1x128x128xbf16, #tpu.memory_space<vmem>>, %arg5: memref<1x128x128xbf16, #tpu.memory_space<vmem>>) attributes {dimension_semantics = [#tpu.dimension_semantics<parallel>], iteration_bounds = array<i64: 2>, scalar_prefetch = 0 : i64, scratch_operands = 0 : i64, tpu.core_type = #tpu.core_type<tc>, window_params = [{transform_indices = @transform_0, window_bounds = array<i64: 1, 160, 128>}, {pipeline_mode = #tpu.pipeline_mode<synchronous>, transform_indices = @transform_1, window_bounds = array<i64: 3, 128, 128>}, {pipeline_mode = #tpu.pipeline_mode<synchronous>, transform_indices = @transform_2, window_bounds = array<i64: 1, 128>}, {transform_indices = @transform_3, window_bounds = array<i64: 1, 128, 128>}, {transform_indices = @transform_4, window_bounds = array<i64: 1, 128, 128>}]} {
    %c0 = arith.constant 0 : index
    %c0_0 = arith.constant 0 : index
    %c0_1 = arith.constant 0 : index
    %0 = vector.load %arg1[%c0, %c0_0, %c0_1] : memref<1x160x128xbf16, #tpu.memory_space<vmem>>, vector<1x128x128xbf16>
    %1 = vector.shape_cast %0 : vector<1x128x128xbf16> to vector<128x128xbf16>
    %c0_2 = arith.constant 0 : index
    %c0_3 = arith.constant 0 : index
    %c0_4 = arith.constant 0 : index
    %2 = vector.load %arg2[%c0_2, %c0_3, %c0_4] : memref<3x128x128xbf16, #tpu.memory_space<vmem>>, vector<1x128x128xbf16>
    %3 = vector.shape_cast %2 : vector<1x128x128xbf16> to vector<128x128xbf16>
    %cst = arith.constant dense<0.000000e+00> : vector<128x128xf32>
    %4 = tpu.matmul %1, %3, %cst {dimension_numbers = #tpu.dot_dimension_numbers<[1], [0], [0], [1], [0, 0, 1, 1], [], []>} : vector<128x128xbf16>, vector<128x128xbf16>, vector<128x128xf32> -> vector<128x128xf32>
    %c0_5 = arith.constant 0 : index
    %c16 = arith.constant 16 : index
    %c0_6 = arith.constant 0 : index
    %5 = vector.load %arg1[%c0_5, %c16, %c0_6] : memref<1x160x128xbf16, #tpu.memory_space<vmem>>, vector<1x128x128xbf16>
    %6 = vector.shape_cast %5 : vector<1x128x128xbf16> to vector<128x128xbf16>
    %c1 = arith.constant 1 : index
    %c0_7 = arith.constant 0 : index
    %c0_8 = arith.constant 0 : index
    %7 = vector.load %arg2[%c1, %c0_7, %c0_8] : memref<3x128x128xbf16, #tpu.memory_space<vmem>>, vector<1x128x128xbf16>
    %8 = vector.shape_cast %7 : vector<1x128x128xbf16> to vector<128x128xbf16>
    %cst_9 = arith.constant dense<0.000000e+00> : vector<128x128xf32>
    %9 = tpu.matmul %6, %8, %cst_9 {dimension_numbers = #tpu.dot_dimension_numbers<[1], [0], [0], [1], [0, 0, 1, 1], [], []>} : vector<128x128xbf16>, vector<128x128xbf16>, vector<128x128xf32> -> vector<128x128xf32>
    %10 = arith.addf %4, %9 : vector<128x128xf32>
    %c0_10 = arith.constant 0 : index
    %c32 = arith.constant 32 : index
    %c0_11 = arith.constant 0 : index
    %11 = vector.load %arg1[%c0_10, %c32, %c0_11] : memref<1x160x128xbf16, #tpu.memory_space<vmem>>, vector<1x128x128xbf16>
    %12 = vector.shape_cast %11 : vector<1x128x128xbf16> to vector<128x128xbf16>
    %c2 = arith.constant 2 : index
    %c0_12 = arith.constant 0 : index
    %c0_13 = arith.constant 0 : index
    %13 = vector.load %arg2[%c2, %c0_12, %c0_13] : memref<3x128x128xbf16, #tpu.memory_space<vmem>>, vector<1x128x128xbf16>
    %14 = vector.shape_cast %13 : vector<1x128x128xbf16> to vector<128x128xbf16>
    %cst_14 = arith.constant dense<0.000000e+00> : vector<128x128xf32>
    %15 = tpu.matmul %12, %14, %cst_14 {dimension_numbers = #tpu.dot_dimension_numbers<[1], [0], [0], [1], [0, 0, 1, 1], [], []>} : vector<128x128xbf16>, vector<128x128xbf16>, vector<128x128xf32> -> vector<128x128xf32>
    %16 = arith.addf %10, %15 : vector<128x128xf32>
    %c0_15 = arith.constant 0 : index
    %c0_16 = arith.constant 0 : index
    %17 = vector.load %arg3[%c0_15, %c0_16] : memref<1x128xf32, #tpu.memory_space<vmem>>, vector<1x128xf32>
    %18 = vector.broadcast %17 : vector<1x128xf32> to vector<128x128xf32>
    %19 = arith.addf %16, %18 : vector<128x128xf32>
    %c0_17 = arith.constant 0 : index
    %c0_18 = arith.constant 0 : index
    %c0_19 = arith.constant 0 : index
    %20 = vector.load %arg4[%c0_17, %c0_18, %c0_19] : memref<1x128x128xbf16, #tpu.memory_space<vmem>>, vector<1x128x128xbf16>
    %21 = vector.shape_cast %20 : vector<1x128x128xbf16> to vector<128x128xbf16>
    %22 = arith.extf %21 : vector<128x128xbf16> to vector<128x128xf32>
    %23 = arith.addf %19, %22 : vector<128x128xf32>
    %cst_20 = arith.constant 0.000000e+00 : f32
    %24 = vector.broadcast %cst_20 : f32 to vector<128x128xf32>
    %25 = arith.maximumf %23, %24 : vector<128x128xf32>
    %26 = arith.truncf %25 : vector<128x128xf32> to vector<128x128xbf16>
    %c0_21 = arith.constant 0 : index
    %c0_22 = arith.constant 0 : index
    %c0_23 = arith.constant 0 : index
    %27 = vector.load %arg5[%c0_21, %c0_22, %c0_23] : memref<1x128x128xbf16, #tpu.memory_space<vmem>>, vector<1x128x128xbf16>
    %28 = vector.shape_cast %27 : vector<1x128x128xbf16> to vector<128x128xbf16>
    %29 = vector.shape_cast %26 : vector<128x128xbf16> to vector<1x128x128xbf16>
    tpu.vector_store %arg5[%c0_21, %c0_22, %c0_23], %29 {strides = array<i32>} : memref<1x128x128xbf16, #tpu.memory_space<vmem>>, vector<1x128x128xbf16>,
    return
  }
  func.func @transform_0(%arg0: i32) -> (i32, i32, i32) {
    %c0_i32 = arith.constant 0 : i32
    %c0_i32_0 = arith.constant 0 : i32
    %c0_i32_1 = arith.constant 0 : i32
    return %arg0, %c0_i32, %c0_i32_0 : i32, i32, i32
  }
  func.func @transform_1(%arg0: i32) -> (i32, i32, i32) {
    %c0_i32 = arith.constant 0 : i32
    %c0_i32_0 = arith.constant 0 : i32
    %c0_i32_1 = arith.constant 0 : i32
    %c0_i32_2 = arith.constant 0 : i32
    return %c0_i32, %c0_i32_0, %c0_i32_1 : i32, i32, i32
  }
  func.func @transform_2(%arg0: i32) -> (i32, i32) {
    %c0_i32 = arith.constant 0 : i32
    %c0_i32_0 = arith.constant 0 : i32
    %c0_i32_1 = arith.constant 0 : i32
    return %c0_i32, %c0_i32_0 : i32, i32
  }
  func.func @transform_3(%arg0: i32) -> (i32, i32, i32) {
    %c0_i32 = arith.constant 0 : i32
    %c0_i32_0 = arith.constant 0 : i32
    %c0_i32_1 = arith.constant 0 : i32
    return %arg0, %c0_i32, %c0_i32_0 : i32, i32, i32
  }
  func.func @transform_4(%arg0: i32) -> (i32, i32, i32) {
    %c0_i32 = arith.constant 0 : i32
    %c0_i32_0 = arith.constant 0 : i32
    %c0_i32_1 = arith.constant 0 : i32
    return %arg0, %c0_i32, %c0_i32_0 : i32, i32, i32
  }
}

</mosaic_0001>

<bundles_post_ra>
// kernel: run.11
= control target key start
LH: loop header
LB: loop body
LE: loop exit
PB: predicated region body
PF: predicated region fallthrough
CT: control target
= control target key end

     0   :  { %s1547_s0 = inlined_call_operand.vmem [shape: bf16[256,128], index: 0, kind: input, shape index: {}]   ;;  %s1548_s1 = inlined_call_operand.vmem [shape: f32[1,128], index: 1, kind: input, shape index: {}]   ;;  %s1549_s2 = inlined_call_operand.vmem [shape: f32[1,128], index: 2, kind: input, shape index: {}]   ;;  %s1550_s3 = inlined_call_operand.vmem [shape: bf16[128,144], index: 3, kind: input, shape index: {}]   ;;  %s1551_s4 = inlined_call_operand.<no memory space> [shape: bf16[], index: 4, kind: input, shape index: {}]   ;;  %s1552_s5 = inlined_call_operand.vmem [shape: bf16[128,128], index: 5, kind: output, shape index: {}]  }
   0x1   :  { %v10_v0 = vstv %s1551_s4 }
   0x2   :  { %v1284_v1 = vunpack.i.l.bf16 %v10_v0 }
   0x3   :  { %v1177_v2 = vld [vmem:[%s1547_s0 + $0x38] sm:$0xff]  ;;  %v48_v4 = vlaneseq  ;;  %v1176_v5 = vld [vmem:[%s1547_s0 + $0x30] sm:$0xff]  ;;  %v1175_v9 = vld [vmem:[%s1547_s0 + $0x28] sm:$0xff] }
   0x4   :  { %v1185_v3 = vld [vmem:[%s1547_s0 + $0x78] sm:$0xff]  ;;  %841 = vmatpush.bf16.msra.mxu0 %v1177_v2  ;;  %1233 = vmatpush.bf16.msra.mxu2 %v1177_v2  ;;  %v1184_v7 = vld [vmem:[%s1547_s0 + $0x70] sm:$0xff]  ;;  %v23_v10 = vld [vmem:[%s1550_s3] sm:$0xf] }
   0x5   :  { %v49_v6 = vand.u32 127, %v48_v4  ;;  %890 = vmatpush.bf16.msra.mxu1 %v1185_v3  ;;  %1241 = vmatpush.bf16.msra.mxu3 %v1185_v3  ;;  %v996_v11 = vld [vmem:[%s1550_s3 + $0x8] sm:$0xf]  ;;  %34 = vst [vmem:[#allocation7] sm:$0xf] %v23_v10  ;;  %v1174_v16 = vld [vmem:[%s1547_s0 + $0x20] sm:$0xff] }
   0x6   :  { %v1010_v12 = vld [vmem:[%s1550_s3 + $0x40] sm:$0xf]  ;;  %v1012_v13 = vld [vmem:[%s1550_s3 + $0x48] sm:$0xf]  ;;  %71 = vst [vmem:[#allocation7 + $0x8] sm:$0xf] %v996_v11 }
   0x7   :  { %v1298_v8 = vadd.s32 128, %v49_v6  ;;  %v1183_v14 = vld [vmem:[%s1547_s0 + $0x68] sm:$0xff]  ;;  %v995_v15 = vld [vmem:[%s1550_s3 + $0x4] sm:$0xf]  ;;  %330 = vst [vmem:[#allocation7 + $0x40] sm:$0xf] %v1010_v12 }
   0x8   :  { %842 = vmatpush.bf16.msra.mxu0 %v1176_v5  ;;  %1234 = vmatpush.bf16.msra.mxu2 %v1176_v5  ;;  %v46_v17 = vunpack.c.l.bf16 %v995_v15  ;;  %v997_v18 = vld [vmem:[%s1550_s3 + $0xc] sm:$0xf]  ;;  %v1011_v19 = vld [vmem:[%s1550_s3 + $0x44] sm:$0xf]  ;;  %367 = vst [vmem:[#allocation7 + $0x48] sm:$0xf] %v1012_v13 }
   0x9   :  { %891 = vmatpush.bf16.msra.mxu1 %v1184_v7  ;;  %1242 = vmatpush.bf16.msra.mxu3 %v1184_v7  ;;  %vm51_vm0 = vcmp.lt.s32.totalorder %v1298_v8, 144  ;;  %v83_v20 = vunpack.c.l.bf16 %v997_v18  ;;  %v342_v21 = vunpack.c.l.bf16 %v1011_v19  ;;  %v1013_v22 = vld [vmem:[%s1550_s3 + $0x4c] sm:$0xf]  ;;  %v998_v23 = vld [vmem:[%s1550_s3 + $0x10] sm:$0xf]  ;;  %v1182_v28 = vld [vmem:[%s1547_s0 + $0x60] sm:$0xff] }
   0xa   :  { %v52_v24 = vsel %vm51_vm0, %v46_v17, %v1284_v1  ;;  %v379_v25 = vunpack.c.l.bf16 %v1013_v22  ;;  %108 = vst [vmem:[#allocation7 + $0x10] sm:$0xf] %v998_v23  ;;  %v1000_v26 = vld [vmem:[%s1550_s3 + $0x18] sm:$0xf]  ;;  %v1014_v27 = vld [vmem:[%s1550_s3 + $0x50] sm:$0xf] }
   0xb   :  { %v54_v29 = vpack.c.bf16 0.0, %v52_v24  ;;  %v89_v30 = vsel %vm51_vm0, %v83_v20, %v1284_v1  ;;  %v348_v31 = vsel %vm51_vm0, %v342_v21, %v1284_v1  ;;  %145 = vst [vmem:[#allocation7 + $0x18] sm:$0xf] %v1000_v26  ;;  %v999_v35 = vld [vmem:[%s1550_s3 + $0x14] sm:$0xf]  ;;  %v1173_v36 = vld [vmem:[%s1547_s0 + $0x18] sm:$0xff] }
   0xc   :  { %843 = vmatpush.bf16.msra.mxu0 %v1175_v9  ;;  %1235 = vmatpush.bf16.msra.mxu2 %v1175_v9  ;;  %v91_v32 = vpack.c.bf16 0.0, %v89_v30  ;;  %v350_v33 = vpack.c.bf16 0.0, %v348_v31  ;;  %v385_v34 = vsel %vm51_vm0, %v379_v25, %v1284_v1  ;;  %404 = vst [vmem:[#allocation7 + $0x50] sm:$0xf] %v1014_v27  ;;  %v120_v38 = vunpack.c.l.bf16 %v999_v35  ;;  %v1016_v39 = vld [vmem:[%s1550_s3 + $0x58] sm:$0xf] }
   0xd   :  { %892 = vmatpush.bf16.msra.mxu1 %v1183_v14  ;;  %1243 = vmatpush.bf16.msra.mxu3 %v1183_v14  ;;  %57 = vst [vmem:[#allocation7 + $0x4] sm:$0xf] %v54_v29  ;;  %v387_v37 = vpack.c.bf16 0.0, %v385_v34  ;;  %v1001_v40 = vld [vmem:[%s1550_s3 + $0x1c] sm:$0xf]  ;;  %v1172_v49 = vld [vmem:[%s1547_s0 + $0x10] sm:$0xff] }
   0xe   :  { %94 = vst [vmem:[#allocation7 + $0xc] sm:$0xf] %v91_v32  ;;  %v1181_v41 = vld [vmem:[%s1547_s0 + $0x58] sm:$0xff]  ;;  %v126_v42 = vsel %vm51_vm0, %v120_v38, %v1284_v1  ;;  %v157_v43 = vunpack.c.l.bf16 %v1001_v40  ;;  %v1015_v44 = vld [vmem:[%s1550_s3 + $0x54] sm:$0xf]  ;;  %v1171_v59 = vld [vmem:[%s1547_s0 + $0x8] sm:$0xff] }
   0xf   :  { %353 = vst [vmem:[#allocation7 + $0x44] sm:$0xf] %v350_v33  ;;  %v128_v45 = vpack.c.bf16 0.0, %v126_v42  ;;  %v416_v46 = vunpack.c.l.bf16 %v1015_v44  ;;  %v1017_v48 = vld [vmem:[%s1550_s3 + $0x5c] sm:$0xf]  ;;  %v1180_v53 = vld [vmem:[%s1547_s0 + $0x50] sm:$0xff] }
  0x10   :  { %844 = vmatpush.bf16.msra.mxu0 %v1174_v16  ;;  %1236 = vmatpush.bf16.msra.mxu2 %v1174_v16  ;;  %390 = vst [vmem:[#allocation7 + $0x4c] sm:$0xf] %v387_v37  ;;  %v163_v47 = vsel %vm51_vm0, %v157_v43, %v1284_v1  ;;  %v453_v52 = vunpack.c.l.bf16 %v1017_v48  ;;  %v1002_v55 = vld [vmem:[%s1550_s3 + $0x20] sm:$0xf]  ;;  %v1004_v58 = vld [vmem:[%s1550_s3 + $0x28] sm:$0xf] }
  0x11   :  { %893 = vmatpush.bf16.msra.mxu1 %v1182_v28  ;;  %1244 = vmatpush.bf16.msra.mxu3 %v1182_v28  ;;  %441 = vst [vmem:[#allocation7 + $0x58] sm:$0xf] %v1016_v39  ;;  %v165_v50 = vpack.c.bf16 0.0, %v163_v47  ;;  %v422_v51 = vsel %vm51_vm0, %v416_v46, %v1284_v1  ;;  %v1003_v60 = vld [vmem:[%s1550_s3 + $0x24] sm:$0xf]  ;;  %v1179_v61 = vld [vmem:[%s1547_s0 + $0x48] sm:$0xff] }
  0x12   :  { %131 = vst [vmem:[#allocation7 + $0x14] sm:$0xf] %v128_v45  ;;  %v424_v54 = vpack.c.bf16 0.0, %v422_v51  ;;  %v459_v56 = vsel %vm51_vm0, %v453_v52, %v1284_v1  ;;  %v1018_v62 = vld [vmem:[%s1550_s3 + $0x60] sm:$0xf]  ;;  %v194_v63 = vunpack.c.l.bf16 %v1003_v60 }
  0x13   :  { %168 = vst [vmem:[#allocation7 + $0x1c] sm:$0xf] %v165_v50  ;;  %v461_v57 = vpack.c.bf16 0.0, %v459_v56  ;;  %v1170_v0 = vld [vmem:[%s1547_s0] sm:$0xff]  ;;  %v1155_v3 = vld [vmem:[#allocation7 + $0x4] sm:$0xf0] }
  0x14   :  { %845 = vmatpush.bf16.msra.mxu0 %v1173_v36  ;;  %1237 = vmatpush.bf16.msra.mxu2 %v1173_v36  ;;  %427 = vst [vmem:[#allocation7 + $0x54] sm:$0xf] %v424_v54  ;;  %v1028_v2 = vld [vmem:[#allocation7] sm:$0xf]  ;;  %v1163_v5 = vld [vmem:[#allocation7 + $0x44] sm:$0xf0]  ;;  %v200_v11 = vsel %vm51_vm0, %v194_v63, %v1284_v1 }
  0x15   :  { %894 = vmatpush.bf16.msra.mxu1 %v1181_v41  ;;  %1245 = vmatpush.bf16.msra.mxu3 %v1181_v41  ;;  %182 = vst [vmem:[#allocation7 + $0x20] sm:$0xf] %v1002_v55  ;;  %v1060_v4 = vld [vmem:[#allocation7 + $0x40] sm:$0xf]  ;;  %v1020_v6 = vld [vmem:[%s1550_s3 + $0x68] sm:$0xf]  ;;  %v1029_v22 = vor.u32 %v1155_v3, %v1028_v2 }
  0x16   :  { %464 = vst [vmem:[#allocation7 + $0x5c] sm:$0xf] %v461_v57  ;;  %v1154_v7 = vld [vmem:[#allocation7 + $0x4] sm:$0xf]  ;;  %v1030_v9 = vld [vmem:[#allocation7 + $0x8] sm:$0xf0]  ;;  %v1061_v23 = vor.u32 %v1163_v5, %v1060_v4 }
  0x17   :  { %219 = vst [vmem:[#allocation7 + $0x28] sm:$0xf] %v1004_v58  ;;  %v1162_v10 = vld [vmem:[#allocation7 + $0x44] sm:$0xf]  ;;  %v1005_v12 = vld [vmem:[%s1550_s3 + $0x2c] sm:$0xf]  ;;  %v1033_v26 = vor.u32 %v1154_v7, %v1030_v9 }
  0x18   :  { %846 = vmatpush.bf16.msra.mxu0 %v1172_v49  ;;  %1238 = vmatpush.bf16.msra.mxu2 %v1172_v49  ;;  %478 = vst [vmem:[#allocation7 + $0x60] sm:$0xf] %v1018_v62  ;;  %v1178_v13 = vld [vmem:[%s1547_s0 + $0x40] sm:$0xff]  ;;  %v202_v14 = vpack.c.bf16 0.0, %v200_v11  ;;  %v231_v15 = vunpack.c.l.bf16 %v1005_v12  ;;  %v1062_v17 = vld [vmem:[#allocation7 + $0x48] sm:$0xf0] }
  0x19   :  { %895 = vmatpush.bf16.msra.mxu1 %v1180_v53  ;;  %1246 = vmatpush.bf16.msra.mxu3 %v1180_v53  ;;  %515 = vst [vmem:[#allocation7 + $0x68] sm:$0xf] %v1020_v6  ;;  %v1019_v16 = vld [vmem:[%s1550_s3 + $0x64] sm:$0xf]  ;;  %v1021_v19 = vld [vmem:[%s1550_s3 + $0x6c] sm:$0xf]  ;;  %v1065_v27 = vor.u32 %v1162_v10, %v1062_v17 }
  0x1a   :  { %v490_v18 = vunpack.c.l.bf16 %v1019_v16  ;;  %205 = vst [vmem:[#allocation7 + $0x24] sm:$0xf] %v202_v14  ;;  %v237_v20 = vsel %vm51_vm0, %v231_v15, %v1284_v1  ;;  %v527_v21 = vunpack.c.l.bf16 %v1021_v19  ;;  %v1006_v31 = vld [vmem:[%s1550_s3 + $0x30] sm:$0xf]  ;;  %v1008_v32 = vld [vmem:[%s1550_s3 + $0x38] sm:$0xf] }
  0x1b   :  { %v239_v24 = vpack.c.bf16 0.0, %v237_v20  ;;  %v1007_v33 = vld [vmem:[%s1550_s3 + $0x34] sm:$0xf]  ;;  %256 = vst [vmem:[#allocation7 + $0x30] sm:$0xf] %v1006_v31 }
  0x1c   :  { %847 = vmatpush.bf16.msra.mxu0 %v1171_v59  ;;  %1239 = vmatpush.bf16.msra.mxu2 %v1171_v59  ;;  %v496_v25 = vsel %vm51_vm0, %v490_v18, %v1284_v1  ;;  %v533_v29 = vsel %vm51_vm0, %v527_v21, %v1284_v1  ;;  %v268_v34 = vunpack.c.l.bf16 %v1007_v33  ;;  %v1009_v35 = vld [vmem:[%s1550_s3 + $0x3c] sm:$0xf]  ;;  %293 = vst [vmem:[#allocation7 + $0x38] sm:$0xf] %v1008_v32  ;;  %v1023_v37 = vld [vmem:[%s1550_s3 + $0x74] sm:$0xf] }
  0x1d   :  { %896 = vmatpush.bf16.msra.mxu1 %v1179_v61  ;;  %1247 = vmatpush.bf16.msra.mxu3 %v1179_v61  ;;  %v498_v28 = vpack.c.bf16 0.0, %v496_v25  ;;  %242 = vst [vmem:[#allocation7 + $0x2c] sm:$0xf] %v239_v24  ;;  %v535_v30 = vpack.c.bf16 0.0, %v533_v29  ;;  %v305_v36 = vunpack.c.l.bf16 %v1009_v35  ;;  %v1025_v38 = vld [vmem:[%s1550_s3 + $0x7c] sm:$0xf]  ;;  %v564_v40 = vunpack.c.l.bf16 %v1023_v37 }
  0x1e   :  { %v274_v39 = vsel %vm51_vm0, %v268_v34, %v1284_v1  ;;  %v601_v41 = vunpack.c.l.bf16 %v1025_v38  ;;  %v1022_v44 = vld [vmem:[%s1550_s3 + $0x70] sm:$0xf]  ;;  %v1024_v45 = vld [vmem:[%s1550_s3 + $0x78] sm:$0xf]  ;;  %v1156_v55 = vld [vmem:[#allocation7 + $0x14] sm:$0xf] }
  0x1f   :  { %501 = vst [vmem:[#allocation7 + $0x64] sm:$0xf] %v498_v28  ;;  %v276_v42 = vpack.c.bf16 0.0, %v274_v39  ;;  %v311_v43 = vsel %vm51_vm0, %v305_v36, %v1284_v1  ;;  %v570_v46 = vsel %vm51_vm0, %v564_v40, %v1284_v1  ;;  %v1036_v48 = vld [vmem:[#allocation7 + $0x10] sm:$0xf] }
  0x20   :  { %848 = vmatpush.bf16.msra.mxu0 %v1170_v0  ;;  %1240 = vmatpush.bf16.msra.mxu2 %v1170_v0  ;;  %538 = vst [vmem:[#allocation7 + $0x6c] sm:$0xf] %v535_v30  ;;  %v607_v47 = vsel %vm51_vm0, %v601_v41, %v1284_v1  ;;  %v1157_v49 = vld [vmem:[#allocation7 + $0x14] sm:$0xf0]  ;;  %v1068_v50 = vld [vmem:[#allocation7 + $0x50] sm:$0xf] }
  0x21   :  { %897 = vmatpush.bf16.msra.mxu1 %v1178_v13  ;;  %1248 = vmatpush.bf16.msra.mxu3 %v1178_v13  ;;  %552 = vst [vmem:[#allocation7 + $0x70] sm:$0xf] %v1022_v44  ;;  %v313_v51 = vpack.c.bf16 0.0, %v311_v43  ;;  %v572_v52 = vpack.c.bf16 0.0, %v570_v46  ;;  %v1165_v53 = vld [vmem:[#allocation7 + $0x54] sm:$0xf0]  ;;  %v1037_v59 = vor.u32 %v1157_v49, %v1036_v48 }
  0x22   :  { %589 = vst [vmem:[#allocation7 + $0x78] sm:$0xf] %v1024_v45  ;;  %v609_v54 = vpack.c.bf16 0.0, %v607_v47  ;;  %v1038_v56 = vld [vmem:[#allocation7 + $0x18] sm:$0xf0]  ;;  %v1069_v60 = vor.u32 %v1165_v53, %v1068_v50 }
  0x23   :  { %849 = vmatmul.bf16.vlgmr.msra.gmra.mxu0 %v1029_v22  ;;  %869 = vmatmul.bf16.vlgmr.msra.gmra.mxu2 %v1061_v23  ;;  %279 = vst [vmem:[#allocation7 + $0x34] sm:$0xf] %v276_v42  ;;  %v1164_v57 = vld [vmem:[#allocation7 + $0x54] sm:$0xf]  ;;  %v1070_v58 = vld [vmem:[#allocation7 + $0x58] sm:$0xf0]  ;;  %v1041_v1 = vor.u32 %v1156_v55, %v1038_v56 }
  0x24   :  { %898 = vmatmul.bf16.vlgmr.msra.gmra.mxu1 %v1033_v26  ;;  %918 = vmatmul.bf16.vlgmr.msra.gmra.mxu3 %v1065_v27  ;;  %316 = vst [vmem:[#allocation7 + $0x3c] sm:$0xf] %v313_v51  ;;  %v1073_v8 = vor.u32 %v1164_v57, %v1070_v58  ;;  %v1044_v61 = vld [vmem:[#allocation7 + $0x20] sm:$0xf]  ;;  %v1159_v62 = vld [vmem:[#allocation7 + $0x24] sm:$0xf0] }
  0x25   :  { %575 = vst [vmem:[#allocation7 + $0x74] sm:$0xf] %v572_v52  ;;  %v1076_v63 = vld [vmem:[#allocation7 + $0x60] sm:$0xf]  ;;  %v1167_v0 = vld [vmem:[#allocation7 + $0x64] sm:$0xf0]  ;;  %v1045_v6 = vor.u32 %v1159_v62, %v1044_v61 }
  0x26   :  { %612 = vst [vmem:[#allocation7 + $0x7c] sm:$0xf] %v609_v54  ;;  %v1158_v2 = vld [vmem:[#allocation7 + $0x24] sm:$0xf]  ;;  %v1046_v3 = vld [vmem:[#allocation7 + $0x28] sm:$0xf0]  ;;  %v1077_v7 = vor.u32 %v1167_v0, %v1076_v63 }
  0x27   :  { %v1166_v4 = vld [vmem:[#allocation7 + $0x64] sm:$0xf]  ;;  %v1078_v5 = vld [vmem:[#allocation7 + $0x68] sm:$0xf0]  ;;  %v1049_v9 = vor.u32 %v1158_v2, %v1046_v3  ;;  %v1052_v11 = vld [vmem:[#allocation7 + $0x30] sm:$0xf] }
  0x28   :  { %v1081_v10 = vor.u32 %v1166_v4, %v1078_v5  ;;  %v1161_v12 = vld [vmem:[#allocation7 + $0x34] sm:$0xf0]  ;;  %v1084_v13 = vld [vmem:[#allocation7 + $0x70] sm:$0xf]  ;;  %v1484_v24 = vld [vmem:[%s1548_s1] ss:$0 sm:$0xff] }
  0x29   :  { %v1169_v14 = vld [vmem:[#allocation7 + $0x74] sm:$0xf0]  ;;  %v1053_v19 = vor.u32 %v1161_v12, %v1052_v11  ;;  %v1490_v31 = vld [vmem:[%s1549_s2] ss:$0 sm:$0xff] }
  0x2a   :  { %v1160_v15 = vld [vmem:[#allocation7 + $0x34] sm:$0xf]  ;;  %v1085_v20 = vor.u32 %v1169_v14, %v1084_v13 }
  0x2b   :  { %v1054_v16 = vld [vmem:[#allocation7 + $0x38] sm:$0xf0] }
  0x2c   :  { %v1168_v17 = vld [vmem:[#allocation7 + $0x74] sm:$0xf]  ;;  %v1057_v21 = vor.u32 %v1160_v15, %v1054_v16 }
  0x2d   :  { %v1086_v18 = vld [vmem:[#allocation7 + $0x78] sm:$0xf0] }
  0x2e   :  { %v1089_v22 = vor.u32 %v1168_v17, %v1086_v18 }
  0x33   :  { %854 = vmatmul.bf16.gmra.mxu0 %v1037_v59  ;;  %874 = vmatmul.bf16.gmra.mxu2 %v1069_v60 }
  0x34   :  { %903 = vmatmul.bf16.gmra.mxu1 %v1041_v1  ;;  %923 = vmatmul.bf16.gmra.mxu3 %v1073_v8 }
  0x43   :  { %859 = vmatmul.bf16.gmra.mxu0 %v1045_v6  ;;  %879 = vmatmul.bf16.gmra.mxu2 %v1077_v7 }
  0x44   :  { %908 = vmatmul.bf16.gmra.mxu1 %v1049_v9  ;;  %928 = vmatmul.bf16.gmra.mxu3 %v1081_v10 }
  0x53   :  { %864 = vmatmul.bf16.gmra.mxu0 %v1053_v19  ;;  %884 = vmatmul.bf16.gmra.mxu2 %v1085_v20 }
  0x54   :  { %913 = vmatmul.bf16.gmra.mxu1 %v1057_v21  ;;  %933 = vmatmul.bf16.gmra.mxu3 %v1089_v22 }
  0xa0   :  { %v850_v23 = vpop.f32.mrf.mxu0 }
  0xa1   :  { %v899_v25 = vpop.f32.mrf.mxu1  ;;  %v851_v26 = vadd.f32 %v1484_v24, %v850_v23 }
  0xa3   :  { %v900_v30 = vadd.f32 %v899_v25, %v851_v26 }
  0xa5   :  { %v943_v36 = vmax.f32 %v900_v30, %v1490_v31 }
  0xa6   :  { %v870_v27 = vpop.f32.mrf.mxu2 }
  0xa7   :  { %v919_v28 = vpop.f32.mrf.mxu3  ;;  %v871_v34 = vadd.f32 %v1484_v24, %v870_v27 }
  0xa8   :  { %v852_v29 = vpop.f32.mrf.mxu0 }
  0xa9   :  { %v853_v32 = vadd.f32 %v1484_v24, %v852_v29  ;;  %v901_v33 = vpop.f32.mrf.mxu1  ;;  %v920_v39 = vadd.f32 %v919_v28, %v871_v34 }
  0xab   :  { %v902_v35 = vadd.f32 %v901_v33, %v853_v32  ;;  %v951_v46 = vmax.f32 %v920_v39, %v1490_v31 }
  0xad   :  { %v944_v37 = vmax.f32 %v902_v35, %v1490_v31 }
  0xae   :  { %v872_v38 = vpop.f32.mrf.mxu2 }
  0xaf   :  { %v1189_v40 = vpack.c.bf16 %v944_v37, %v943_v36  ;;  %v873_v41 = vadd.f32 %v1484_v24, %v872_v38  ;;  %v921_v42 = vpop.f32.mrf.mxu3 }
  0xb0   :  { %v855_v43 = vpop.f32.mrf.mxu0 }
  0xb1   :  { %1190 = vst [vmem:[%s1552_s5] sm:$0xff] %v1189_v40   ;;  %v922_v44 = vadd.f32 %v921_v42, %v873_v41  ;;  %v904_v45 = vpop.f32.mrf.mxu1  ;;  %v856_v49 = vadd.f32 %v1484_v24, %v855_v43 }
  0xb3   :  { %v952_v47 = vmax.f32 %v922_v44, %v1490_v31  ;;  %v905_v53 = vadd.f32 %v904_v45, %v856_v49 }
  0xb5   :  { %v1209_v48 = vpack.c.bf16 %v952_v47, %v951_v46  ;;  %v945_v58 = vmax.f32 %v905_v53, %v1490_v31 }
  0xb6   :  { %v875_v50 = vpop.f32.mrf.mxu2 }
  0xb7   :  { %1229 = vst [vmem:[%s1552_s5 + $0x20] sm:$0xff] %v1209_v48   ;;  %v924_v51 = vpop.f32.mrf.mxu3  ;;  %v876_v56 = vadd.f32 %v1484_v24, %v875_v50 }
  0xb8   :  { %v857_v52 = vpop.f32.mrf.mxu0 }
  0xb9   :  { %v858_v54 = vadd.f32 %v1484_v24, %v857_v52  ;;  %v906_v55 = vpop.f32.mrf.mxu1  ;;  %v925_v1 = vadd.f32 %v924_v51, %v876_v56 }
  0xbb   :  { %v907_v57 = vadd.f32 %v906_v55, %v858_v54  ;;  %v953_v3 = vmax.f32 %v925_v1, %v1490_v31 }
  0xbd   :  { %v946_v59 = vmax.f32 %v907_v57, %v1490_v31 }
  0xbe   :  { %v877_v60 = vpop.f32.mrf.mxu2 }
  0xbf   :  { %v1194_v8 = vpack.c.bf16 %v946_v59, %v945_v58  ;;  %v878_v61 = vadd.f32 %v1484_v24, %v877_v60  ;;  %v926_v62 = vpop.f32.mrf.mxu3 }
  0xc0   :  { %v860_v63 = vpop.f32.mrf.mxu0 }
  0xc1   :  { %1226 = vst [vmem:[%s1552_s5 + $0x8] sm:$0xff] %v1194_v8   ;;  %v927_v0 = vadd.f32 %v926_v62, %v878_v61  ;;  %v909_v2 = vpop.f32.mrf.mxu1  ;;  %v861_v6 = vadd.f32 %v1484_v24, %v860_v63 }
  0xc3   :  { %v954_v4 = vmax.f32 %v927_v0, %v1490_v31  ;;  %v910_v11 = vadd.f32 %v909_v2, %v861_v6 }
  0xc5   :  { %v1214_v5 = vpack.c.bf16 %v954_v4, %v953_v3  ;;  %v947_v16 = vmax.f32 %v910_v11, %v1490_v31 }
  0xc6   :  { %v880_v7 = vpop.f32.mrf.mxu2 }
  0xc7   :  { %1230 = vst [vmem:[%s1552_s5 + $0x28] sm:$0xff] %v1214_v5   ;;  %v929_v9 = vpop.f32.mrf.mxu3  ;;  %v881_v14 = vadd.f32 %v1484_v24, %v880_v7 }
  0xc8   :  { %v862_v10 = vpop.f32.mrf.mxu0 }
  0xc9   :  { %v863_v12 = vadd.f32 %v1484_v24, %v862_v10  ;;  %v911_v13 = vpop.f32.mrf.mxu1  ;;  %v930_v19 = vadd.f32 %v929_v9, %v881_v14 }
  0xcb   :  { %v912_v15 = vadd.f32 %v911_v13, %v863_v12  ;;  %v955_v27 = vmax.f32 %v930_v19, %v1490_v31 }
  0xcd   :  { %v948_v17 = vmax.f32 %v912_v15, %v1490_v31 }
  0xce   :  { %v882_v18 = vpop.f32.mrf.mxu2 }
  0xcf   :  { %v1199_v20 = vpack.c.bf16 %v948_v17, %v947_v16  ;;  %v883_v21 = vadd.f32 %v1484_v24, %v882_v18  ;;  %v931_v22 = vpop.f32.mrf.mxu3 }
  0xd0   :  { %v865_v23 = vpop.f32.mrf.mxu0 }
  0xd1   :  { %1227 = vst [vmem:[%s1552_s5 + $0x10] sm:$0xff] %v1199_v20   ;;  %v932_v25 = vadd.f32 %v931_v22, %v883_v21  ;;  %v914_v26 = vpop.f32.mrf.mxu1  ;;  %v866_v30 = vadd.f32 %v1484_v24, %v865_v23 }
  0xd3   :  { %v956_v28 = vmax.f32 %v932_v25, %v1490_v31  ;;  %v915_v35 = vadd.f32 %v914_v26, %v866_v30 }
  0xd5   :  { %v1219_v29 = vpack.c.bf16 %v956_v28, %v955_v27  ;;  %v949_v40 = vmax.f32 %v915_v35, %v1490_v31 }
  0xd6   :  { %v885_v32 = vpop.f32.mrf.mxu2 }
  0xd7   :  { %1231 = vst [vmem:[%s1552_s5 + $0x30] sm:$0xff] %v1219_v29   ;;  %v934_v33 = vpop.f32.mrf.mxu3  ;;  %v886_v38 = vadd.f32 %v1484_v24, %v885_v32 }
  0xd8   :  { %v867_v34 = vpop.f32.mrf.mxu0 }
  0xd9   :  { %v868_v36 = vadd.f32 %v1484_v24, %v867_v34  ;;  %v916_v37 = vpop.f32.mrf.mxu1  ;;  %v935_v43 = vadd.f32 %v934_v33, %v886_v38 }
  0xdb   :  { %v917_v39 = vadd.f32 %v916_v37, %v868_v36  ;;  %v957_v48 = vmax.f32 %v935_v43, %v1490_v31 }
  0xdd   :  { %v950_v41 = vmax.f32 %v917_v39, %v1490_v31 }
  0xde   :  { %v887_v42 = vpop.f32.mrf.mxu2 }
  0xdf   :  { %v1204_v44 = vpack.c.bf16 %v950_v41, %v949_v40  ;;  %v888_v45 = vadd.f32 %v1484_v24, %v887_v42  ;;  %v936_v46 = vpop.f32.mrf.mxu3 }
  0xe1   :  { %1228 = vst [vmem:[%s1552_s5 + $0x18] sm:$0xff] %v1204_v44   ;;  %v937_v47 = vadd.f32 %v936_v46, %v888_v45 }
  0xe3   :  { %v958_v49 = vmax.f32 %v937_v47, %v1490_v31 }
  0xe5   :  { %v1224_v50 = vpack.c.bf16 %v958_v49, %v957_v48 }
  0xe7   :  { %1232 = vst [vmem:[%s1552_s5 + $0x38] sm:$0xff] %v1224_v50  }

// kernel: run.10
= control target key start
LH: loop header
LB: loop body
LE: loop exit
PB: predicated region body
PF: predicated region fallthrough
CT: control target
= control target key end

     0   :  { %s3863_s15 = smov 0   ;;  %s4769_s0 = inlined_call_operand.vmem [shape: bf16[3,128,128], index: 0, kind: input, shape index: {}]   ;;  %s4770_s1 = inlined_call_operand.vmem [shape: f32[1,128], index: 1, kind: input, shape index: {}]   ;;  %s4771_s2 = inlined_call_operand.vmem [shape: bf16[2,128,128], index: 2, kind: input, shape index: {}]   ;;  %s4772_s3 = inlined_call_operand.<no memory space> [shape: s32[], index: 3, kind: input, shape index: {}]   ;;  %s4773_s4 = inlined_call_operand.vmem [shape: bf16[2,160,32], index: 4, kind: input, shape index: {}]   ;;  %s4774_s5 = inlined_call_operand.<no memory space> [shape: bf16[], index: 5, kind: input, shape index: {}]   ;;  %s4775_s6 = inlined_call_operand.vmem [shape: bf16[2,160,32], index: 6, kind: input, shape index: {}]   ;;  %s4776_s7 = inlined_call_operand.vmem [shape: bf16[2,160,32], index: 7, kind: input, shape index: {}]   ;;  %s4777_s8 = inlined_call_operand.<no memory space> [shape: bf16[], index: 8, kind: input, shape index: {}]   ;;  %s4778_s9 = inlined_call_operand.vmem [shape: bf16[2,128,128], index: 9, kind: output, shape index: {}]  }
   0x1   :  { %v14_v0 = vstv %s4772_s3  ;;  %v15_v1 = vstv %s4774_s5  ;;  %v30_v2 = vstv %s4777_s8 }
   0x2   :  { %v3859_v3 = vunpack.i.l.bf16 %v15_v1  ;;  %v3861_v4 = vunpack.i.l.bf16 %v30_v2 }
   0x3 LB: > { %s3258_s16 = sadd.s32 4294967295, %s3796_s15   ;;  %p3262_p0 = scmp.ge.s32.totalorder %s3796_s15, 1  ;;  %s3796_s15 = sphi %s3863_s15, %s40_s15  }
   0x4   : > { %p292_p1 = scmp.lt.s32.totalorder %s3796_s15, 3 }
   0x6   : > { %p293_p2 = pnand %p3262_p0, %p292_p1 }
   0x8   : > { %296 = sbr.rel (%p293_p2) target bundleno = 402 (0x192), region = 44 }
   0xd   : > { %p352_p3 = scmp.lt.s32.totalorder %s3258_s16, 1  ;;  %v407_v5 = vlaneseq  ;;  %s3798_s22 = smov 32  }
   0xe   : > { %s3799_s23 = smov 64  }
   0xf   : > { %s4782_s16 = smov (!%p352_p3, %s3258_s16), 1  ;;  %v3873_v6 = vand.u32 127, %v407_v5 }
  0x10   : > { %s3876_s5 = smul.u32 80, %s4782_s16 }
  0x11   : > { %v3879_v7 = vadd.s32 128, %v3873_v6  ;;  %vm440_vm1 = vcmp.lt.s32.totalorder %v3873_v6, 96  ;;  %vm414_vm2 = vcmp.lt.s32.totalorder %v3873_v6, 64  ;;  %vm4082_vm3 = vcmp.lt.s32.totalorder %v3873_v6, %v14_v0 }
  0x12   : > { %s3885_s18 = scalar_lea.vmem %s4775_s6, %s3876_s5  ;;  %s3891_s21 = scalar_lea.vmem %s4773_s4, %s3876_s5  ;;  %vm459_vm4 = vcmp.lt.s32.totalorder %v3873_v6, 32 }
  0x13   : > { %vm410_vm0 = vcmp.lt.s32.totalorder %v3879_v7, 160  ;;  %v3280_v8 = vld [vmem:[%s3885_s18 + $0x10] sm:$0xff]   ;;  %v3310_v10 = vld [vmem:[%s3885_s18 + $0x38] sm:$0xff]   ;;  %v3273_v32 = vld [vmem:[%s3891_s21 + $0x8] sm:$0xff]   ;;  %s4054_s26 = scalar_lea.vmem %s4776_s7, %s3876_s5 }
  0x14   : > { %v3279_v9 = vld [vmem:[%s3891_s21 + $0x10] sm:$0xff]   ;;  %v860_v11 = vunpack.c.l.bf16 %v3280_v8  ;;  %v968_v12 = vunpack.c.h.bf16 %v3280_v8  ;;  %v3309_v15 = vld [vmem:[%s3891_s21 + $0x38] sm:$0xff]   ;;  %v1940_v16 = vunpack.c.l.bf16 %v3310_v10  ;;  %v2048_v17 = vunpack.c.h.bf16 %v3310_v10  ;;  %v404_v35 = vld [vmem:[%s3891_s21] sm:$0xff]  }
  0x15   : > { %v832_v13 = vunpack.c.l.bf16 %v3279_v9  ;;  %v940_v14 = vunpack.c.h.bf16 %v3279_v9  ;;  %v1912_v18 = vunpack.c.l.bf16 %v3309_v15  ;;  %v2020_v19 = vunpack.c.h.bf16 %v3309_v15  ;;  %v3285_v44 = vld [vmem:[%s3891_s21 + $0x18] sm:$0xff]   ;;  %v430_v45 = vld [vmem:[%s3885_s18] sm:$0xff]   ;;  %v3274_v49 = vld [vmem:[%s3885_s18 + $0x8] sm:$0xff]  }
  0x16   : > { %v867_v20 = vsel %vm410_vm0, %v860_v11, %v3859_v3  ;;  %v975_v21 = vsel %vm410_vm0, %v968_v12, %v3859_v3  ;;  %v1947_v30 = vsel %vm410_vm0, %v1940_v16, %v3859_v3  ;;  %v2055_v31 = vsel %vm410_vm0, %v2048_v17, %v3859_v3  ;;  %v3316_v48 = vld [vmem:[%s3885_s18 + $0x40] sm:$0xff]   ;;  %v3286_v17 = vld [vmem:[%s3885_s18 + $0x18] sm:$0xff]   ;;  %v3550_v7 = vld [vmem:[%s4769_s0 + $0x70] sm:$0xff] }
  0x17   : > { %v839_v22 = vsel %vm410_vm0, %v832_v13, %v3859_v3  ;;  %v947_v23 = vsel %vm410_vm0, %v940_v14, %v3859_v3  ;;  %v871_v24 = vsel %vm440_vm1, %v867_v20, %v3859_v3  ;;  %v979_v25 = vsel %vm440_vm1, %v975_v21, %v3859_v3  ;;  %v3292_v20 = vld [vmem:[%s3885_s18 + $0x20] sm:$0xff]  }
  0x18   : > { %v843_v26 = vsel %vm414_vm2, %v839_v22, %v3859_v3  ;;  %v951_v27 = vsel %vm414_vm2, %v947_v23, %v3859_v3  ;;  %v3689_v28 = vpack.i.bf16 %v979_v25, %v871_v24  ;;  %v1919_v33 = vsel %vm410_vm0, %v1912_v18, %v3859_v3  ;;  %v3304_v24 = vld [vmem:[%s3885_s18 + $0x30] sm:$0xff]  }
  0x19   : > { %v3699_v29 = vpack.i.bf16 %v951_v27, %v843_v26  ;;  %v2027_v34 = vsel %vm410_vm0, %v2020_v19, %v3859_v3  ;;  %v1951_v36 = vsel %vm440_vm1, %v1947_v30, %v3859_v3  ;;  %v2059_v37 = vsel %vm440_vm1, %v2055_v31, %v3859_v3 }
  0x1a   : > { %3690 = vrot.lane.b32.xlu0 %v3689_v28, %s3798_s22  ;;  %v1923_v38 = vsel %vm414_vm2, %v1919_v33, %v3859_v3  ;;  %v2031_v39 = vsel %vm414_vm2, %v2027_v34, %v3859_v3  ;;  %v616_v40 = vunpack.c.l.bf16 %v3273_v32  ;;  %v724_v41 = vunpack.c.h.bf16 %v3273_v32 }
  0x1b   : > { %3700 = vrot.lane.b32.xlu1 %v3699_v29, %s3799_s23  ;;  %v405_v42 = vunpack.c.l.bf16 %v404_v35  ;;  %v508_v43 = vunpack.c.h.bf16 %v404_v35  ;;  %v3694_v46 = vpack.i.bf16 %v2059_v37, %v1951_v36  ;;  %v3704_v47 = vpack.i.bf16 %v2031_v39, %v1923_v38  ;;  %v3315_v36 = vld [vmem:[%s3891_s21 + $0x40] sm:$0xff]  }
  0x1c   : > { %v623_v50 = vsel %vm410_vm0, %v616_v40, %v3859_v3  ;;  %v731_v51 = vsel %vm410_vm0, %v724_v41, %v3859_v3  ;;  %v1048_v54 = vunpack.c.l.bf16 %v3285_v44  ;;  %v431_v55 = vunpack.c.l.bf16 %v430_v45 }
  0x1d   : > { %v411_v52 = vsel %vm410_vm0, %v405_v42, %v3859_v3  ;;  %v515_v53 = vsel %vm410_vm0, %v508_v43, %v3859_v3  ;;  %v1156_v56 = vunpack.c.h.bf16 %v3285_v44  ;;  %v2156_v57 = vunpack.c.l.bf16 %v3316_v48  ;;  %v3303_v43 = vld [vmem:[%s3891_s21 + $0x30] sm:$0xff]  }
  0x1e   : > { %v536_v58 = vunpack.c.h.bf16 %v430_v45  ;;  %v644_v59 = vunpack.c.l.bf16 %v3274_v49  ;;  %v627_v60 = vsel %vm414_vm2, %v623_v50, %v3859_v3  ;;  %v735_v61 = vsel %vm414_vm2, %v731_v51, %v3859_v3  ;;  %v3551_v51 = vld [vmem:[%s4769_s0 + $0x78] sm:$0xff] }
  0x1f   : > { %v437_v62 = vsel %vm410_vm0, %v431_v55, %v3859_v3  ;;  %v752_v63 = vunpack.c.h.bf16 %v3274_v49  ;;  %v415_v1 = vsel %vm414_vm2, %v411_v52, %v3859_v3  ;;  %v519_v2 = vsel %vm414_vm2, %v515_v53, %v3859_v3  ;;  %v3298_v55 = vld [vmem:[%s3885_s18 + $0x28] sm:$0xff]   ;;  %3654 = vmatpush.bf16.msra.mxu3 %v3551_v51  ;;  %2693 = vmatpush.bf16.msra.mxu0 %v3551_v51 }
  0x20   : > { %v441_v5 = vsel %vm440_vm1, %v437_v62, %v3859_v3  ;;  %v543_v8 = vsel %vm410_vm0, %v536_v58, %v3859_v3  ;;  %v2264_v9 = vunpack.c.h.bf16 %v3316_v48  ;;  %v651_v12 = vsel %vm410_vm0, %v644_v59, %v3859_v3  ;;  %v4066_v48 = vld [vmem:[%s4769_s0 + $0xb8] sm:$0xff] }
  0x21   : > { %v547_v10 = vsel %vm440_vm1, %v543_v8, %v3859_v3  ;;  %v759_v13 = vsel %vm410_vm0, %v752_v63, %v3859_v3  ;;  %v3724_v14 = vpack.i.bf16 %v735_v61, %v627_v60  ;;  %v3719_v15 = vpack.i.bf16 %v519_v2, %v415_v1  ;;  %2974 = vmatpush.bf16.msra.mxu2 %v4066_v48  ;;  %v3291_v8 = vld [vmem:[%s3891_s21 + $0x20] sm:$0xff]  }
  0x22   : > { %3695 = vrot.lane.b32.xlu0 %v3694_v46, %s3798_s22  ;;  %v3709_v11 = vpack.i.bf16 %v547_v10, %v441_v5  ;;  %v1055_v16 = vsel %vm410_vm0, %v1048_v54, %v3859_v3  ;;  %v1163_v18 = vsel %vm410_vm0, %v1156_v56, %v3859_v3  ;;  %v2163_v19 = vsel %vm410_vm0, %v2156_v57, %v3859_v3  ;;  %v4094_v56 = vld [vmem:[%s4769_s0 + $0xb0] sm:$0xff] }
  0x23   : > { %3705 = vrot.lane.b32.xlu1 %v3704_v47, %s3799_s23  ;;  %v2271_v21 = vsel %vm410_vm0, %v2264_v9, %v3859_v3  ;;  %v655_v22 = vsel %vm440_vm1, %v651_v12, %v3859_v3  ;;  %v763_v23 = vsel %vm440_vm1, %v759_v13, %v3859_v3  ;;  %v1059_v25 = vsel %vm414_vm2, %v1055_v16, %v3859_v3  ;;  %v3281_v57 = vld [vmem:[%s4054_s26 + $0x10] sm:$0xff]   ;;  %v4123_v13 = vld [vmem:[%s4769_s0 + $0xa8] sm:$0xff] }
  0x24   : > { %3710 = vrot.lane.b32.xlu2 %v3709_v11, %s3798_s22  ;;  %v1076_v26 = vunpack.c.l.bf16 %v3286_v17  ;;  %v1184_v27 = vunpack.c.h.bf16 %v3286_v17  ;;  %v1167_v28 = vsel %vm414_vm2, %v1163_v18, %v3859_v3  ;;  %v2167_v29 = vsel %vm440_vm1, %v2163_v19, %v3859_v3  ;;  %3655 = vmatpush.bf16.msra.mxu3 %v3550_v7 }
  0x25   : > { %v1292_v30 = vunpack.c.l.bf16 %v3292_v20  ;;  %v1400_v31 = vunpack.c.h.bf16 %v3292_v20  ;;  %v2275_v32 = vsel %vm440_vm1, %v2271_v21, %v3859_v3  ;;  %v3714_v33 = vpack.i.bf16 %v763_v23, %v655_v22  ;;  %2975 = vmatpush.bf16.msra.mxu2 %v4094_v56  ;;  %2694 = vmatpush.bf16.msra.mxu0 %v3550_v7 }
  0x26   : > { %v1724_v34 = vunpack.c.l.bf16 %v3304_v24  ;;  %v1832_v35 = vunpack.c.h.bf16 %v3304_v24  ;;  %v1083_v37 = vsel %vm410_vm0, %v1076_v26, %v3859_v3  ;;  %v1191_v38 = vsel %vm410_vm0, %v1184_v27, %v3859_v3  ;;  %v3321_v26 = vld [vmem:[%s3891_s21 + $0x48] sm:$0xff]  }
  0x27   : > { %v3739_v39 = vpack.i.bf16 %v1167_v28, %v1059_v25  ;;  %v3734_v40 = vpack.i.bf16 %v2275_v32, %v2167_v29  ;;  %v1299_v41 = vsel %vm410_vm0, %v1292_v30, %v3859_v3  ;;  %v1407_v42 = vsel %vm410_vm0, %v1400_v31, %v3859_v3  ;;  %v3322_v25 = vld [vmem:[%s3885_s18 + $0x48] sm:$0xff]  }
  0x28   : > { %v1731_v44 = vsel %vm410_vm0, %v1724_v34, %v3859_v3  ;;  %v1839_v45 = vsel %vm410_vm0, %v1832_v35, %v3859_v3  ;;  %v2128_v46 = vunpack.c.l.bf16 %v3315_v36  ;;  %v2236_v47 = vunpack.c.h.bf16 %v3315_v36 }
  0x29   : > { %v1087_v49 = vsel %vm440_vm1, %v1083_v37, %v3859_v3  ;;  %v1195_v50 = vsel %vm440_vm1, %v1191_v38, %v3859_v3  ;;  %v1303_v53 = vsel %vm440_vm1, %v1299_v41, %v3859_v3  ;;  %v1696_v54 = vunpack.c.l.bf16 %v3303_v43  ;;  %2976 = vmatpush.bf16.msra.mxu2 %v4123_v13  ;;  %v3297_v41 = vld [vmem:[%s3891_s21 + $0x28] sm:$0xff]  }
  0x2a   : > { %3720 = vrot.lane.b32.xlu0 %v3719_v15, %s3799_s23  ;;  %v1411_v58 = vsel %vm440_vm1, %v1407_v42, %v3859_v3  ;;  %v1735_v59 = vsel %vm440_vm1, %v1731_v44, %v3859_v3  ;;  %v1843_v60 = vsel %vm440_vm1, %v1839_v45, %v3859_v3  ;;  %v1804_v61 = vunpack.c.h.bf16 %v3303_v43 }
  0x2b   : > { %3725 = vrot.lane.b32.xlu1 %v3724_v14, %s3799_s23  ;;  %v3729_v62 = vpack.i.bf16 %v1195_v50, %v1087_v49  ;;  %v2135_v63 = vsel %vm410_vm0, %v2128_v46, %v3859_v3  ;;  %v2243_v1 = vsel %vm410_vm0, %v2236_v47, %v3859_v3  ;;  %v1508_v2 = vunpack.c.l.bf16 %v3298_v55 }
  0x2c   : > { %3715 = vrot.lane.b32.xlu2 %v3714_v33, %s3798_s22  ;;  %v1616_v5 = vunpack.c.h.bf16 %v3298_v55  ;;  %v885_v9 = vunpack.c.l.bf16 %v3281_v57  ;;  %v3749_v10 = vpack.i.bf16 %v1411_v58, %v1303_v53  ;;  %v3754_v11 = vpack.i.bf16 %v1843_v60, %v1735_v59 }
  0x2d   : > { %v1703_v12 = vsel %vm410_vm0, %v1696_v54, %v3859_v3  ;;  %v1811_v14 = vsel %vm410_vm0, %v1804_v61, %v3859_v3  ;;  %v2139_v15 = vsel %vm414_vm2, %v2135_v63, %v3859_v3  ;;  %v2247_v16 = vsel %vm414_vm2, %v2243_v1, %v3859_v3 }
  0x2e   : > { %v4137_v17 = vsel %vm459_vm4, %v885_v9, %v3859_v3  ;;  %v1264_v18 = vunpack.c.l.bf16 %v3291_v8  ;;  %v1372_v19 = vunpack.c.h.bf16 %v3291_v8  ;;  %v993_v21 = vunpack.c.h.bf16 %v3281_v57  ;;  %v3549_v8 = vld [vmem:[%s4769_s0 + $0x68] sm:$0xff]  ;;  %v4253_v9 = vld [vmem:[%s4769_s0 + $0x98] sm:$0xff] }
  0x2f   : > { %v903_v20 = vsel %vm4082_vm3, %v4137_v17, %v3861_v4  ;;  %v1515_v22 = vsel %vm410_vm0, %v1508_v2, %v3859_v3  ;;  %v1623_v23 = vsel %vm410_vm0, %v1616_v5, %v3859_v3  ;;  %v1707_v24 = vsel %vm414_vm2, %v1703_v12, %v3859_v3  ;;  %v4238_v2 = vld [vmem:[%s4769_s0 + $0xa0] sm:$0xff]  ;;  %v4244_v5 = vld [vmem:[%s4769_s0 + $0x38] sm:$0xff]  ;;  %3656 = vmatpush.bf16.msra.mxu3 %v3549_v8 }
  0x30   : > { %v4159_v27 = vsel %vm459_vm4, %v993_v21, %v3859_v3  ;;  %v1815_v28 = vsel %vm414_vm2, %v1811_v14, %v3859_v3  ;;  %v3744_v29 = vpack.i.bf16 %v2247_v16, %v2139_v15  ;;  %v1519_v31 = vsel %vm440_vm1, %v1515_v22, %v3859_v3  ;;  %2977 = vmatpush.bf16.msra.mxu2 %v4238_v2  ;;  %v4260_v14 = vld [vmem:[%s4769_s0 + $0x30] sm:$0xff] }
  0x31   : > { %v1011_v30 = vsel %vm4082_vm3, %v4159_v27, %v3861_v4  ;;  %v1627_v32 = vsel %vm440_vm1, %v1623_v23, %v3859_v3  ;;  %v1271_v33 = vsel %vm410_vm0, %v1264_v18, %v3859_v3  ;;  %v1379_v34 = vsel %vm410_vm0, %v1372_v19, %v3859_v3  ;;  %2796 = vmatpush.bf16.msra.mxu1 %v4244_v5  ;;  %v3548_v18 = vld [vmem:[%s4769_s0 + $0x60] sm:$0xff]  ;;  %v4275_v19 = vld [vmem:[%s4769_s0 + $0x90] sm:$0xff]  ;;  %v3311_v23 = vld [vmem:[%s4054_s26 + $0x38] sm:$0xff]  }
  0x32   : > { %3735 = vrot.lane.b32.xlu0 %v3734_v40, %s3798_s22  ;;  %v2372_v35 = vunpack.c.l.bf16 %v3322_v25  ;;  %v2480_v36 = vunpack.c.h.bf16 %v3322_v25  ;;  %v2344_v37 = vunpack.c.l.bf16 %v3321_v26  ;;  %v2452_v38 = vunpack.c.h.bf16 %v3321_v26  ;;  %2695 = vmatpush.bf16.msra.mxu0 %v3549_v8  ;;  %v4288_v26 = vld [vmem:[%s4769_s0 + $0x28] sm:$0xff]  ;;  %v3317_v8 = vld [vmem:[%s4054_s26 + $0x40] sm:$0xff]  }
  0x33   : > { %3740 = vrot.lane.b32.xlu1 %v3739_v39, %s3799_s23  ;;  %v3764_v39 = vpack.i.bf16 %v1815_v28, %v1707_v24  ;;  %v3769_v40 = vpack.i.bf16 %v1627_v32, %v1519_v31  ;;  %v1275_v42 = vsel %vm414_vm2, %v1271_v33, %v3859_v3  ;;  %v1383_v43 = vsel %vm414_vm2, %v1379_v34, %v3859_v3  ;;  %v3547_v31 = vld [vmem:[%s4769_s0 + $0x58] sm:$0xff]  ;;  %v4307_v32 = vld [vmem:[%s4769_s0 + $0x88] sm:$0xff] }
  0x34   : > { %3730 = vrot.lane.b32.xlu2 %v3729_v62, %s3798_s22  ;;  %v2379_v44 = vsel %vm410_vm0, %v2372_v35, %v3859_v3  ;;  %v2487_v45 = vsel %vm410_vm0, %v2480_v36, %v3859_v3  ;;  %v2351_v46 = vsel %vm410_vm0, %v2344_v37, %v3859_v3  ;;  %v2459_v47 = vsel %vm410_vm0, %v2452_v38, %v3859_v3  ;;  %v3275_v35 = vld [vmem:[%s4054_s26 + $0x8] sm:$0xff]   ;;  %v4322_v38 = vld [vmem:[%s4769_s0 + $0x20] sm:$0xff] }
  0x35   : > { %v1480_v49 = vunpack.c.l.bf16 %v3297_v41  ;;  %v1588_v50 = vunpack.c.h.bf16 %v3297_v41  ;;  %v3759_v51 = vpack.i.bf16 %v1383_v43, %v1275_v42  ;;  %v2383_v53 = vsel %vm440_vm1, %v2379_v44, %v3859_v3  ;;  %2978 = vmatpush.bf16.msra.mxu2 %v4253_v9  ;;  %2797 = vmatpush.bf16.msra.mxu1 %v4260_v14  ;;  %v3546_v43 = vld [vmem:[%s4769_s0 + $0x50] sm:$0xff]  ;;  %v4343_v44 = vld [vmem:[%s4769_s0 + $0x80] sm:$0xff] }
  0x36   : > { %v2491_v54 = vsel %vm440_vm1, %v2487_v45, %v3859_v3  ;;  %v2355_v55 = vsel %vm414_vm2, %v2351_v46, %v3859_v3  ;;  %v2463_v57 = vsel %vm414_vm2, %v2459_v47, %v3859_v3  ;;  %v1965_v24 = vunpack.c.l.bf16 %v3311_v23  ;;  %3657 = vmatpush.bf16.msra.mxu3 %v3548_v18  ;;  %2696 = vmatpush.bf16.msra.mxu0 %v3548_v18  ;;  %v4349_v45 = vld [vmem:[%s4769_s0 + $0x18] sm:$0xff]  ;;  %v3545_v47 = vld [vmem:[%s4769_s0 + $0x48] sm:$0xff] }
  0x37   : > { %v1487_v58 = vsel %vm410_vm0, %v1480_v49, %v3859_v3  ;;  %v1595_v59 = vsel %vm410_vm0, %v1588_v50, %v3859_v3  ;;  %v3779_v60 = vpack.i.bf16 %v2491_v54, %v2383_v53  ;;  %v3784_v61 = vpack.i.bf16 %v2463_v57, %v2355_v55  ;;  %v4359_v55 = vld [vmem:[%s4769_s0 + $0x10] sm:$0xff] }
  0x38   : > { %v1491_v62 = vsel %vm414_vm2, %v1487_v58, %v3859_v3  ;;  %v1599_v63 = vsel %vm414_vm2, %v1595_v59, %v3859_v3  ;;  %v2073_v25 = vunpack.c.h.bf16 %v3311_v23  ;;  %v4293_v28 = vsel %vm459_vm4, %v1965_v24, %v3859_v3  ;;  %v4422_v24 = vld [vmem:[%s4769_s0] sm:$0xff] }
  0x39   : > { %v3774_v1 = vpack.i.bf16 %v1599_v63, %v1491_v62  ;;  %2979 = vmatpush.bf16.msra.mxu2 %v4275_v19  ;;  %2798 = vmatpush.bf16.msra.mxu1 %v4288_v26  ;;  %v1983_v33 = vsel %vm4082_vm3, %v4293_v28, %v3861_v4  ;;  %v669_v36 = vunpack.c.l.bf16 %v3275_v35  ;;  %v777_v37 = vunpack.c.h.bf16 %v3275_v35  ;;  %v3544_v63 = vld [vmem:[%s4769_s0 + $0x40] sm:$0xff] }
  0x3a   : > { %3750 = vrot.lane.b32.xlu0 %v3749_v10, %s3798_s22  ;;  %v453_v10 = vld [vmem:[%s4054_s26] sm:$0xff]   ;;  %3658 = vmatpush.bf16.msra.mxu3 %v3547_v31 }
  0x3b   : > { %3755 = vrot.lane.b32.xlu1 %v3754_v11, %s3798_s22  ;;  %v454_v11 = vunpack.c.l.bf16 %v453_v10  ;;  %v561_v12 = vunpack.c.h.bf16 %v453_v10  ;;  %2697 = vmatpush.bf16.msra.mxu0 %v3547_v31  ;;  %v2181_v10 = vunpack.c.l.bf16 %v3317_v8 }
  0x3c   : > { %3745 = vrot.lane.b32.xlu2 %v3744_v29, %s3799_s23  ;;  %v4298_v29 = vsel %vm459_vm4, %v2073_v25, %v3859_v3 }
  0x3d   : > { %v460_v15 = vsel %vm459_vm4, %v454_v11, %v3859_v3  ;;  %v567_v16 = vsel %vm459_vm4, %v561_v12, %v3859_v3  ;;  %v2091_v34 = vsel %vm4082_vm3, %v4298_v29, %v3861_v4  ;;  %2980 = vmatpush.bf16.msra.mxu2 %v4307_v32  ;;  %2799 = vmatpush.bf16.msra.mxu1 %v4322_v38  ;;  %v2289_v11 = vunpack.c.h.bf16 %v3317_v8  ;;  %v4397_v12 = vld [vmem:[%s4769_s0 + $0x8] sm:$0xff] }
  0x3e   : > { %v472_v21 = vsel %vm4082_vm3, %v460_v15, %v3861_v4  ;;  %v579_v22 = vsel %vm4082_vm3, %v567_v16, %v3861_v4  ;;  %3659 = vmatpush.bf16.msra.mxu3 %v3546_v43  ;;  %v4403_v16 = vsel %vm459_vm4, %v2181_v10, %v3859_v3 }
  0x3f   : > { %2698 = vmatpush.bf16.msra.mxu0 %v3546_v43  ;;  %v4408_v18 = vsel %vm459_vm4, %v2289_v11, %v3859_v3 }
  0x40   : > { %v2307_v23 = vsel %vm4082_vm3, %v4408_v18, %v3861_v4 }
  0x41   : > { %2981 = vmatpush.bf16.msra.mxu2 %v4343_v44  ;;  %2800 = vmatpush.bf16.msra.mxu1 %v4349_v45 }
  0x42   : > { %3765 = vrot.lane.b32.xlu0 %v3764_v39, %s3799_s23  ;;  %v675_v39 = vsel %vm459_vm4, %v669_v36, %v3859_v3  ;;  %3660 = vmatpush.bf16.msra.mxu3 %v3545_v47 }
  0x43   : > { %3770 = vrot.lane.b32.xlu1 %v3769_v40, %s3798_s22  ;;  %v783_v40 = vsel %vm459_vm4, %v777_v37, %v3859_v3  ;;  %v687_v41 = vsel %vm4082_vm3, %v675_v39, %v3861_v4  ;;  %2699 = vmatpush.bf16.msra.mxu0 %v3545_v47 }
  0x44   : > { %3760 = vrot.lane.b32.xlu2 %v3759_v51, %s3799_s23  ;;  %v795_v42 = vsel %vm4082_vm3, %v783_v40, %v3861_v4  ;;  %v3287_v51 = vld [vmem:[%s4054_s26 + $0x18] sm:$0xff]  }
  0x45   : > { %v1101_v53 = vunpack.c.l.bf16 %v3287_v51  ;;  %v1209_v54 = vunpack.c.h.bf16 %v3287_v51  ;;  %2801 = vmatpush.bf16.msra.mxu1 %v4359_v55  ;;  %v3293_v51 = vld [vmem:[%s4054_s26 + $0x20] sm:$0xff]  }
  0x46   : > { %3661 = vmatpush.bf16.msra.mxu3 %v3544_v63 }
  0x47   : > { %v4379_v62 = vsel %vm459_vm4, %v1209_v54, %v3859_v3  ;;  %2700 = vmatpush.bf16.msra.mxu0 %v3544_v63 }
  0x48   : > { %v1227_v7 = vsel %vm4082_vm3, %v4379_v62, %v3861_v4 }
  0x49   : > { %2802 = vmatpush.bf16.msra.mxu1 %v4397_v12 }
  0x4a   : > { %3780 = vrot.lane.b32.xlu0 %v3779_v60, %s3798_s22  ;;  %3662 = vmatpush.bf16.msrb.mxu3 %v4244_v5  ;;  %v2199_v5 = vsel %vm4082_vm3, %v4403_v16, %v3861_v4 }
  0x4b   : > { %3785 = vrot.lane.b32.xlu1 %v3784_v61, %s3799_s23  ;;  %v4374_v61 = vsel %vm459_vm4, %v1101_v53, %v3859_v3  ;;  %v1425_v53 = vunpack.c.h.bf16 %v3293_v51 }
  0x4c   : > { %3775 = vrot.lane.b32.xlu2 %v3774_v1, %s3799_s23  ;;  %v1119_v1 = vsel %vm4082_vm3, %v4374_v61, %v3861_v4 }
  0x4d   : > { %2803 = vmatpush.bf16.msra.mxu1 %v4422_v24 }
  0x4e   : > { %3663 = vmatpush.bf16.msrb.mxu3 %v4260_v14 }
  0x52   : > { %3664 = vmatpush.bf16.msrb.mxu3 %v4288_v26 }
  0x56   : > { %3665 = vmatpush.bf16.msrb.mxu3 %v4322_v38  ;;  %v3305_v38 = vld [vmem:[%s4054_s26 + $0x30] sm:$0xff]  }
  0x5a   : > { %3666 = vmatpush.bf16.msrb.mxu3 %v4349_v45 }
  0x5e   : > { %3667 = vmatpush.bf16.msrb.mxu3 %v4359_v55 }
  0x62   : > { %3668 = vmatpush.bf16.msrb.mxu3 %v4397_v12 }
  0x66   : > { %3669 = vmatpush.bf16.msrb.mxu3 %v4422_v24 }
  0x7e   : > { %v3711_v46 = vpop.permute.xlu2 %3710 }
  0x7f   : > { %v3713_v49 = vunpack.i.h.bf16 %v3711_v46  ;;  %v3712_v50 = vunpack.i.l.bf16 %v3711_v46 }
  0x81   : > { %v583_v57 = vsel %vm4082_vm3, %v3713_v49, %v3861_v4  ;;  %v476_v58 = vsel %vm4082_vm3, %v3712_v50, %v3861_v4 }
  0x82   : > { %v4367_v59 = vmax.f32 %v579_v22, %v583_v57  ;;  %v4369_v60 = vmax.f32 %v472_v21, %v476_v58 }
  0x86   : > { %v3716_v15 = vpop.permute.xlu2 %3715 }
  0x87   : > { %v3718_v21 = vunpack.i.h.bf16 %v3716_v15  ;;  %v3717_v22 = vunpack.i.l.bf16 %v3716_v15 }
  0x89   : > { %v799_v35 = vsel %vm4082_vm3, %v3718_v21, %v3861_v4  ;;  %v691_v36 = vsel %vm4082_vm3, %v3717_v22, %v3861_v4 }
  0x8a   : > { %v4432_v46 = vmax.f32 %v795_v42, %v799_v35  ;;  %v4434_v47 = vmax.f32 %v687_v41, %v691_v36  ;;  %v1317_v42 = vunpack.c.l.bf16 %v3293_v51 }
  0x8c   : > { %v3691_v25 = vpop.permute.xlu0 %3690  ;;  %v4463_v17 = vsel %vm459_vm4, %v1317_v42, %v3859_v3 }
  0x8d   : > { %v3701_v31 = vpop.permute.xlu1 %3700  ;;  %v3693_v37 = vunpack.i.h.bf16 %v3691_v25  ;;  %v3692_v39 = vunpack.i.l.bf16 %v3691_v25 }
  0x8e   : > { %v3703_v40 = vunpack.i.h.bf16 %v3701_v31  ;;  %v3702_v43 = vunpack.i.l.bf16 %v3701_v31  ;;  %v3731_v27 = vpop.permute.xlu2 %3730 }
  0x8f   : > { %v1015_v49 = vsel %vm4082_vm3, %v3693_v37, %v3861_v4  ;;  %v907_v50 = vsel %vm4082_vm3, %v3692_v39, %v3861_v4  ;;  %v3733_v61 = vunpack.i.h.bf16 %v3731_v27  ;;  %v3732_v62 = vunpack.i.l.bf16 %v3731_v27 }
  0x90   : > { %v1019_v14 = vmax.f32 %v1011_v30, %v1015_v49  ;;  %v911_v41 = vmax.f32 %v903_v20, %v907_v50  ;;  %v1023_v54 = vsel %vm4082_vm3, %v3703_v40, %v3861_v4  ;;  %v915_v57 = vsel %vm4082_vm3, %v3702_v43, %v3861_v4 }
  0x91   : > { %v4468_v20 = vsel %vm459_vm4, %v1425_v53, %v3859_v3  ;;  %v1231_v11 = vsel %vm4082_vm3, %v3733_v61, %v3861_v4  ;;  %v1123_v15 = vsel %vm4082_vm3, %v3732_v62, %v3861_v4  ;;  %v1335_v37 = vsel %vm4082_vm3, %v4463_v17, %v3861_v4 }
  0x92   : > { %v1027_v30 = vmax.f32 %v1019_v14, %v1023_v54  ;;  %v919_v58 = vmax.f32 %v911_v41, %v915_v57  ;;  %v4477_v35 = vmax.f32 %v1227_v7, %v1231_v11  ;;  %v4479_v36 = vmax.f32 %v1119_v1, %v1123_v15 }
  0x93   : > { %v1443_v39 = vsel %vm4082_vm3, %v4468_v20, %v3861_v4  ;;  %v1749_v49 = vunpack.c.l.bf16 %v3305_v38  ;;  %v1857_v50 = vunpack.c.h.bf16 %v3305_v38 }
  0x94   : > { %v1030_v26 = vpack.c.bf16 0.0, %v1027_v30  ;;  %v922_v63 = vpack.c.bf16 0.0, %v919_v58  ;;  %v3696_v8 = vpop.permute.xlu0 %3695 }
  0x95   : > { %v3706_v10 = vpop.permute.xlu1 %3705  ;;  %v3698_v21 = vunpack.i.h.bf16 %v3696_v8  ;;  %v3697_v22 = vunpack.i.l.bf16 %v3696_v8  ;;  %v4516_v41 = vsel %vm459_vm4, %v1749_v49, %v3859_v3  ;;  %v4521_v28 = vsel %vm459_vm4, %v1857_v50, %v3859_v3 }
  0x96   : > { %v3708_v25 = vunpack.i.h.bf16 %v3706_v10  ;;  %v3707_v31 = vunpack.i.l.bf16 %v3706_v10  ;;  %1033 = vst [vmem:[#allocation17 + $0x14] sm:$0xf] %v1030_v26  ;;  %v3746_v61 = vpop.permute.xlu2 %3745  ;;  %v1767_v62 = vsel %vm4082_vm3, %v4516_v41, %v3861_v4  ;;  %v1875_v26 = vsel %vm4082_vm3, %v4521_v28, %v3861_v4 }
  0x97   : > { %925 = vst [vmem:[#allocation17 + $0x10] sm:$0xf] %v922_v63  ;;  %v2095_v40 = vsel %vm4082_vm3, %v3698_v21, %v3861_v4  ;;  %v1987_v1 = vsel %vm4082_vm3, %v3697_v22, %v3861_v4  ;;  %v3747_v49 = vunpack.i.l.bf16 %v3746_v61 }
  0x98   : > { %v2099_v7 = vmax.f32 %v2091_v34, %v2095_v40  ;;  %v1991_v43 = vmax.f32 %v1983_v33, %v1987_v1  ;;  %v2103_v51 = vsel %vm4082_vm3, %v3708_v25, %v3861_v4  ;;  %v1995_v14 = vsel %vm4082_vm3, %v3707_v31, %v3861_v4  ;;  %v3299_v25 = vld [vmem:[%s4054_s26 + $0x28] sm:$0xff]  }
  0x99   : > { %v3748_v31 = vunpack.i.h.bf16 %v3746_v61  ;;  %v1533_v38 = vunpack.c.l.bf16 %v3299_v25  ;;  %v1641_v40 = vunpack.c.h.bf16 %v3299_v25 }
  0x9a   : > { %v2107_v29 = vmax.f32 %v2099_v7, %v2103_v51  ;;  %v1999_v34 = vmax.f32 %v1991_v43, %v1995_v14 }
  0x9c   : > { %v2110_v33 = vpack.c.bf16 0.0, %v2107_v29  ;;  %v2002_v45 = vpack.c.bf16 0.0, %v1999_v34  ;;  %v3721_v53 = vpop.permute.xlu0 %3720 }
  0x9d   : > { %v3726_v42 = vpop.permute.xlu1 %3725  ;;  %v3723_v27 = vunpack.i.h.bf16 %v3721_v53  ;;  %v3722_v30 = vunpack.i.l.bf16 %v3721_v53 }
  0x9e   : > { %v3728_v54 = vunpack.i.h.bf16 %v3726_v42  ;;  %v3727_v57 = vunpack.i.l.bf16 %v3726_v42  ;;  %2113 = vst [vmem:[#allocation17 + $0x3c] sm:$0xf] %v2110_v33  ;;  %v3552_v58 = vld [vmem:[#allocation17 + $0x10] sm:$0xff]  ;;  %v2211_v42 = vsel %vm4082_vm3, %v3747_v49, %v3861_v4 }
  0x9f   : > { %2005 = vst [vmem:[#allocation17 + $0x38] sm:$0xf] %v2002_v45  ;;  %v591_v8 = vsel %vm4082_vm3, %v3723_v27, %v3861_v4  ;;  %v484_v10 = vsel %vm4082_vm3, %v3722_v30, %v3861_v4  ;;  %2982 = vmatmul.bf16.vlgmr.msra.gmra.mxu2 %v3552_v58  ;;  %v2319_v45 = vsel %vm4082_vm3, %v3748_v31, %v3861_v4 }
  0xa0   : > { %v807_v55 = vsel %vm4082_vm3, %v3728_v54, %v3861_v4  ;;  %v699_v63 = vsel %vm4082_vm3, %v3727_v57, %v3861_v4  ;;  %v595_v21 = vmax.f32 %v4367_v59, %v591_v8  ;;  %v488_v22 = vmax.f32 %v4369_v60, %v484_v10  ;;  %v3761_v54 = vpop.permute.xlu2 %3760 }
  0xa1   : > { %v811_v11 = vmax.f32 %v4432_v46, %v807_v55  ;;  %v703_v15 = vmax.f32 %v4434_v47, %v699_v63  ;;  %v4553_v46 = vsel %vm459_vm4, %v1533_v38, %v3859_v3  ;;  %v4558_v59 = vsel %vm459_vm4, %v1641_v40, %v3859_v3 }
  0xa2   : > { %v598_v43 = vpack.c.bf16 0.0, %v595_v21  ;;  %v490_v50 = vpack.c.bf16 0.0, %v488_v22  ;;  %v1551_v47 = vsel %vm4082_vm3, %v4553_v46, %v3861_v4  ;;  %v1659_v51 = vsel %vm4082_vm3, %v4558_v59, %v3861_v4  ;;  %v3323_v46 = vld [vmem:[%s4054_s26 + $0x48] sm:$0xff]   ;;  %s3525_s26 = sshll.u32 %s4782_s16, 6 }
  0xa3   : > { %v814_v1 = vpack.c.bf16 0.0, %v811_v11  ;;  %v706_v7 = vpack.c.bf16 0.0, %v703_v15  ;;  %v3763_v8 = vunpack.i.h.bf16 %v3761_v54  ;;  %v3762_v10 = vunpack.i.l.bf16 %v3761_v54  ;;  %s4712_s18 = scalar_lea.vmem %s4771_s2, %s3525_s26  ;;  %s4729_s22 = scalar_lea.vmem %s4778_s9, %s3525_s26 }
  0xa4   : > { %v3736_v12 = vpop.permute.xlu0 %3735  ;;  %601 = vst [vmem:[#allocation17 + $0x4] sm:$0xf] %v598_v43 }
  0xa5   : > { %817 = vst [vmem:[#allocation17 + $0xc] sm:$0xf] %v814_v1  ;;  %v3741_v60 = vpop.permute.xlu1 %3740  ;;  %v3738_v34 = vunpack.i.h.bf16 %v3736_v12  ;;  %v3737_v33 = vunpack.i.l.bf16 %v3736_v12  ;;  %v1455_v40 = vsel %vm4082_vm3, %v3763_v8, %v3861_v4  ;;  %v1347_v1 = vsel %vm4082_vm3, %v3762_v10, %v3861_v4 }
  0xa6   : > { %709 = vst [vmem:[#allocation17 + $0x8] sm:$0xf] %v706_v7  ;;  %v3743_v14 = vunpack.i.h.bf16 %v3741_v60  ;;  %v3742_v29 = vunpack.i.l.bf16 %v3741_v60  ;;  %v4575_v53 = vld [vmem:[#allocation17 + $0x38] sm:$0xff] }
  0xa7   : > { %493 = vst [vmem:[#allocation17] sm:$0xf] %v490_v50  ;;  %v2311_v27 = vsel %vm4082_vm3, %v3738_v34, %v3861_v4  ;;  %v2203_v30 = vsel %vm4082_vm3, %v3737_v33, %v3861_v4  ;;  %2731 = vmatmul.bf16.vlgmr.msra.gmra.mxu3 %v4575_v53 }
  0xa8   : > { %v1239_v57 = vsel %vm4082_vm3, %v3743_v14, %v3861_v4  ;;  %v1131_v24 = vsel %vm4082_vm3, %v3742_v29, %v3861_v4  ;;  %v2315_v55 = vmax.f32 %v2307_v23, %v2311_v27  ;;  %v2207_v63 = vmax.f32 %v2199_v5, %v2203_v30  ;;  %3670 = vmatpush.bf16.msra.mxu3 %v4066_v48  ;;  %v3776_v50 = vpop.permute.xlu2 %3775 }
  0xa9   : > { %v1243_v58 = vmax.f32 %v4477_v35, %v1239_v57  ;;  %v1135_v61 = vmax.f32 %v4479_v36, %v1131_v24  ;;  %v3778_v34 = vunpack.i.h.bf16 %v3776_v50  ;;  %v3777_v17 = vunpack.i.l.bf16 %v3776_v50 }
  0xaa   : > { %v2215_v11 = vmax.f32 %v2207_v63, %v2211_v42  ;;  %v2323_v15 = vmax.f32 %v2315_v55, %v2319_v45 }
  0xab   : > { %v1246_v35 = vpack.c.bf16 0.0, %v1243_v58  ;;  %v1138_v36 = vpack.c.bf16 0.0, %v1135_v61 }
  0xac   : > { %v2218_v21 = vpack.c.bf16 0.0, %v2215_v11  ;;  %v2326_v18 = vpack.c.bf16 0.0, %v2323_v15  ;;  %v3751_v22 = vpop.permute.xlu0 %3750  ;;  %3671 = vmatpush.bf16.msra.mxu3 %v4094_v56  ;;  %v3529_v15 = vld [vmem:[#allocation17 + $0x10] sm:$0xff] }
  0xad   : > { %1249 = vst [vmem:[#allocation17 + $0x1c] sm:$0xf] %v1246_v35  ;;  %v4603_v23 = vld [vmem:[#allocation17 + $0x8] sm:$0xff]  ;;  %v3756_v25 = vpop.permute.xlu1 %3755  ;;  %v3753_v16 = vunpack.i.h.bf16 %v3751_v22  ;;  %v3752_v5 = vunpack.i.l.bf16 %v3751_v22 }
  0xae   : > { %1141 = vst [vmem:[#allocation17 + $0x18] sm:$0xf] %v1138_v36  ;;  %v3758_v31 = vunpack.i.h.bf16 %v3756_v25  ;;  %v3757_v38 = vunpack.i.l.bf16 %v3756_v25  ;;  %2701 = vmatmul.bf16.vlgmr.msra.gmra.mxu0 %v4603_v23  ;;  %v3527_v48 = vld [vmem:[#allocation17] sm:$0xff] }
  0xaf   : > { %2221 = vst [vmem:[#allocation17 + $0x40] sm:$0xf] %v2218_v21  ;;  %v1447_v7 = vsel %vm4082_vm3, %v3753_v16, %v3861_v4  ;;  %v1339_v56 = vsel %vm4082_vm3, %v3752_v5, %v3861_v4  ;;  %2804 = vmatmul.bf16.vlgmr.msra.gmra.mxu1 %v3527_v48 }
  0xb0   : > { %2329 = vst [vmem:[#allocation17 + $0x44] sm:$0xf] %v2326_v18  ;;  %v1879_v43 = vsel %vm4082_vm3, %v3758_v31, %v3861_v4  ;;  %v1771_v49 = vsel %vm4082_vm3, %v3757_v38, %v3861_v4  ;;  %v1451_v60 = vmax.f32 %v1443_v39, %v1447_v7  ;;  %v1343_v12 = vmax.f32 %v1335_v37, %v1339_v56 }
  0xb1   : > { %v1883_v14 = vmax.f32 %v1875_v26, %v1879_v43  ;;  %v1775_v20 = vmax.f32 %v1767_v62, %v1771_v49  ;;  %3672 = vmatpush.bf16.msra.mxu3 %v4123_v13  ;;  %v1671_v13 = vsel %vm4082_vm3, %v3778_v34, %v3861_v4  ;;  %v1563_v62 = vsel %vm4082_vm3, %v3777_v17, %v3861_v4  ;;  %v3557_v34 = vld [vmem:[#allocation17 + $0x38] sm:$0xff] }
  0xb2   : > { %v1351_v39 = vmax.f32 %v1343_v12, %v1347_v1  ;;  %v1459_v29 = vmax.f32 %v1451_v60, %v1455_v40 }
  0xb4   : > { %v1354_v37 = vpack.c.bf16 0.0, %v1351_v39  ;;  %v1462_v33 = vpack.c.bf16 0.0, %v1459_v29  ;;  %v3766_v42 = vpop.permute.xlu0 %3765 }
  0xb5   : > { %v3553_v45 = vld [vmem:[#allocation17 + $0x18] sm:$0xff]  ;;  %v3771_v54 = vpop.permute.xlu1 %3770  ;;  %v3768_v57 = vunpack.i.h.bf16 %v3766_v42  ;;  %v3767_v28 = vunpack.i.l.bf16 %v3766_v42  ;;  %3673 = vmatpush.bf16.msra.mxu3 %v4238_v2 }
  0xb6   : > { %v3773_v26 = vunpack.i.h.bf16 %v3771_v54  ;;  %v3772_v24 = vunpack.i.l.bf16 %v3771_v54  ;;  %1357 = vst [vmem:[#allocation17 + $0x20] sm:$0xf] %v1354_v37  ;;  %2987 = vmatmul.bf16.gmra.mxu2 %v3553_v45 }
  0xb7   : > { %v3543_v41 = vld [vmem:[#allocation17 + $0x40] sm:$0xff]  ;;  %1465 = vst [vmem:[#allocation17 + $0x24] sm:$0xf] %v1462_v33  ;;  %v1887_v27 = vsel %vm4082_vm3, %v3768_v57, %v3861_v4  ;;  %v1779_v2 = vsel %vm4082_vm3, %v3767_v28, %v3861_v4 }
  0xb8   : > { %v1663_v30 = vsel %vm4082_vm3, %v3773_v26, %v3861_v4  ;;  %v1555_v58 = vsel %vm4082_vm3, %v3772_v24, %v3861_v4  ;;  %v1891_v61 = vmax.f32 %v1883_v14, %v1887_v27  ;;  %v1783_v55 = vmax.f32 %v1775_v20, %v1779_v2  ;;  %2736 = vmatmul.bf16.gmra.mxu3 %v3543_v41  ;;  %v3530_v14 = vld [vmem:[#allocation17 + $0x18] sm:$0xff]  ;;  %v4717_v28 = vld [vmem:[%s4770_s1] ss:$0 sm:$0xff] }
  0xb9   : > { %v1667_v63 = vmax.f32 %v1659_v51, %v1663_v30  ;;  %v1559_v8 = vmax.f32 %v1551_v47, %v1555_v58  ;;  %3674 = vmatpush.bf16.msra.mxu3 %v4253_v9  ;;  %v2397_v9 = vunpack.c.l.bf16 %v3323_v46  ;;  %v2505_v51 = vunpack.c.h.bf16 %v3323_v46  ;;  %v3569_v26 = vld [vmem:[%s4712_s18] sm:$0xff]  }
  0xba   : > { %v1894_v10 = vpack.c.bf16 0.0, %v1891_v61  ;;  %v1786_v35 = vpack.c.bf16 0.0, %v1783_v55  ;;  %v3570_v27 = vunpack.c.l.bf16 %v3569_v26  ;;  %v3571_v58 = vunpack.c.h.bf16 %v3569_v26 }
  0xbb   : > { %v1567_v36 = vmax.f32 %v1559_v8, %v1563_v62  ;;  %v1675_v11 = vmax.f32 %v1667_v63, %v1671_v13  ;;  %v2511_v31 = vsel %vm459_vm4, %v2505_v51, %v3859_v3 }
  0xbc   : > { %1897 = vst [vmem:[#allocation17 + $0x34] sm:$0xf] %v1894_v10  ;;  %v3781_v59 = vpop.permute.xlu0 %3780  ;;  %v2523_v1 = vsel %vm4082_vm3, %v2511_v31, %v3861_v4 }
  0xbd   : > { %v1570_v21 = vpack.c.bf16 0.0, %v1567_v36  ;;  %v1678_v18 = vpack.c.bf16 0.0, %v1675_v11  ;;  %1789 = vst [vmem:[#allocation17 + $0x30] sm:$0xf] %v1786_v35  ;;  %3675 = vmatpush.bf16.msra.mxu3 %v4275_v19  ;;  %v3786_v47 = vpop.permute.xlu1 %3785  ;;  %v3783_v22 = vunpack.i.h.bf16 %v3781_v59  ;;  %v3782_v25 = vunpack.i.l.bf16 %v3781_v59 }
  0xbe   : > { %2706 = vmatmul.bf16.gmra.mxu0 %v3529_v15  ;;  %v3788_v16 = vunpack.i.h.bf16 %v3786_v47  ;;  %v3787_v5 = vunpack.i.l.bf16 %v3786_v47  ;;  %v2403_v19 = vsel %vm459_vm4, %v2397_v9, %v3859_v3  ;;  %v3554_v38 = vld [vmem:[#allocation17 + $0x20] sm:$0xff]  ;;  %v3640_v47 = vld [vmem:[%s4712_s18 + $0x8] sm:$0xff]  }
  0xbf   : > { %1573 = vst [vmem:[#allocation17 + $0x28] sm:$0xf] %v1570_v21  ;;  %2809 = vmatmul.bf16.gmra.mxu1 %v4603_v23  ;;  %v2527_v23 = vsel %vm4082_vm3, %v3783_v22, %v3861_v4  ;;  %v2415_v40 = vsel %vm4082_vm3, %v2403_v19, %v3861_v4  ;;  %v3531_v52 = vld [vmem:[#allocation17 + $0x20] sm:$0xff]  ;;  %v3575_v31 = vunpack.c.h.bf16 %v3640_v47 }
  0xc0   : > { %1681 = vst [vmem:[#allocation17 + $0x2c] sm:$0xf] %v1678_v18  ;;  %v2535_v6 = vsel %vm4082_vm3, %v3788_v16, %v3861_v4  ;;  %v2427_v7 = vsel %vm4082_vm3, %v3787_v5, %v3861_v4  ;;  %v2531_v56 = vmax.f32 %v2523_v1, %v2527_v23  ;;  %v3574_v16 = vunpack.c.l.bf16 %v3640_v47 }
  0xc1   : > { %3676 = vmatpush.bf16.msra.mxu3 %v4307_v32  ;;  %v2419_v32 = vsel %vm4082_vm3, %v3782_v25, %v3861_v4 }
  0xc2   : > { %v2423_v43 = vmax.f32 %v2415_v40, %v2419_v32  ;;  %v2539_v50 = vmax.f32 %v2531_v56, %v2535_v6 }
  0xc4   : > { %v3533_v48 = vld [vmem:[#allocation17 + $0x30] sm:$0xff]  ;;  %v2431_v49 = vmax.f32 %v2423_v43, %v2427_v7  ;;  %v2542_v12 = vpack.c.bf16 0.0, %v2539_v50 }
  0xc5   : > { %3677 = vmatpush.bf16.msra.mxu3 %v4343_v44  ;;  %v3556_v39 = vld [vmem:[#allocation17 + $0x30] sm:$0xff]  ;;  %v3558_v44 = vld [vmem:[#allocation17 + $0x40] sm:$0xff] }
  0xc6   : > { %2992 = vmatmul.bf16.gmra.mxu2 %v3554_v38  ;;  %v2434_v60 = vpack.c.bf16 0.0, %v2431_v49  ;;  %2545 = vst [vmem:[#allocation17 + $0x4c] sm:$0xf] %v2542_v12  ;;  %v3641_v12 = vld [vmem:[%s4712_s18 + $0x10] sm:$0xff]  }
  0xc7   : > { %v3555_v20 = vld [vmem:[#allocation17 + $0x28] sm:$0xff] }
  0xc8   : > { %2834 = vmatmul.bf16.vlgmr.msrb.gmra.mxu3 %v3533_v48  ;;  %2437 = vst [vmem:[#allocation17 + $0x48] sm:$0xf] %v2434_v60  ;;  %v3532_v29 = vld [vmem:[#allocation17 + $0x28] sm:$0xff] }
  0xce   : > { %2711 = vmatmul.bf16.gmra.mxu0 %v3530_v14 }
  0xcf   : > { %2814 = vmatmul.bf16.gmra.mxu1 %v3529_v15  ;;  %v3559_v17 = vld [vmem:[#allocation17 + $0x48] sm:$0xff] }
  0xd6   : > { %2997 = vmatmul.bf16.gmra.mxu2 %v3555_v20 }
  0xd8   : > { %2839 = vmatmul.bf16.gmra.mxu3 %v4575_v53 }
  0xde   : > { %2716 = vmatmul.bf16.gmra.mxu0 %v3531_v52 }
  0xdf   : > { %2819 = vmatmul.bf16.gmra.mxu1 %v3530_v14 }
  0xe6   : > { %3002 = vmatmul.bf16.gmra.mxu2 %v3556_v39 }
  0xe8   : > { %3012 = vmatmul.bf16.vlgmr.msra.gmra.mxu3 %v3558_v44  ;;  %v3578_v44 = vunpack.c.l.bf16 %v3641_v12 }
  0xee   : > { %2721 = vmatmul.bf16.gmra.mxu0 %v3532_v29 }
  0xef   : > { %2824 = vmatmul.bf16.gmra.mxu1 %v3531_v52 }
  0xf6   : > { %3007 = vmatmul.bf16.gmra.mxu2 %v3557_v34 }
  0xf8   : > { %3017 = vmatmul.bf16.gmra.mxu3 %v3559_v17  ;;  %v3579_v17 = vunpack.c.h.bf16 %v3641_v12 }
  0xfe   : > { %2726 = vmatmul.bf16.gmra.mxu0 %v3533_v48 }
  0xff   : > { %2829 = vmatmul.bf16.gmra.mxu1 %v3532_v29 }
 0x122   : > { %v2983_v37 = vpop.f32.mrf.mxu2 }
 0x12a   : > { %v4706_v53 = vpop.f32.mrf.mxu3  ;;  %v2985_v54 = vpop.f32.mrf.mxu2 }
 0x12b   : > { %v2702_v33 = vpop.f32.mrf.mxu0 }
 0x12c   : > { %v2805_v45 = vpop.f32.mrf.mxu1 }
 0x12d   : > { %v2806_v42 = vadd.f32 %v2805_v45, %v2702_v33 }
 0x12f   : > { %v3023_v57 = vadd.f32 %v2983_v37, %v2806_v42 }
 0x131   : > { %v3043_v62 = vadd.f32 %v4717_v28, %v3023_v57 }
 0x132   : > { %v4720_v41 = vpop.f32.mrf.mxu3 }
 0x133   : > { %v2704_v24 = vpop.f32.mrf.mxu0  ;;  %v3091_v55 = vadd.f32 %v3570_v27, %v3043_v62 }
 0x134   : > { %v2807_v13 = vpop.f32.mrf.mxu1 }
 0x135   : > { %v2808_v2 = vadd.f32 %v2807_v13, %v2704_v24  ;;  %v3107_v11 = vmax.f32 %v3091_v55, 0.0 }
 0x137   : > { %v3024_v30 = vadd.f32 %v2985_v54, %v2808_v2 }
 0x139   : > { %v2988_v61 = vpop.f32.mrf.mxu2  ;;  %v3044_v63 = vadd.f32 %v4717_v28, %v3024_v30 }
 0x13b   : > { %v2707_v8 = vpop.f32.mrf.mxu0  ;;  %v4724_v10 = vpop.f32.mrf.mxu3  ;;  %v3092_v35 = vadd.f32 %v3571_v58, %v3044_v63  ;;  %v3642_v58 = vld [vmem:[%s4712_s18 + $0x18] sm:$0xff]  }
 0x13c   : > { %v2810_v36 = vpop.f32.mrf.mxu1 }
 0x13d   : > { %v3108_v15 = vmax.f32 %v3092_v35, 0.0  ;;  %v2811_v21 = vadd.f32 %v2810_v36, %v2707_v8  ;;  %v3582_v35 = vunpack.c.l.bf16 %v3642_v58 }
 0x13f   : > { %v3603_v18 = vpack.c.bf16 %v3108_v15, %v3107_v11  ;;  %v3025_v59 = vadd.f32 %v2988_v61, %v2811_v21  ;;  %v3583_v15 = vunpack.c.h.bf16 %v3642_v58  ;;  %v3646_v58 = vld [vmem:[%s4712_s18 + $0x38] sm:$0xff]  }
 0x141   : > { %v2990_v46 = vpop.f32.mrf.mxu2  ;;  %3604 = vst [vmem:[%s4729_s22] sm:$0xff] %v3603_v18   ;;  %v3045_v25 = vadd.f32 %v4717_v28, %v3025_v59 }
 0x143   : > { %v2709_v9 = vpop.f32.mrf.mxu0  ;;  %v4733_v51 = vpop.f32.mrf.mxu3  ;;  %v3093_v32 = vadd.f32 %v3574_v16, %v3045_v25 }
 0x144   : > { %v2812_v22 = vpop.f32.mrf.mxu1 }
 0x145   : > { %v2813_v5 = vadd.f32 %v2812_v22, %v2709_v9  ;;  %v3109_v7 = vmax.f32 %v3093_v32, 0.0 }
 0x147   : > { %v3026_v19 = vadd.f32 %v2990_v46, %v2813_v5 }
 0x149   : > { %v2993_v23 = vpop.f32.mrf.mxu2  ;;  %v3046_v38 = vadd.f32 %v4717_v28, %v3026_v19 }
 0x14b   : > { %v2712_v48 = vpop.f32.mrf.mxu0  ;;  %v2835_v40 = vpop.f32.mrf.mxu3  ;;  %v3094_v1 = vadd.f32 %v3575_v31, %v3046_v38 }
 0x14c   : > { %v2815_v6 = vpop.f32.mrf.mxu1  ;;  %v2836_v9 = vadd.f32 %v2835_v40, %v4706_v53 }
 0x14d   : > { %v3110_v56 = vmax.f32 %v3094_v1, 0.0  ;;  %v2816_v43 = vadd.f32 %v2815_v6, %v2712_v48  ;;  %v3643_v1 = vld [vmem:[%s4712_s18 + $0x20] sm:$0xff]  }
 0x14f   : > { %v3608_v49 = vpack.c.bf16 %v3110_v56, %v3109_v7  ;;  %v3027_v60 = vadd.f32 %v2993_v23, %v2816_v43  ;;  %v3645_v23 = vld [vmem:[%s4712_s18 + $0x30] sm:$0xff]  }
 0x150   : > { %v3594_v7 = vunpack.c.l.bf16 %v3645_v23  ;;  %v3595_v40 = vunpack.c.h.bf16 %v3645_v23 }
 0x151   : > { %v2995_v50 = vpop.f32.mrf.mxu2  ;;  %3647 = vst [vmem:[%s4729_s22 + $0x8] sm:$0xff] %v3608_v49   ;;  %v3047_v39 = vadd.f32 %v4717_v28, %v3027_v60 }
 0x153   : > { %v2714_v14 = vpop.f32.mrf.mxu0  ;;  %v2837_v20 = vpop.f32.mrf.mxu3  ;;  %v3095_v33 = vadd.f32 %v3578_v44, %v3047_v39 }
 0x154   : > { %v2817_v52 = vpop.f32.mrf.mxu1  ;;  %v2838_v38 = vadd.f32 %v2837_v20, %v4720_v41  ;;  %v3587_v20 = vunpack.c.h.bf16 %v3643_v1 }
 0x155   : > { %v2818_v29 = vadd.f32 %v2817_v52, %v2714_v14  ;;  %v3111_v24 = vmax.f32 %v3095_v33, 0.0 }
 0x157   : > { %v3028_v34 = vadd.f32 %v2995_v50, %v2818_v29  ;;  %v3586_v50 = vunpack.c.l.bf16 %v3643_v1 }
 0x159   : > { %v2998_v37 = vpop.f32.mrf.mxu2  ;;  %v3048_v45 = vadd.f32 %v4717_v28, %v3028_v34 }
 0x15b   : > { %v2717_v42 = vpop.f32.mrf.mxu0  ;;  %v2840_v54 = vpop.f32.mrf.mxu3  ;;  %v3096_v57 = vadd.f32 %v3579_v17, %v3048_v45 }
 0x15c   : > { %v2820_v26 = vpop.f32.mrf.mxu1 }
 0x15d   : > { %v3112_v13 = vmax.f32 %v3096_v57, 0.0  ;;  %v2821_v62 = vadd.f32 %v2820_v26, %v2717_v42  ;;  %v2841_v42 = vadd.f32 %v2840_v54, %v4724_v10 }
 0x15f   : > { %v3613_v27 = vpack.c.bf16 %v3112_v13, %v3111_v24  ;;  %v3029_v30 = vadd.f32 %v2998_v37, %v2821_v62 }
 0x161   : > { %v3000_v2 = vpop.f32.mrf.mxu2  ;;  %3648 = vst [vmem:[%s4729_s22 + $0x10] sm:$0xff] %v3613_v27   ;;  %v3049_v8 = vadd.f32 %v4717_v28, %v3029_v30 }
 0x163   : > { %v2719_v61 = vpop.f32.mrf.mxu0  ;;  %v2842_v55 = vpop.f32.mrf.mxu3  ;;  %v3097_v18 = vadd.f32 %v3582_v35, %v3049_v8  ;;  %v3644_v35 = vld [vmem:[%s4712_s18 + $0x28] sm:$0xff]  }
 0x164   : > { %v2822_v63 = vpop.f32.mrf.mxu1 }
 0x165   : > { %v2823_v36 = vadd.f32 %v2822_v63, %v2719_v61  ;;  %v3113_v16 = vmax.f32 %v3097_v18, 0.0  ;;  %v2843_v63 = vadd.f32 %v2842_v55, %v4733_v51  ;;  %v3590_v18 = vunpack.c.l.bf16 %v3644_v35 }
 0x167   : > { %v3030_v11 = vadd.f32 %v3000_v2, %v2823_v36 }
 0x169   : > { %v3003_v21 = vpop.f32.mrf.mxu2  ;;  %v3050_v46 = vadd.f32 %v4717_v28, %v3030_v11  ;;  %v3598_v11 = vunpack.c.l.bf16 %v3646_v58 }
 0x16b   : > { %v2722_v59 = vpop.f32.mrf.mxu0  ;;  %v3013_v47 = vpop.f32.mrf.mxu3  ;;  %v3098_v22 = vadd.f32 %v3583_v15, %v3050_v46 }
 0x16c   : > { %v2825_v25 = vpop.f32.mrf.mxu1  ;;  %v3035_v31 = vadd.f32 %v3013_v47, %v2836_v9 }
 0x16d   : > { %v3114_v5 = vmax.f32 %v3098_v22, 0.0  ;;  %v2826_v19 = vadd.f32 %v2825_v25, %v2722_v59  ;;  %v3591_v25 = vunpack.c.h.bf16 %v3644_v35 }
 0x16e   : > { %v3055_v6 = vadd.f32 %v4717_v28, %v3035_v31 }
 0x16f   : > { %v3618_v32 = vpack.c.bf16 %v3114_v5, %v3113_v16  ;;  %v3031_v48 = vadd.f32 %v3003_v21, %v2826_v19  ;;  %v3599_v21 = vunpack.c.h.bf16 %v3646_v58 }
 0x170   : > { %v3103_v14 = vadd.f32 %v3594_v7, %v3055_v6 }
 0x171   : > { %3649 = vst [vmem:[%s4729_s22 + $0x18] sm:$0xff] %v3618_v32   ;;  %v3005_v56 = vpop.f32.mrf.mxu2  ;;  %v3051_v12 = vadd.f32 %v4717_v28, %v3031_v48 }
 0x172   : > { %v3119_v34 = vmax.f32 %v3103_v14, 0.0 }
 0x173   : > { %v2724_v43 = vpop.f32.mrf.mxu0  ;;  %v3015_v49 = vpop.f32.mrf.mxu3  ;;  %v3099_v29 = vadd.f32 %v3586_v50, %v3051_v12 }
 0x174   : > { %v3036_v53 = vadd.f32 %v3015_v49, %v2838_v38  ;;  %v2827_v60 = vpop.f32.mrf.mxu1 }
 0x175   : > { %v2828_v52 = vadd.f32 %v2827_v60, %v2724_v43  ;;  %v3115_v62 = vmax.f32 %v3099_v29, 0.0 }
 0x176   : > { %v3056_v39 = vadd.f32 %v4717_v28, %v3036_v53 }
 0x177   : > { %v3032_v41 = vadd.f32 %v3005_v56, %v2828_v52 }
 0x178   : > { %v3104_v44 = vadd.f32 %v3595_v40, %v3056_v39 }
 0x179   : > { %v3052_v17 = vadd.f32 %v4717_v28, %v3032_v41  ;;  %v3008_v24 = vpop.f32.mrf.mxu2 }
 0x17a   : > { %v3120_v37 = vmax.f32 %v3104_v44, 0.0 }
 0x17b   : > { %v2727_v33 = vpop.f32.mrf.mxu0  ;;  %v3018_v45 = vpop.f32.mrf.mxu3  ;;  %v3100_v57 = vadd.f32 %v3587_v20, %v3052_v17 }
 0x17c   : > { %v3633_v26 = vpack.c.bf16 %v3120_v37, %v3119_v34  ;;  %v2830_v13 = vpop.f32.mrf.mxu1  ;;  %v3037_v30 = vadd.f32 %v3018_v45, %v2841_v42 }
 0x17d   : > { %v3116_v27 = vmax.f32 %v3100_v57, 0.0  ;;  %v2831_v2 = vadd.f32 %v2830_v13, %v2727_v33 }
 0x17e   : > { %3652 = vst [vmem:[%s4729_s22 + $0x30] sm:$0xff] %v3633_v26   ;;  %v3057_v36 = vadd.f32 %v4717_v28, %v3037_v30 }
 0x17f   : > { %v3623_v61 = vpack.c.bf16 %v3116_v27, %v3115_v62  ;;  %v3033_v8 = vadd.f32 %v3008_v24, %v2831_v2 }
 0x180   : > { %v3105_v47 = vadd.f32 %v3598_v11, %v3057_v36 }
 0x181   : > { %3650 = vst [vmem:[%s4729_s22 + $0x20] sm:$0xff] %v3623_v61   ;;  %v3053_v59 = vadd.f32 %v4717_v28, %v3033_v8  ;;  %v3010_v55 = vpop.f32.mrf.mxu2 }
 0x182   : > { %v3121_v19 = vmax.f32 %v3105_v47, 0.0 }
 0x183   : > { %v2729_v10 = vpop.f32.mrf.mxu0  ;;  %v3020_v54 = vpop.f32.mrf.mxu3  ;;  %v3101_v5 = vadd.f32 %v3590_v18, %v3053_v59 }
 0x184   : > { %v3038_v15 = vadd.f32 %v3020_v54, %v2843_v63  ;;  %v2832_v46 = vpop.f32.mrf.mxu1 }
 0x185   : > { %v2833_v9 = vadd.f32 %v2832_v46, %v2729_v10  ;;  %v3117_v48 = vmax.f32 %v3101_v5, 0.0 }
 0x186   : > { %v3058_v51 = vadd.f32 %v4717_v28, %v3038_v15 }
 0x187   : > { %v3034_v22 = vadd.f32 %v3010_v55, %v2833_v9 }
 0x188   : > { %v3106_v16 = vadd.f32 %v3599_v21, %v3058_v51 }
 0x189   : > { %v3054_v31 = vadd.f32 %v4717_v28, %v3034_v22 }
 0x18a   : > { %v3122_v23 = vmax.f32 %v3106_v16, 0.0 }
 0x18b   : > { %v3102_v32 = vadd.f32 %v3591_v25, %v3054_v31 }
 0x18c   : > { %v3638_v38 = vpack.c.bf16 %v3122_v23, %v3121_v19 }
 0x18d   : > { %v3118_v1 = vmax.f32 %v3102_v32, 0.0 }
 0x18e   : > { %3653 = vst [vmem:[%s4729_s22 + $0x38] sm:$0xff] %v3638_v38  }
 0x18f   : > { %v3628_v6 = vpack.c.bf16 %v3118_v1, %v3117_v48 }
 0x191   : > { %3651 = vst [vmem:[%s4729_s22 + $0x28] sm:$0xff] %v3628_v6  }
 0x192 PF: > { %s40_s15 = sadd.s32 1, %s3796_s15  }
 0x193   : > { %p37_p4 = scmp.ge.s32.totalorder %s40_s15, 4  }
 0x195   :  { %39 = sbr.rel (!%p37_p4) target bundleno = 3 (0x3), region = 199 }

// kernel: run.9
= control target key start
LH: loop header
LB: loop body
LE: loop exit
PB: predicated region body
PF: predicated region fallthrough
CT: control target
= control target key end

     0   :  { %s3709_s11 = smov 0   ;;  %s4602_s0 = inlined_call_operand.vmem [shape: bf16[3,128,128], index: 0, kind: input, shape index: {}]   ;;  %s4603_s1 = inlined_call_operand.vmem [shape: f32[1,128], index: 1, kind: input, shape index: {}]   ;;  %s4604_s2 = inlined_call_operand.<no memory space> [shape: s32[], index: 2, kind: input, shape index: {}]   ;;  %s4605_s3 = inlined_call_operand.vmem [shape: bf16[2,160,32], index: 3, kind: input, shape index: {}]   ;;  %s4606_s4 = inlined_call_operand.<no memory space> [shape: bf16[], index: 4, kind: input, shape index: {}]   ;;  %s4607_s5 = inlined_call_operand.vmem [shape: bf16[2,160,32], index: 5, kind: input, shape index: {}]   ;;  %s4608_s6 = inlined_call_operand.vmem [shape: bf16[2,160,32], index: 6, kind: input, shape index: {}]   ;;  %s4609_s7 = inlined_call_operand.<no memory space> [shape: bf16[], index: 7, kind: input, shape index: {}]   ;;  %s4610_s8 = inlined_call_operand.vmem [shape: bf16[2,128,128], index: 8, kind: output, shape index: {}]  }
   0x1   :  { %v13_v0 = vstv %s4604_s2  ;;  %v14_v1 = vstv %s4606_s4  ;;  %v29_v2 = vstv %s4609_s7 }
   0x2   :  { %v3705_v3 = vunpack.i.l.bf16 %v14_v1  ;;  %v3707_v4 = vunpack.i.l.bf16 %v29_v2 }
   0x3 LB: > { %s3151_s12 = sadd.s32 4294967295, %s3647_s11   ;;  %p3155_p0 = scmp.ge.s32.totalorder %s3647_s11, 1  ;;  %s3647_s11 = sphi %s3709_s11, %s39_s11  }
   0x4   : > { %p257_p1 = scmp.lt.s32.totalorder %s3647_s11, 3 }
   0x6   : > { %p258_p2 = pnand %p3155_p0, %p257_p1 }
   0x8   : > { %261 = sbr.rel (%p258_p2) target bundleno = 400 (0x190), region = 40 }
   0xd   : > { %p310_p3 = scmp.lt.s32.totalorder %s3151_s12, 1  ;;  %v360_v5 = vlaneseq  ;;  %s3649_s18 = smov 32  }
   0xe   : > { %s3650_s19 = smov 64  }
   0xf   : > { %s4614_s12 = smov (!%p310_p3, %s3151_s12), 1  ;;  %v3719_v6 = vand.u32 127, %v360_v5 }
  0x10   : > { %s3722_s4 = smul.u32 80, %s4614_s12  ;;  %s3416_s10 = sshll.u32 %s4614_s12, 6 }
  0x11   : > { %v3725_v7 = vadd.s32 128, %v3719_v6  ;;  %vm393_vm1 = vcmp.lt.s32.totalorder %v3719_v6, 96  ;;  %vm367_vm2 = vcmp.lt.s32.totalorder %v3719_v6, 64  ;;  %vm3928_vm3 = vcmp.lt.s32.totalorder %v3719_v6, %v13_v0  ;;  %s4569_s13 = scalar_lea.vmem %s4610_s8, %s3416_s10 }
  0x12   : > { %s3731_s14 = scalar_lea.vmem %s4607_s5, %s3722_s4  ;;  %s3737_s17 = scalar_lea.vmem %s4605_s3, %s3722_s4  ;;  %vm412_vm4 = vcmp.lt.s32.totalorder %v3719_v6, 32 }
  0x13   : > { %vm363_vm0 = vcmp.lt.s32.totalorder %v3725_v7, 160  ;;  %v3171_v8 = vld [vmem:[%s3731_s14 + $0x10] sm:$0xff]   ;;  %v3201_v10 = vld [vmem:[%s3731_s14 + $0x38] sm:$0xff]   ;;  %v3164_v32 = vld [vmem:[%s3737_s17 + $0x8] sm:$0xff]   ;;  %s3900_s22 = scalar_lea.vmem %s4608_s6, %s3722_s4 }
  0x14   : > { %v3170_v9 = vld [vmem:[%s3737_s17 + $0x10] sm:$0xff]   ;;  %v813_v11 = vunpack.c.l.bf16 %v3171_v8  ;;  %v921_v12 = vunpack.c.h.bf16 %v3171_v8  ;;  %v3200_v15 = vld [vmem:[%s3737_s17 + $0x38] sm:$0xff]   ;;  %v1893_v16 = vunpack.c.l.bf16 %v3201_v10  ;;  %v2001_v17 = vunpack.c.h.bf16 %v3201_v10  ;;  %v357_v35 = vld [vmem:[%s3737_s17] sm:$0xff]  }
  0x15   : > { %v785_v13 = vunpack.c.l.bf16 %v3170_v9  ;;  %v893_v14 = vunpack.c.h.bf16 %v3170_v9  ;;  %v1865_v18 = vunpack.c.l.bf16 %v3200_v15  ;;  %v1973_v19 = vunpack.c.h.bf16 %v3200_v15  ;;  %v3176_v44 = vld [vmem:[%s3737_s17 + $0x18] sm:$0xff]   ;;  %v383_v45 = vld [vmem:[%s3731_s14] sm:$0xff]   ;;  %v3165_v49 = vld [vmem:[%s3731_s14 + $0x8] sm:$0xff]  }
  0x16   : > { %v820_v20 = vsel %vm363_vm0, %v813_v11, %v3705_v3  ;;  %v928_v21 = vsel %vm363_vm0, %v921_v12, %v3705_v3  ;;  %v1900_v30 = vsel %vm363_vm0, %v1893_v16, %v3705_v3  ;;  %v2008_v31 = vsel %vm363_vm0, %v2001_v17, %v3705_v3  ;;  %v3207_v48 = vld [vmem:[%s3731_s14 + $0x40] sm:$0xff]   ;;  %v3177_v17 = vld [vmem:[%s3731_s14 + $0x18] sm:$0xff]   ;;  %v3440_v7 = vld [vmem:[%s4602_s0 + $0x70] sm:$0xff] }
  0x17   : > { %v792_v22 = vsel %vm363_vm0, %v785_v13, %v3705_v3  ;;  %v900_v23 = vsel %vm363_vm0, %v893_v14, %v3705_v3  ;;  %v824_v24 = vsel %vm393_vm1, %v820_v20, %v3705_v3  ;;  %v932_v25 = vsel %vm393_vm1, %v928_v21, %v3705_v3  ;;  %v3183_v20 = vld [vmem:[%s3731_s14 + $0x20] sm:$0xff]  }
  0x18   : > { %v796_v26 = vsel %vm367_vm2, %v792_v22, %v3705_v3  ;;  %v904_v27 = vsel %vm367_vm2, %v900_v23, %v3705_v3  ;;  %v3540_v28 = vpack.i.bf16 %v932_v25, %v824_v24  ;;  %v1872_v33 = vsel %vm363_vm0, %v1865_v18, %v3705_v3  ;;  %v3195_v24 = vld [vmem:[%s3731_s14 + $0x30] sm:$0xff]  }
  0x19   : > { %v3550_v29 = vpack.i.bf16 %v904_v27, %v796_v26  ;;  %v1980_v34 = vsel %vm363_vm0, %v1973_v19, %v3705_v3  ;;  %v1904_v36 = vsel %vm393_vm1, %v1900_v30, %v3705_v3  ;;  %v2012_v37 = vsel %vm393_vm1, %v2008_v31, %v3705_v3 }
  0x1a   : > { %3541 = vrot.lane.b32.xlu0 %v3540_v28, %s3649_s18  ;;  %v1876_v38 = vsel %vm367_vm2, %v1872_v33, %v3705_v3  ;;  %v1984_v39 = vsel %vm367_vm2, %v1980_v34, %v3705_v3  ;;  %v569_v40 = vunpack.c.l.bf16 %v3164_v32  ;;  %v677_v41 = vunpack.c.h.bf16 %v3164_v32 }
  0x1b   : > { %3551 = vrot.lane.b32.xlu1 %v3550_v29, %s3650_s19  ;;  %v358_v42 = vunpack.c.l.bf16 %v357_v35  ;;  %v461_v43 = vunpack.c.h.bf16 %v357_v35  ;;  %v3545_v46 = vpack.i.bf16 %v2012_v37, %v1904_v36  ;;  %v3555_v47 = vpack.i.bf16 %v1984_v39, %v1876_v38  ;;  %v3206_v36 = vld [vmem:[%s3737_s17 + $0x40] sm:$0xff]  }
  0x1c   : > { %v576_v50 = vsel %vm363_vm0, %v569_v40, %v3705_v3  ;;  %v684_v51 = vsel %vm363_vm0, %v677_v41, %v3705_v3  ;;  %v1001_v54 = vunpack.c.l.bf16 %v3176_v44  ;;  %v384_v55 = vunpack.c.l.bf16 %v383_v45 }
  0x1d   : > { %v364_v52 = vsel %vm363_vm0, %v358_v42, %v3705_v3  ;;  %v468_v53 = vsel %vm363_vm0, %v461_v43, %v3705_v3  ;;  %v1109_v56 = vunpack.c.h.bf16 %v3176_v44  ;;  %v2109_v57 = vunpack.c.l.bf16 %v3207_v48  ;;  %v3194_v43 = vld [vmem:[%s3737_s17 + $0x30] sm:$0xff]  }
  0x1e   : > { %v489_v58 = vunpack.c.h.bf16 %v383_v45  ;;  %v597_v59 = vunpack.c.l.bf16 %v3165_v49  ;;  %v580_v60 = vsel %vm367_vm2, %v576_v50, %v3705_v3  ;;  %v688_v61 = vsel %vm367_vm2, %v684_v51, %v3705_v3  ;;  %v3441_v51 = vld [vmem:[%s4602_s0 + $0x78] sm:$0xff] }
  0x1f   : > { %v390_v62 = vsel %vm363_vm0, %v384_v55, %v3705_v3  ;;  %v705_v63 = vunpack.c.h.bf16 %v3165_v49  ;;  %v368_v1 = vsel %vm367_vm2, %v364_v52, %v3705_v3  ;;  %v472_v2 = vsel %vm367_vm2, %v468_v53, %v3705_v3  ;;  %v3189_v55 = vld [vmem:[%s3731_s14 + $0x28] sm:$0xff]   ;;  %3505 = vmatpush.bf16.msra.mxu3 %v3441_v51  ;;  %2646 = vmatpush.bf16.msra.mxu0 %v3441_v51 }
  0x20   : > { %v394_v5 = vsel %vm393_vm1, %v390_v62, %v3705_v3  ;;  %v496_v8 = vsel %vm363_vm0, %v489_v58, %v3705_v3  ;;  %v2217_v9 = vunpack.c.h.bf16 %v3207_v48  ;;  %v604_v12 = vsel %vm363_vm0, %v597_v59, %v3705_v3  ;;  %v3912_v48 = vld [vmem:[%s4602_s0 + $0xb8] sm:$0xff] }
  0x21   : > { %v500_v10 = vsel %vm393_vm1, %v496_v8, %v3705_v3  ;;  %v712_v13 = vsel %vm363_vm0, %v705_v63, %v3705_v3  ;;  %v3575_v14 = vpack.i.bf16 %v688_v61, %v580_v60  ;;  %v3570_v15 = vpack.i.bf16 %v472_v2, %v368_v1  ;;  %2927 = vmatpush.bf16.msra.mxu2 %v3912_v48  ;;  %v3182_v8 = vld [vmem:[%s3737_s17 + $0x20] sm:$0xff]  }
  0x22   : > { %3546 = vrot.lane.b32.xlu0 %v3545_v46, %s3649_s18  ;;  %v3560_v11 = vpack.i.bf16 %v500_v10, %v394_v5  ;;  %v1008_v16 = vsel %vm363_vm0, %v1001_v54, %v3705_v3  ;;  %v1116_v18 = vsel %vm363_vm0, %v1109_v56, %v3705_v3  ;;  %v2116_v19 = vsel %vm363_vm0, %v2109_v57, %v3705_v3  ;;  %v3940_v56 = vld [vmem:[%s4602_s0 + $0xb0] sm:$0xff] }
  0x23   : > { %3556 = vrot.lane.b32.xlu1 %v3555_v47, %s3650_s19  ;;  %v2224_v21 = vsel %vm363_vm0, %v2217_v9, %v3705_v3  ;;  %v608_v22 = vsel %vm393_vm1, %v604_v12, %v3705_v3  ;;  %v716_v23 = vsel %vm393_vm1, %v712_v13, %v3705_v3  ;;  %v1012_v25 = vsel %vm367_vm2, %v1008_v16, %v3705_v3  ;;  %v3172_v57 = vld [vmem:[%s3900_s22 + $0x10] sm:$0xff]   ;;  %v3969_v13 = vld [vmem:[%s4602_s0 + $0xa8] sm:$0xff] }
  0x24   : > { %3561 = vrot.lane.b32.xlu2 %v3560_v11, %s3649_s18  ;;  %v1029_v26 = vunpack.c.l.bf16 %v3177_v17  ;;  %v1137_v27 = vunpack.c.h.bf16 %v3177_v17  ;;  %v1120_v28 = vsel %vm367_vm2, %v1116_v18, %v3705_v3  ;;  %v2120_v29 = vsel %vm393_vm1, %v2116_v19, %v3705_v3  ;;  %3506 = vmatpush.bf16.msra.mxu3 %v3440_v7 }
  0x25   : > { %v1245_v30 = vunpack.c.l.bf16 %v3183_v20  ;;  %v1353_v31 = vunpack.c.h.bf16 %v3183_v20  ;;  %v2228_v32 = vsel %vm393_vm1, %v2224_v21, %v3705_v3  ;;  %v3565_v33 = vpack.i.bf16 %v716_v23, %v608_v22  ;;  %2928 = vmatpush.bf16.msra.mxu2 %v3940_v56  ;;  %2647 = vmatpush.bf16.msra.mxu0 %v3440_v7 }
  0x26   : > { %v1677_v34 = vunpack.c.l.bf16 %v3195_v24  ;;  %v1785_v35 = vunpack.c.h.bf16 %v3195_v24  ;;  %v1036_v37 = vsel %vm363_vm0, %v1029_v26, %v3705_v3  ;;  %v1144_v38 = vsel %vm363_vm0, %v1137_v27, %v3705_v3  ;;  %v3212_v26 = vld [vmem:[%s3737_s17 + $0x48] sm:$0xff]  }
  0x27   : > { %v3590_v39 = vpack.i.bf16 %v1120_v28, %v1012_v25  ;;  %v3585_v40 = vpack.i.bf16 %v2228_v32, %v2120_v29  ;;  %v1252_v41 = vsel %vm363_vm0, %v1245_v30, %v3705_v3  ;;  %v1360_v42 = vsel %vm363_vm0, %v1353_v31, %v3705_v3  ;;  %v3213_v25 = vld [vmem:[%s3731_s14 + $0x48] sm:$0xff]  }
  0x28   : > { %v1684_v44 = vsel %vm363_vm0, %v1677_v34, %v3705_v3  ;;  %v1792_v45 = vsel %vm363_vm0, %v1785_v35, %v3705_v3  ;;  %v2081_v46 = vunpack.c.l.bf16 %v3206_v36  ;;  %v2189_v47 = vunpack.c.h.bf16 %v3206_v36 }
  0x29   : > { %v1040_v49 = vsel %vm393_vm1, %v1036_v37, %v3705_v3  ;;  %v1148_v50 = vsel %vm393_vm1, %v1144_v38, %v3705_v3  ;;  %v1256_v53 = vsel %vm393_vm1, %v1252_v41, %v3705_v3  ;;  %v1649_v54 = vunpack.c.l.bf16 %v3194_v43  ;;  %2929 = vmatpush.bf16.msra.mxu2 %v3969_v13  ;;  %v3188_v41 = vld [vmem:[%s3737_s17 + $0x28] sm:$0xff]  }
  0x2a   : > { %3571 = vrot.lane.b32.xlu0 %v3570_v15, %s3650_s19  ;;  %v1364_v58 = vsel %vm393_vm1, %v1360_v42, %v3705_v3  ;;  %v1688_v59 = vsel %vm393_vm1, %v1684_v44, %v3705_v3  ;;  %v1796_v60 = vsel %vm393_vm1, %v1792_v45, %v3705_v3  ;;  %v1757_v61 = vunpack.c.h.bf16 %v3194_v43 }
  0x2b   : > { %3576 = vrot.lane.b32.xlu1 %v3575_v14, %s3650_s19  ;;  %v3580_v62 = vpack.i.bf16 %v1148_v50, %v1040_v49  ;;  %v2088_v63 = vsel %vm363_vm0, %v2081_v46, %v3705_v3  ;;  %v2196_v1 = vsel %vm363_vm0, %v2189_v47, %v3705_v3  ;;  %v1461_v2 = vunpack.c.l.bf16 %v3189_v55 }
  0x2c   : > { %3566 = vrot.lane.b32.xlu2 %v3565_v33, %s3649_s18  ;;  %v1569_v5 = vunpack.c.h.bf16 %v3189_v55  ;;  %v838_v9 = vunpack.c.l.bf16 %v3172_v57  ;;  %v3600_v10 = vpack.i.bf16 %v1364_v58, %v1256_v53  ;;  %v3605_v11 = vpack.i.bf16 %v1796_v60, %v1688_v59 }
  0x2d   : > { %v1656_v12 = vsel %vm363_vm0, %v1649_v54, %v3705_v3  ;;  %v1764_v14 = vsel %vm363_vm0, %v1757_v61, %v3705_v3  ;;  %v2092_v15 = vsel %vm367_vm2, %v2088_v63, %v3705_v3  ;;  %v2200_v16 = vsel %vm367_vm2, %v2196_v1, %v3705_v3 }
  0x2e   : > { %v3983_v17 = vsel %vm412_vm4, %v838_v9, %v3705_v3  ;;  %v1217_v18 = vunpack.c.l.bf16 %v3182_v8  ;;  %v1325_v19 = vunpack.c.h.bf16 %v3182_v8  ;;  %v946_v21 = vunpack.c.h.bf16 %v3172_v57  ;;  %v3439_v8 = vld [vmem:[%s4602_s0 + $0x68] sm:$0xff]  ;;  %v4099_v9 = vld [vmem:[%s4602_s0 + $0x98] sm:$0xff] }
  0x2f   : > { %v856_v20 = vsel %vm3928_vm3, %v3983_v17, %v3707_v4  ;;  %v1468_v22 = vsel %vm363_vm0, %v1461_v2, %v3705_v3  ;;  %v1576_v23 = vsel %vm363_vm0, %v1569_v5, %v3705_v3  ;;  %v1660_v24 = vsel %vm367_vm2, %v1656_v12, %v3705_v3  ;;  %v4084_v2 = vld [vmem:[%s4602_s0 + $0xa0] sm:$0xff]  ;;  %v4090_v5 = vld [vmem:[%s4602_s0 + $0x38] sm:$0xff]  ;;  %3507 = vmatpush.bf16.msra.mxu3 %v3439_v8 }
  0x30   : > { %v4005_v27 = vsel %vm412_vm4, %v946_v21, %v3705_v3  ;;  %v1768_v28 = vsel %vm367_vm2, %v1764_v14, %v3705_v3  ;;  %v3595_v29 = vpack.i.bf16 %v2200_v16, %v2092_v15  ;;  %v1472_v31 = vsel %vm393_vm1, %v1468_v22, %v3705_v3  ;;  %2930 = vmatpush.bf16.msra.mxu2 %v4084_v2  ;;  %v4106_v14 = vld [vmem:[%s4602_s0 + $0x30] sm:$0xff] }
  0x31   : > { %v964_v30 = vsel %vm3928_vm3, %v4005_v27, %v3707_v4  ;;  %v1580_v32 = vsel %vm393_vm1, %v1576_v23, %v3705_v3  ;;  %v1224_v33 = vsel %vm363_vm0, %v1217_v18, %v3705_v3  ;;  %v1332_v34 = vsel %vm363_vm0, %v1325_v19, %v3705_v3  ;;  %2749 = vmatpush.bf16.msra.mxu1 %v4090_v5  ;;  %v3438_v18 = vld [vmem:[%s4602_s0 + $0x60] sm:$0xff]  ;;  %v4121_v19 = vld [vmem:[%s4602_s0 + $0x90] sm:$0xff]  ;;  %v3202_v23 = vld [vmem:[%s3900_s22 + $0x38] sm:$0xff]  }
  0x32   : > { %3586 = vrot.lane.b32.xlu0 %v3585_v40, %s3649_s18  ;;  %v2325_v35 = vunpack.c.l.bf16 %v3213_v25  ;;  %v2433_v36 = vunpack.c.h.bf16 %v3213_v25  ;;  %v2297_v37 = vunpack.c.l.bf16 %v3212_v26  ;;  %v2405_v38 = vunpack.c.h.bf16 %v3212_v26  ;;  %2648 = vmatpush.bf16.msra.mxu0 %v3439_v8  ;;  %v4134_v26 = vld [vmem:[%s4602_s0 + $0x28] sm:$0xff]  ;;  %v3208_v8 = vld [vmem:[%s3900_s22 + $0x40] sm:$0xff]  }
  0x33   : > { %3591 = vrot.lane.b32.xlu1 %v3590_v39, %s3650_s19  ;;  %v3615_v39 = vpack.i.bf16 %v1768_v28, %v1660_v24  ;;  %v3620_v40 = vpack.i.bf16 %v1580_v32, %v1472_v31  ;;  %v1228_v42 = vsel %vm367_vm2, %v1224_v33, %v3705_v3  ;;  %v1336_v43 = vsel %vm367_vm2, %v1332_v34, %v3705_v3  ;;  %v3437_v31 = vld [vmem:[%s4602_s0 + $0x58] sm:$0xff]  ;;  %v4153_v32 = vld [vmem:[%s4602_s0 + $0x88] sm:$0xff] }
  0x34   : > { %3581 = vrot.lane.b32.xlu2 %v3580_v62, %s3649_s18  ;;  %v2332_v44 = vsel %vm363_vm0, %v2325_v35, %v3705_v3  ;;  %v2440_v45 = vsel %vm363_vm0, %v2433_v36, %v3705_v3  ;;  %v2304_v46 = vsel %vm363_vm0, %v2297_v37, %v3705_v3  ;;  %v2412_v47 = vsel %vm363_vm0, %v2405_v38, %v3705_v3  ;;  %v3166_v35 = vld [vmem:[%s3900_s22 + $0x8] sm:$0xff]   ;;  %v4168_v38 = vld [vmem:[%s4602_s0 + $0x20] sm:$0xff] }
  0x35   : > { %v1433_v49 = vunpack.c.l.bf16 %v3188_v41  ;;  %v1541_v50 = vunpack.c.h.bf16 %v3188_v41  ;;  %v3610_v51 = vpack.i.bf16 %v1336_v43, %v1228_v42  ;;  %v2336_v53 = vsel %vm393_vm1, %v2332_v44, %v3705_v3  ;;  %2931 = vmatpush.bf16.msra.mxu2 %v4099_v9  ;;  %2750 = vmatpush.bf16.msra.mxu1 %v4106_v14  ;;  %v3436_v43 = vld [vmem:[%s4602_s0 + $0x50] sm:$0xff]  ;;  %v4189_v44 = vld [vmem:[%s4602_s0 + $0x80] sm:$0xff] }
  0x36   : > { %v2444_v54 = vsel %vm393_vm1, %v2440_v45, %v3705_v3  ;;  %v2308_v55 = vsel %vm367_vm2, %v2304_v46, %v3705_v3  ;;  %v2416_v57 = vsel %vm367_vm2, %v2412_v47, %v3705_v3  ;;  %v1918_v24 = vunpack.c.l.bf16 %v3202_v23  ;;  %3508 = vmatpush.bf16.msra.mxu3 %v3438_v18  ;;  %2649 = vmatpush.bf16.msra.mxu0 %v3438_v18  ;;  %v4195_v45 = vld [vmem:[%s4602_s0 + $0x18] sm:$0xff]  ;;  %v3435_v47 = vld [vmem:[%s4602_s0 + $0x48] sm:$0xff] }
  0x37   : > { %v1440_v58 = vsel %vm363_vm0, %v1433_v49, %v3705_v3  ;;  %v1548_v59 = vsel %vm363_vm0, %v1541_v50, %v3705_v3  ;;  %v3630_v60 = vpack.i.bf16 %v2444_v54, %v2336_v53  ;;  %v3635_v61 = vpack.i.bf16 %v2416_v57, %v2308_v55  ;;  %v4205_v55 = vld [vmem:[%s4602_s0 + $0x10] sm:$0xff] }
  0x38   : > { %v1444_v62 = vsel %vm367_vm2, %v1440_v58, %v3705_v3  ;;  %v1552_v63 = vsel %vm367_vm2, %v1548_v59, %v3705_v3  ;;  %v2026_v25 = vunpack.c.h.bf16 %v3202_v23  ;;  %v4139_v28 = vsel %vm412_vm4, %v1918_v24, %v3705_v3  ;;  %v4268_v24 = vld [vmem:[%s4602_s0] sm:$0xff] }
  0x39   : > { %v3625_v1 = vpack.i.bf16 %v1552_v63, %v1444_v62  ;;  %2932 = vmatpush.bf16.msra.mxu2 %v4121_v19  ;;  %2751 = vmatpush.bf16.msra.mxu1 %v4134_v26  ;;  %v1936_v33 = vsel %vm3928_vm3, %v4139_v28, %v3707_v4  ;;  %v622_v36 = vunpack.c.l.bf16 %v3166_v35  ;;  %v730_v37 = vunpack.c.h.bf16 %v3166_v35  ;;  %v3434_v63 = vld [vmem:[%s4602_s0 + $0x40] sm:$0xff] }
  0x3a   : > { %3601 = vrot.lane.b32.xlu0 %v3600_v10, %s3649_s18  ;;  %v406_v10 = vld [vmem:[%s3900_s22] sm:$0xff]   ;;  %3509 = vmatpush.bf16.msra.mxu3 %v3437_v31 }
  0x3b   : > { %3606 = vrot.lane.b32.xlu1 %v3605_v11, %s3649_s18  ;;  %v407_v11 = vunpack.c.l.bf16 %v406_v10  ;;  %v514_v12 = vunpack.c.h.bf16 %v406_v10  ;;  %2650 = vmatpush.bf16.msra.mxu0 %v3437_v31  ;;  %v2134_v10 = vunpack.c.l.bf16 %v3208_v8 }
  0x3c   : > { %3596 = vrot.lane.b32.xlu2 %v3595_v29, %s3650_s19  ;;  %v4144_v29 = vsel %vm412_vm4, %v2026_v25, %v3705_v3 }
  0x3d   : > { %v413_v15 = vsel %vm412_vm4, %v407_v11, %v3705_v3  ;;  %v520_v16 = vsel %vm412_vm4, %v514_v12, %v3705_v3  ;;  %v2044_v34 = vsel %vm3928_vm3, %v4144_v29, %v3707_v4  ;;  %2933 = vmatpush.bf16.msra.mxu2 %v4153_v32  ;;  %2752 = vmatpush.bf16.msra.mxu1 %v4168_v38  ;;  %v2242_v11 = vunpack.c.h.bf16 %v3208_v8  ;;  %v4243_v12 = vld [vmem:[%s4602_s0 + $0x8] sm:$0xff] }
  0x3e   : > { %v425_v21 = vsel %vm3928_vm3, %v413_v15, %v3707_v4  ;;  %v532_v22 = vsel %vm3928_vm3, %v520_v16, %v3707_v4  ;;  %3510 = vmatpush.bf16.msra.mxu3 %v3436_v43  ;;  %v4249_v16 = vsel %vm412_vm4, %v2134_v10, %v3705_v3 }
  0x3f   : > { %2651 = vmatpush.bf16.msra.mxu0 %v3436_v43  ;;  %v4254_v18 = vsel %vm412_vm4, %v2242_v11, %v3705_v3 }
  0x40   : > { %v2260_v23 = vsel %vm3928_vm3, %v4254_v18, %v3707_v4 }
  0x41   : > { %2934 = vmatpush.bf16.msra.mxu2 %v4189_v44  ;;  %2753 = vmatpush.bf16.msra.mxu1 %v4195_v45 }
  0x42   : > { %3616 = vrot.lane.b32.xlu0 %v3615_v39, %s3650_s19  ;;  %v628_v39 = vsel %vm412_vm4, %v622_v36, %v3705_v3  ;;  %3511 = vmatpush.bf16.msra.mxu3 %v3435_v47 }
  0x43   : > { %3621 = vrot.lane.b32.xlu1 %v3620_v40, %s3649_s18  ;;  %v736_v40 = vsel %vm412_vm4, %v730_v37, %v3705_v3  ;;  %v640_v41 = vsel %vm3928_vm3, %v628_v39, %v3707_v4  ;;  %2652 = vmatpush.bf16.msra.mxu0 %v3435_v47 }
  0x44   : > { %3611 = vrot.lane.b32.xlu2 %v3610_v51, %s3650_s19  ;;  %v748_v42 = vsel %vm3928_vm3, %v736_v40, %v3707_v4  ;;  %v3178_v51 = vld [vmem:[%s3900_s22 + $0x18] sm:$0xff]  }
  0x45   : > { %v1054_v53 = vunpack.c.l.bf16 %v3178_v51  ;;  %v1162_v54 = vunpack.c.h.bf16 %v3178_v51  ;;  %2754 = vmatpush.bf16.msra.mxu1 %v4205_v55  ;;  %v3184_v51 = vld [vmem:[%s3900_s22 + $0x20] sm:$0xff]  }
  0x46   : > { %3512 = vmatpush.bf16.msra.mxu3 %v3434_v63 }
  0x47   : > { %v4225_v62 = vsel %vm412_vm4, %v1162_v54, %v3705_v3  ;;  %2653 = vmatpush.bf16.msra.mxu0 %v3434_v63 }
  0x48   : > { %v1180_v7 = vsel %vm3928_vm3, %v4225_v62, %v3707_v4 }
  0x49   : > { %2755 = vmatpush.bf16.msra.mxu1 %v4243_v12 }
  0x4a   : > { %3631 = vrot.lane.b32.xlu0 %v3630_v60, %s3649_s18  ;;  %3513 = vmatpush.bf16.msrb.mxu3 %v4090_v5  ;;  %v2152_v5 = vsel %vm3928_vm3, %v4249_v16, %v3707_v4 }
  0x4b   : > { %3636 = vrot.lane.b32.xlu1 %v3635_v61, %s3650_s19  ;;  %v4220_v61 = vsel %vm412_vm4, %v1054_v53, %v3705_v3  ;;  %v1378_v53 = vunpack.c.h.bf16 %v3184_v51 }
  0x4c   : > { %3626 = vrot.lane.b32.xlu2 %v3625_v1, %s3650_s19  ;;  %v1072_v1 = vsel %vm3928_vm3, %v4220_v61, %v3707_v4 }
  0x4d   : > { %2756 = vmatpush.bf16.msra.mxu1 %v4268_v24 }
  0x4e   : > { %3514 = vmatpush.bf16.msrb.mxu3 %v4106_v14 }
  0x52   : > { %3515 = vmatpush.bf16.msrb.mxu3 %v4134_v26 }
  0x56   : > { %3516 = vmatpush.bf16.msrb.mxu3 %v4168_v38  ;;  %v3196_v38 = vld [vmem:[%s3900_s22 + $0x30] sm:$0xff]  }
  0x5a   : > { %3517 = vmatpush.bf16.msrb.mxu3 %v4195_v45 }
  0x5e   : > { %3518 = vmatpush.bf16.msrb.mxu3 %v4205_v55 }
  0x62   : > { %3519 = vmatpush.bf16.msrb.mxu3 %v4243_v12 }
  0x66   : > { %3520 = vmatpush.bf16.msrb.mxu3 %v4268_v24 }
  0x7e   : > { %v3562_v46 = vpop.permute.xlu2 %3561 }
  0x7f   : > { %v3564_v49 = vunpack.i.h.bf16 %v3562_v46  ;;  %v3563_v50 = vunpack.i.l.bf16 %v3562_v46 }
  0x81   : > { %v536_v57 = vsel %vm3928_vm3, %v3564_v49, %v3707_v4  ;;  %v429_v58 = vsel %vm3928_vm3, %v3563_v50, %v3707_v4 }
  0x82   : > { %v4213_v59 = vmax.f32 %v532_v22, %v536_v57  ;;  %v4215_v60 = vmax.f32 %v425_v21, %v429_v58 }
  0x86   : > { %v3567_v15 = vpop.permute.xlu2 %3566 }
  0x87   : > { %v3569_v21 = vunpack.i.h.bf16 %v3567_v15  ;;  %v3568_v22 = vunpack.i.l.bf16 %v3567_v15 }
  0x89   : > { %v752_v35 = vsel %vm3928_vm3, %v3569_v21, %v3707_v4  ;;  %v644_v36 = vsel %vm3928_vm3, %v3568_v22, %v3707_v4 }
  0x8a   : > { %v4278_v46 = vmax.f32 %v748_v42, %v752_v35  ;;  %v4280_v47 = vmax.f32 %v640_v41, %v644_v36  ;;  %v1270_v42 = vunpack.c.l.bf16 %v3184_v51 }
  0x8c   : > { %v3542_v25 = vpop.permute.xlu0 %3541  ;;  %v4309_v17 = vsel %vm412_vm4, %v1270_v42, %v3705_v3 }
  0x8d   : > { %v3552_v31 = vpop.permute.xlu1 %3551  ;;  %v3544_v37 = vunpack.i.h.bf16 %v3542_v25  ;;  %v3543_v39 = vunpack.i.l.bf16 %v3542_v25 }
  0x8e   : > { %v3554_v40 = vunpack.i.h.bf16 %v3552_v31  ;;  %v3553_v43 = vunpack.i.l.bf16 %v3552_v31  ;;  %v3582_v27 = vpop.permute.xlu2 %3581 }
  0x8f   : > { %v968_v49 = vsel %vm3928_vm3, %v3544_v37, %v3707_v4  ;;  %v860_v50 = vsel %vm3928_vm3, %v3543_v39, %v3707_v4  ;;  %v3584_v61 = vunpack.i.h.bf16 %v3582_v27  ;;  %v3583_v62 = vunpack.i.l.bf16 %v3582_v27 }
  0x90   : > { %v972_v14 = vmax.f32 %v964_v30, %v968_v49  ;;  %v864_v41 = vmax.f32 %v856_v20, %v860_v50  ;;  %v976_v54 = vsel %vm3928_vm3, %v3554_v40, %v3707_v4  ;;  %v868_v57 = vsel %vm3928_vm3, %v3553_v43, %v3707_v4 }
  0x91   : > { %v4314_v20 = vsel %vm412_vm4, %v1378_v53, %v3705_v3  ;;  %v1184_v11 = vsel %vm3928_vm3, %v3584_v61, %v3707_v4  ;;  %v1076_v15 = vsel %vm3928_vm3, %v3583_v62, %v3707_v4  ;;  %v1288_v37 = vsel %vm3928_vm3, %v4309_v17, %v3707_v4 }
  0x92   : > { %v980_v30 = vmax.f32 %v972_v14, %v976_v54  ;;  %v872_v58 = vmax.f32 %v864_v41, %v868_v57  ;;  %v4323_v35 = vmax.f32 %v1180_v7, %v1184_v11  ;;  %v4325_v36 = vmax.f32 %v1072_v1, %v1076_v15 }
  0x93   : > { %v1396_v39 = vsel %vm3928_vm3, %v4314_v20, %v3707_v4  ;;  %v1702_v49 = vunpack.c.l.bf16 %v3196_v38  ;;  %v1810_v50 = vunpack.c.h.bf16 %v3196_v38 }
  0x94   : > { %v983_v26 = vpack.c.bf16 0.0, %v980_v30  ;;  %v875_v63 = vpack.c.bf16 0.0, %v872_v58  ;;  %v3547_v8 = vpop.permute.xlu0 %3546 }
  0x95   : > { %v3557_v10 = vpop.permute.xlu1 %3556  ;;  %v3549_v21 = vunpack.i.h.bf16 %v3547_v8  ;;  %v3548_v22 = vunpack.i.l.bf16 %v3547_v8  ;;  %v4362_v41 = vsel %vm412_vm4, %v1702_v49, %v3705_v3  ;;  %v4367_v28 = vsel %vm412_vm4, %v1810_v50, %v3705_v3 }
  0x96   : > { %v3559_v25 = vunpack.i.h.bf16 %v3557_v10  ;;  %v3558_v31 = vunpack.i.l.bf16 %v3557_v10  ;;  %986 = vst [vmem:[#allocation17 + $0x14] sm:$0xf] %v983_v26  ;;  %v3597_v61 = vpop.permute.xlu2 %3596  ;;  %v1720_v62 = vsel %vm3928_vm3, %v4362_v41, %v3707_v4  ;;  %v1828_v26 = vsel %vm3928_vm3, %v4367_v28, %v3707_v4 }
  0x97   : > { %878 = vst [vmem:[#allocation17 + $0x10] sm:$0xf] %v875_v63  ;;  %v2048_v40 = vsel %vm3928_vm3, %v3549_v21, %v3707_v4  ;;  %v1940_v1 = vsel %vm3928_vm3, %v3548_v22, %v3707_v4  ;;  %v3598_v49 = vunpack.i.l.bf16 %v3597_v61 }
  0x98   : > { %v2052_v7 = vmax.f32 %v2044_v34, %v2048_v40  ;;  %v1944_v43 = vmax.f32 %v1936_v33, %v1940_v1  ;;  %v2056_v51 = vsel %vm3928_vm3, %v3559_v25, %v3707_v4  ;;  %v1948_v14 = vsel %vm3928_vm3, %v3558_v31, %v3707_v4  ;;  %v3190_v25 = vld [vmem:[%s3900_s22 + $0x28] sm:$0xff]  }
  0x99   : > { %v3599_v31 = vunpack.i.h.bf16 %v3597_v61  ;;  %v1486_v38 = vunpack.c.l.bf16 %v3190_v25  ;;  %v1594_v40 = vunpack.c.h.bf16 %v3190_v25 }
  0x9a   : > { %v2060_v29 = vmax.f32 %v2052_v7, %v2056_v51  ;;  %v1952_v34 = vmax.f32 %v1944_v43, %v1948_v14 }
  0x9c   : > { %v2063_v33 = vpack.c.bf16 0.0, %v2060_v29  ;;  %v1955_v45 = vpack.c.bf16 0.0, %v1952_v34  ;;  %v3572_v53 = vpop.permute.xlu0 %3571 }
  0x9d   : > { %v3577_v42 = vpop.permute.xlu1 %3576  ;;  %v3574_v27 = vunpack.i.h.bf16 %v3572_v53  ;;  %v3573_v30 = vunpack.i.l.bf16 %v3572_v53 }
  0x9e   : > { %v3579_v54 = vunpack.i.h.bf16 %v3577_v42  ;;  %v3578_v57 = vunpack.i.l.bf16 %v3577_v42  ;;  %2066 = vst [vmem:[#allocation17 + $0x3c] sm:$0xf] %v2063_v33  ;;  %v3442_v58 = vld [vmem:[#allocation17 + $0x10] sm:$0xff]  ;;  %v2164_v42 = vsel %vm3928_vm3, %v3598_v49, %v3707_v4 }
  0x9f   : > { %1958 = vst [vmem:[#allocation17 + $0x38] sm:$0xf] %v1955_v45  ;;  %v544_v8 = vsel %vm3928_vm3, %v3574_v27, %v3707_v4  ;;  %v437_v10 = vsel %vm3928_vm3, %v3573_v30, %v3707_v4  ;;  %2935 = vmatmul.bf16.vlgmr.msra.gmra.mxu2 %v3442_v58  ;;  %v2272_v45 = vsel %vm3928_vm3, %v3599_v31, %v3707_v4 }
  0xa0   : > { %v760_v55 = vsel %vm3928_vm3, %v3579_v54, %v3707_v4  ;;  %v652_v63 = vsel %vm3928_vm3, %v3578_v57, %v3707_v4  ;;  %v548_v21 = vmax.f32 %v4213_v59, %v544_v8  ;;  %v441_v22 = vmax.f32 %v4215_v60, %v437_v10  ;;  %v3612_v54 = vpop.permute.xlu2 %3611 }
  0xa1   : > { %v764_v11 = vmax.f32 %v4278_v46, %v760_v55  ;;  %v656_v15 = vmax.f32 %v4280_v47, %v652_v63  ;;  %v4399_v46 = vsel %vm412_vm4, %v1486_v38, %v3705_v3  ;;  %v4404_v59 = vsel %vm412_vm4, %v1594_v40, %v3705_v3 }
  0xa2   : > { %v551_v43 = vpack.c.bf16 0.0, %v548_v21  ;;  %v443_v50 = vpack.c.bf16 0.0, %v441_v22  ;;  %v1504_v47 = vsel %vm3928_vm3, %v4399_v46, %v3707_v4  ;;  %v1612_v51 = vsel %vm3928_vm3, %v4404_v59, %v3707_v4  ;;  %v3214_v46 = vld [vmem:[%s3900_s22 + $0x48] sm:$0xff]  }
  0xa3   : > { %v767_v1 = vpack.c.bf16 0.0, %v764_v11  ;;  %v659_v7 = vpack.c.bf16 0.0, %v656_v15  ;;  %v3614_v8 = vunpack.i.h.bf16 %v3612_v54  ;;  %v3613_v10 = vunpack.i.l.bf16 %v3612_v54 }
  0xa4   : > { %v3587_v12 = vpop.permute.xlu0 %3586  ;;  %554 = vst [vmem:[#allocation17 + $0x4] sm:$0xf] %v551_v43 }
  0xa5   : > { %770 = vst [vmem:[#allocation17 + $0xc] sm:$0xf] %v767_v1  ;;  %v3592_v60 = vpop.permute.xlu1 %3591  ;;  %v3589_v34 = vunpack.i.h.bf16 %v3587_v12  ;;  %v3588_v33 = vunpack.i.l.bf16 %v3587_v12  ;;  %v1408_v40 = vsel %vm3928_vm3, %v3614_v8, %v3707_v4  ;;  %v1300_v1 = vsel %vm3928_vm3, %v3613_v10, %v3707_v4 }
  0xa6   : > { %662 = vst [vmem:[#allocation17 + $0x8] sm:$0xf] %v659_v7  ;;  %v3594_v14 = vunpack.i.h.bf16 %v3592_v60  ;;  %v3593_v29 = vunpack.i.l.bf16 %v3592_v60  ;;  %v4421_v53 = vld [vmem:[#allocation17 + $0x38] sm:$0xff] }
  0xa7   : > { %446 = vst [vmem:[#allocation17] sm:$0xf] %v443_v50  ;;  %v2264_v27 = vsel %vm3928_vm3, %v3589_v34, %v3707_v4  ;;  %v2156_v30 = vsel %vm3928_vm3, %v3588_v33, %v3707_v4  ;;  %2684 = vmatmul.bf16.vlgmr.msra.gmra.mxu3 %v4421_v53 }
  0xa8   : > { %v1192_v57 = vsel %vm3928_vm3, %v3594_v14, %v3707_v4  ;;  %v1084_v24 = vsel %vm3928_vm3, %v3593_v29, %v3707_v4  ;;  %v2268_v55 = vmax.f32 %v2260_v23, %v2264_v27  ;;  %v2160_v63 = vmax.f32 %v2152_v5, %v2156_v30  ;;  %3521 = vmatpush.bf16.msra.mxu3 %v3912_v48  ;;  %v3627_v50 = vpop.permute.xlu2 %3626 }
  0xa9   : > { %v1196_v58 = vmax.f32 %v4323_v35, %v1192_v57  ;;  %v1088_v61 = vmax.f32 %v4325_v36, %v1084_v24  ;;  %v3629_v34 = vunpack.i.h.bf16 %v3627_v50  ;;  %v3628_v17 = vunpack.i.l.bf16 %v3627_v50 }
  0xaa   : > { %v2168_v11 = vmax.f32 %v2160_v63, %v2164_v42  ;;  %v2276_v15 = vmax.f32 %v2268_v55, %v2272_v45 }
  0xab   : > { %v1199_v35 = vpack.c.bf16 0.0, %v1196_v58  ;;  %v1091_v36 = vpack.c.bf16 0.0, %v1088_v61 }
  0xac   : > { %v2171_v21 = vpack.c.bf16 0.0, %v2168_v11  ;;  %v2279_v18 = vpack.c.bf16 0.0, %v2276_v15  ;;  %v3602_v22 = vpop.permute.xlu0 %3601  ;;  %3522 = vmatpush.bf16.msra.mxu3 %v3940_v56  ;;  %v3419_v15 = vld [vmem:[#allocation17 + $0x10] sm:$0xff] }
  0xad   : > { %1202 = vst [vmem:[#allocation17 + $0x1c] sm:$0xf] %v1199_v35  ;;  %v4449_v23 = vld [vmem:[#allocation17 + $0x8] sm:$0xff]  ;;  %v3607_v25 = vpop.permute.xlu1 %3606  ;;  %v3604_v16 = vunpack.i.h.bf16 %v3602_v22  ;;  %v3603_v5 = vunpack.i.l.bf16 %v3602_v22 }
  0xae   : > { %1094 = vst [vmem:[#allocation17 + $0x18] sm:$0xf] %v1091_v36  ;;  %v3609_v31 = vunpack.i.h.bf16 %v3607_v25  ;;  %v3608_v38 = vunpack.i.l.bf16 %v3607_v25  ;;  %2654 = vmatmul.bf16.vlgmr.msra.gmra.mxu0 %v4449_v23  ;;  %v3417_v48 = vld [vmem:[#allocation17] sm:$0xff] }
  0xaf   : > { %2174 = vst [vmem:[#allocation17 + $0x40] sm:$0xf] %v2171_v21  ;;  %v1400_v7 = vsel %vm3928_vm3, %v3604_v16, %v3707_v4  ;;  %v1292_v56 = vsel %vm3928_vm3, %v3603_v5, %v3707_v4  ;;  %2757 = vmatmul.bf16.vlgmr.msra.gmra.mxu1 %v3417_v48 }
  0xb0   : > { %2282 = vst [vmem:[#allocation17 + $0x44] sm:$0xf] %v2279_v18  ;;  %v1832_v43 = vsel %vm3928_vm3, %v3609_v31, %v3707_v4  ;;  %v1724_v49 = vsel %vm3928_vm3, %v3608_v38, %v3707_v4  ;;  %v1404_v60 = vmax.f32 %v1396_v39, %v1400_v7  ;;  %v1296_v12 = vmax.f32 %v1288_v37, %v1292_v56 }
  0xb1   : > { %v1836_v14 = vmax.f32 %v1828_v26, %v1832_v43  ;;  %v1728_v20 = vmax.f32 %v1720_v62, %v1724_v49  ;;  %3523 = vmatpush.bf16.msra.mxu3 %v3969_v13  ;;  %v1624_v13 = vsel %vm3928_vm3, %v3629_v34, %v3707_v4  ;;  %v1516_v62 = vsel %vm3928_vm3, %v3628_v17, %v3707_v4  ;;  %v3447_v34 = vld [vmem:[#allocation17 + $0x38] sm:$0xff] }
  0xb2   : > { %v1304_v39 = vmax.f32 %v1296_v12, %v1300_v1  ;;  %v1412_v29 = vmax.f32 %v1404_v60, %v1408_v40 }
  0xb4   : > { %v1307_v37 = vpack.c.bf16 0.0, %v1304_v39  ;;  %v1415_v33 = vpack.c.bf16 0.0, %v1412_v29  ;;  %v3617_v42 = vpop.permute.xlu0 %3616 }
  0xb5   : > { %v3443_v45 = vld [vmem:[#allocation17 + $0x18] sm:$0xff]  ;;  %v3622_v54 = vpop.permute.xlu1 %3621  ;;  %v3619_v57 = vunpack.i.h.bf16 %v3617_v42  ;;  %v3618_v28 = vunpack.i.l.bf16 %v3617_v42  ;;  %3524 = vmatpush.bf16.msra.mxu3 %v4084_v2 }
  0xb6   : > { %v3624_v26 = vunpack.i.h.bf16 %v3622_v54  ;;  %v3623_v24 = vunpack.i.l.bf16 %v3622_v54  ;;  %1310 = vst [vmem:[#allocation17 + $0x20] sm:$0xf] %v1307_v37  ;;  %2940 = vmatmul.bf16.gmra.mxu2 %v3443_v45 }
  0xb7   : > { %v3433_v41 = vld [vmem:[#allocation17 + $0x40] sm:$0xff]  ;;  %1418 = vst [vmem:[#allocation17 + $0x24] sm:$0xf] %v1415_v33  ;;  %v1840_v27 = vsel %vm3928_vm3, %v3619_v57, %v3707_v4  ;;  %v1732_v2 = vsel %vm3928_vm3, %v3618_v28, %v3707_v4 }
  0xb8   : > { %v1616_v30 = vsel %vm3928_vm3, %v3624_v26, %v3707_v4  ;;  %v1508_v58 = vsel %vm3928_vm3, %v3623_v24, %v3707_v4  ;;  %v1844_v61 = vmax.f32 %v1836_v14, %v1840_v27  ;;  %v1736_v55 = vmax.f32 %v1728_v20, %v1732_v2  ;;  %2689 = vmatmul.bf16.gmra.mxu3 %v3433_v41  ;;  %v3420_v14 = vld [vmem:[#allocation17 + $0x18] sm:$0xff]  ;;  %v4559_v24 = vld [vmem:[%s4603_s1] ss:$0 sm:$0xff] }
  0xb9   : > { %v1620_v63 = vmax.f32 %v1612_v51, %v1616_v30  ;;  %v1512_v8 = vmax.f32 %v1504_v47, %v1508_v58  ;;  %3525 = vmatpush.bf16.msra.mxu3 %v4099_v9  ;;  %v2350_v9 = vunpack.c.l.bf16 %v3214_v46  ;;  %v2458_v51 = vunpack.c.h.bf16 %v3214_v46 }
  0xba   : > { %v1847_v10 = vpack.c.bf16 0.0, %v1844_v61  ;;  %v1739_v35 = vpack.c.bf16 0.0, %v1736_v55 }
  0xbb   : > { %v1520_v36 = vmax.f32 %v1512_v8, %v1516_v62  ;;  %v1628_v11 = vmax.f32 %v1620_v63, %v1624_v13  ;;  %v2464_v31 = vsel %vm412_vm4, %v2458_v51, %v3705_v3 }
  0xbc   : > { %1850 = vst [vmem:[#allocation17 + $0x34] sm:$0xf] %v1847_v10  ;;  %v3632_v59 = vpop.permute.xlu0 %3631  ;;  %v2476_v1 = vsel %vm3928_vm3, %v2464_v31, %v3707_v4 }
  0xbd   : > { %v1523_v21 = vpack.c.bf16 0.0, %v1520_v36  ;;  %v1631_v18 = vpack.c.bf16 0.0, %v1628_v11  ;;  %1742 = vst [vmem:[#allocation17 + $0x30] sm:$0xf] %v1739_v35  ;;  %3526 = vmatpush.bf16.msra.mxu3 %v4121_v19  ;;  %v3637_v47 = vpop.permute.xlu1 %3636  ;;  %v3634_v22 = vunpack.i.h.bf16 %v3632_v59  ;;  %v3633_v25 = vunpack.i.l.bf16 %v3632_v59 }
  0xbe   : > { %2659 = vmatmul.bf16.gmra.mxu0 %v3419_v15  ;;  %v3639_v16 = vunpack.i.h.bf16 %v3637_v47  ;;  %v3638_v5 = vunpack.i.l.bf16 %v3637_v47  ;;  %v2356_v19 = vsel %vm412_vm4, %v2350_v9, %v3705_v3  ;;  %v3444_v38 = vld [vmem:[#allocation17 + $0x20] sm:$0xff] }
  0xbf   : > { %1526 = vst [vmem:[#allocation17 + $0x28] sm:$0xf] %v1523_v21  ;;  %2762 = vmatmul.bf16.gmra.mxu1 %v4449_v23  ;;  %v2480_v23 = vsel %vm3928_vm3, %v3634_v22, %v3707_v4  ;;  %v2368_v40 = vsel %vm3928_vm3, %v2356_v19, %v3707_v4  ;;  %v3421_v52 = vld [vmem:[#allocation17 + $0x20] sm:$0xff] }
  0xc0   : > { %1634 = vst [vmem:[#allocation17 + $0x2c] sm:$0xf] %v1631_v18  ;;  %v2488_v6 = vsel %vm3928_vm3, %v3639_v16, %v3707_v4  ;;  %v2380_v7 = vsel %vm3928_vm3, %v3638_v5, %v3707_v4  ;;  %v2484_v56 = vmax.f32 %v2476_v1, %v2480_v23 }
  0xc1   : > { %3527 = vmatpush.bf16.msra.mxu3 %v4153_v32  ;;  %v2372_v32 = vsel %vm3928_vm3, %v3633_v25, %v3707_v4 }
  0xc2   : > { %v2376_v43 = vmax.f32 %v2368_v40, %v2372_v32  ;;  %v2492_v50 = vmax.f32 %v2484_v56, %v2488_v6 }
  0xc4   : > { %v3423_v48 = vld [vmem:[#allocation17 + $0x30] sm:$0xff]  ;;  %v2384_v49 = vmax.f32 %v2376_v43, %v2380_v7  ;;  %v2495_v12 = vpack.c.bf16 0.0, %v2492_v50 }
  0xc5   : > { %3528 = vmatpush.bf16.msra.mxu3 %v4189_v44  ;;  %v3446_v39 = vld [vmem:[#allocation17 + $0x30] sm:$0xff]  ;;  %v3448_v44 = vld [vmem:[#allocation17 + $0x40] sm:$0xff] }
  0xc6   : > { %2945 = vmatmul.bf16.gmra.mxu2 %v3444_v38  ;;  %v2387_v60 = vpack.c.bf16 0.0, %v2384_v49  ;;  %2498 = vst [vmem:[#allocation17 + $0x4c] sm:$0xf] %v2495_v12 }
  0xc7   : > { %v3445_v20 = vld [vmem:[#allocation17 + $0x28] sm:$0xff] }
  0xc8   : > { %2787 = vmatmul.bf16.vlgmr.msrb.gmra.mxu3 %v3423_v48  ;;  %2390 = vst [vmem:[#allocation17 + $0x48] sm:$0xf] %v2387_v60  ;;  %v3422_v29 = vld [vmem:[#allocation17 + $0x28] sm:$0xff] }
  0xce   : > { %2664 = vmatmul.bf16.gmra.mxu0 %v3420_v14 }
  0xcf   : > { %2767 = vmatmul.bf16.gmra.mxu1 %v3419_v15  ;;  %v3449_v17 = vld [vmem:[#allocation17 + $0x48] sm:$0xff] }
  0xd6   : > { %2950 = vmatmul.bf16.gmra.mxu2 %v3445_v20 }
  0xd8   : > { %2792 = vmatmul.bf16.gmra.mxu3 %v4421_v53 }
  0xde   : > { %2669 = vmatmul.bf16.gmra.mxu0 %v3421_v52 }
  0xdf   : > { %2772 = vmatmul.bf16.gmra.mxu1 %v3420_v14 }
  0xe6   : > { %2955 = vmatmul.bf16.gmra.mxu2 %v3446_v39 }
  0xe8   : > { %2965 = vmatmul.bf16.vlgmr.msra.gmra.mxu3 %v3448_v44 }
  0xee   : > { %2674 = vmatmul.bf16.gmra.mxu0 %v3422_v29 }
  0xef   : > { %2777 = vmatmul.bf16.gmra.mxu1 %v3421_v52 }
  0xf6   : > { %2960 = vmatmul.bf16.gmra.mxu2 %v3447_v34 }
  0xf8   : > { %2970 = vmatmul.bf16.gmra.mxu3 %v3449_v17 }
  0xfe   : > { %2679 = vmatmul.bf16.gmra.mxu0 %v3423_v48 }
  0xff   : > { %2782 = vmatmul.bf16.gmra.mxu1 %v3422_v29 }
 0x122   : > { %v2936_v37 = vpop.f32.mrf.mxu2 }
 0x12a   : > { %v4552_v53 = vpop.f32.mrf.mxu3  ;;  %v2938_v54 = vpop.f32.mrf.mxu2 }
 0x12b   : > { %v2655_v33 = vpop.f32.mrf.mxu0 }
 0x12c   : > { %v2758_v45 = vpop.f32.mrf.mxu1 }
 0x12d   : > { %v2759_v42 = vadd.f32 %v2758_v45, %v2655_v33 }
 0x12f   : > { %v2976_v26 = vadd.f32 %v2936_v37, %v2759_v42 }
 0x131   : > { %v2996_v62 = vadd.f32 %v4559_v24, %v2976_v26 }
 0x132   : > { %v4554_v28 = vpop.f32.mrf.mxu3 }
 0x133   : > { %v2657_v57 = vpop.f32.mrf.mxu0  ;;  %v3012_v55 = vmax.f32 %v2996_v62, 0.0 }
 0x134   : > { %v2760_v41 = vpop.f32.mrf.mxu1 }
 0x135   : > { %v2761_v13 = vadd.f32 %v2760_v41, %v2657_v57 }
 0x137   : > { %v2977_v27 = vadd.f32 %v2938_v54, %v2761_v13 }
 0x139   : > { %v2941_v2 = vpop.f32.mrf.mxu2  ;;  %v2997_v30 = vadd.f32 %v4559_v24, %v2977_v27 }
 0x13b   : > { %v2660_v58 = vpop.f32.mrf.mxu0  ;;  %v4564_v61 = vpop.f32.mrf.mxu3  ;;  %v3013_v63 = vmax.f32 %v2997_v30, 0.0 }
 0x13c   : > { %v2763_v8 = vpop.f32.mrf.mxu1 }
 0x13d   : > { %v3461_v10 = vpack.c.bf16 %v3013_v63, %v3012_v55  ;;  %v2764_v35 = vadd.f32 %v2763_v8, %v2660_v58 }
 0x13f   : > { %3462 = vst [vmem:[%s4569_s13] sm:$0xff] %v3461_v10   ;;  %v2978_v21 = vadd.f32 %v2941_v2, %v2764_v35 }
 0x141   : > { %v2943_v36 = vpop.f32.mrf.mxu2  ;;  %v2998_v59 = vadd.f32 %v4559_v24, %v2978_v21 }
 0x143   : > { %v2662_v11 = vpop.f32.mrf.mxu0  ;;  %v4572_v15 = vpop.f32.mrf.mxu3  ;;  %v3014_v16 = vmax.f32 %v2998_v59, 0.0 }
 0x144   : > { %v2765_v18 = vpop.f32.mrf.mxu1 }
 0x145   : > { %v2766_v46 = vadd.f32 %v2765_v18, %v2662_v11 }
 0x147   : > { %v2979_v47 = vadd.f32 %v2943_v36, %v2766_v46 }
 0x149   : > { %v2946_v9 = vpop.f32.mrf.mxu2  ;;  %v2999_v51 = vadd.f32 %v4559_v24, %v2979_v47 }
 0x14b   : > { %v2665_v22 = vpop.f32.mrf.mxu0  ;;  %v2788_v25 = vpop.f32.mrf.mxu3  ;;  %v3015_v5 = vmax.f32 %v2999_v51, 0.0 }
 0x14c   : > { %v2768_v19 = vpop.f32.mrf.mxu1  ;;  %v2789_v2 = vadd.f32 %v2788_v25, %v4552_v53 }
 0x14d   : > { %v3466_v31 = vpack.c.bf16 %v3015_v5, %v3014_v16  ;;  %v2769_v23 = vadd.f32 %v2768_v19, %v2665_v22 }
 0x14f   : > { %3498 = vst [vmem:[%s4569_s13 + $0x8] sm:$0xff] %v3466_v31   ;;  %v2980_v40 = vadd.f32 %v2946_v9, %v2769_v23 }
 0x151   : > { %v2948_v32 = vpop.f32.mrf.mxu2  ;;  %v3000_v7 = vadd.f32 %v4559_v24, %v2980_v40 }
 0x153   : > { %v2667_v38 = vpop.f32.mrf.mxu0  ;;  %v2790_v48 = vpop.f32.mrf.mxu3  ;;  %v3016_v12 = vmax.f32 %v3000_v7, 0.0 }
 0x154   : > { %v2770_v1 = vpop.f32.mrf.mxu1  ;;  %v2791_v63 = vadd.f32 %v2790_v48, %v4554_v28 }
 0x155   : > { %v2771_v6 = vadd.f32 %v2770_v1, %v2667_v38 }
 0x157   : > { %v2981_v56 = vadd.f32 %v2948_v32, %v2771_v6 }
 0x159   : > { %v2951_v43 = vpop.f32.mrf.mxu2  ;;  %v3001_v49 = vadd.f32 %v4559_v24, %v2981_v56 }
 0x15b   : > { %v2670_v50 = vpop.f32.mrf.mxu0  ;;  %v2793_v60 = vpop.f32.mrf.mxu3  ;;  %v3017_v14 = vmax.f32 %v3001_v49, 0.0 }
 0x15c   : > { %v2773_v20 = vpop.f32.mrf.mxu1  ;;  %v2794_v32 = vadd.f32 %v2793_v60, %v4564_v61 }
 0x15d   : > { %v3471_v52 = vpack.c.bf16 %v3017_v14, %v3016_v12  ;;  %v2774_v39 = vadd.f32 %v2773_v20, %v2670_v50 }
 0x15f   : > { %3499 = vst [vmem:[%s4569_s13 + $0x10] sm:$0xff] %v3471_v52   ;;  %v2982_v17 = vadd.f32 %v2951_v43, %v2774_v39 }
 0x161   : > { %v2953_v44 = vpop.f32.mrf.mxu2  ;;  %v3002_v45 = vadd.f32 %v4559_v24, %v2982_v17 }
 0x163   : > { %v2672_v29 = vpop.f32.mrf.mxu0  ;;  %v2795_v34 = vpop.f32.mrf.mxu3  ;;  %v3018_v13 = vmax.f32 %v3002_v45, 0.0 }
 0x164   : > { %v2775_v37 = vpop.f32.mrf.mxu1  ;;  %v2796_v1 = vadd.f32 %v2795_v34, %v4572_v15 }
 0x165   : > { %v2776_v33 = vadd.f32 %v2775_v37, %v2672_v29 }
 0x167   : > { %v2983_v42 = vadd.f32 %v2953_v44, %v2776_v33 }
 0x169   : > { %v2956_v54 = vpop.f32.mrf.mxu2  ;;  %v3003_v57 = vadd.f32 %v4559_v24, %v2983_v42 }
 0x16b   : > { %v2675_v26 = vpop.f32.mrf.mxu0  ;;  %v2966_v41 = vpop.f32.mrf.mxu3  ;;  %v3019_v62 = vmax.f32 %v3003_v57, 0.0 }
 0x16c   : > { %v2778_v27 = vpop.f32.mrf.mxu1  ;;  %v2988_v55 = vadd.f32 %v2966_v41, %v2789_v2 }
 0x16d   : > { %v3476_v30 = vpack.c.bf16 %v3019_v62, %v3018_v13  ;;  %v2779_v58 = vadd.f32 %v2778_v27, %v2675_v26 }
 0x16e   : > { %v3008_v11 = vadd.f32 %v4559_v24, %v2988_v55 }
 0x16f   : > { %3500 = vst [vmem:[%s4569_s13 + $0x18] sm:$0xff] %v3476_v30   ;;  %v2984_v36 = vadd.f32 %v2956_v54, %v2779_v58 }
 0x170   : > { %v3024_v47 = vmax.f32 %v3008_v11, 0.0 }
 0x171   : > { %v2958_v8 = vpop.f32.mrf.mxu2  ;;  %v3004_v53 = vadd.f32 %v4559_v24, %v2984_v36 }
 0x173   : > { %v2677_v10 = vpop.f32.mrf.mxu0  ;;  %v2968_v35 = vpop.f32.mrf.mxu3  ;;  %v3020_v5 = vmax.f32 %v3004_v53, 0.0 }
 0x174   : > { %v2989_v21 = vadd.f32 %v2968_v35, %v2791_v63  ;;  %v2780_v18 = vpop.f32.mrf.mxu1 }
 0x175   : > { %v2781_v46 = vadd.f32 %v2780_v18, %v2677_v10 }
 0x176   : > { %v3009_v59 = vadd.f32 %v4559_v24, %v2989_v21 }
 0x177   : > { %v2985_v9 = vadd.f32 %v2958_v8, %v2781_v46 }
 0x178   : > { %v3025_v51 = vmax.f32 %v3009_v59, 0.0 }
 0x179   : > { %v3005_v28 = vadd.f32 %v4559_v24, %v2985_v9  ;;  %v2961_v31 = vpop.f32.mrf.mxu2 }
 0x17a   : > { %v3491_v22 = vpack.c.bf16 %v3025_v51, %v3024_v47 }
 0x17b   : > { %v2680_v25 = vpop.f32.mrf.mxu0  ;;  %v2971_v16 = vpop.f32.mrf.mxu3  ;;  %v3021_v19 = vmax.f32 %v3005_v28, 0.0 }
 0x17c   : > { %3503 = vst [vmem:[%s4569_s13 + $0x30] sm:$0xff] %v3491_v22   ;;  %v2783_v23 = vpop.f32.mrf.mxu1  ;;  %v2990_v40 = vadd.f32 %v2971_v16, %v2794_v32 }
 0x17d   : > { %v3481_v38 = vpack.c.bf16 %v3021_v19, %v3020_v5  ;;  %v2784_v48 = vadd.f32 %v2783_v23, %v2680_v25 }
 0x17e   : > { %v3010_v43 = vadd.f32 %v4559_v24, %v2990_v40 }
 0x17f   : > { %3501 = vst [vmem:[%s4569_s13 + $0x20] sm:$0xff] %v3481_v38   ;;  %v2986_v56 = vadd.f32 %v2961_v31, %v2784_v48 }
 0x180   : > { %v3026_v60 = vmax.f32 %v3010_v43, 0.0 }
 0x181   : > { %v2963_v20 = vpop.f32.mrf.mxu2  ;;  %v3006_v61 = vadd.f32 %v4559_v24, %v2986_v56 }
 0x183   : > { %v2682_v6 = vpop.f32.mrf.mxu0  ;;  %v2973_v7 = vpop.f32.mrf.mxu3  ;;  %v3022_v29 = vmax.f32 %v3006_v61, 0.0 }
 0x184   : > { %v2991_v49 = vadd.f32 %v2973_v7, %v2796_v1  ;;  %v2785_v50 = vpop.f32.mrf.mxu1 }
 0x185   : > { %v2786_v12 = vadd.f32 %v2785_v50, %v2682_v6 }
 0x186   : > { %v3011_v14 = vadd.f32 %v4559_v24, %v2991_v49 }
 0x187   : > { %v2987_v52 = vadd.f32 %v2963_v20, %v2786_v12 }
 0x188   : > { %v3027_v39 = vmax.f32 %v3011_v14, 0.0 }
 0x189   : > { %v3007_v15 = vadd.f32 %v4559_v24, %v2987_v52 }
 0x18a   : > { %v3496_v44 = vpack.c.bf16 %v3027_v39, %v3026_v60 }
 0x18b   : > { %v3023_v34 = vmax.f32 %v3007_v15, 0.0 }
 0x18c   : > { %3504 = vst [vmem:[%s4569_s13 + $0x38] sm:$0xff] %v3496_v44  }
 0x18d   : > { %v3486_v17 = vpack.c.bf16 %v3023_v34, %v3022_v29 }
 0x18f   : > { %3502 = vst [vmem:[%s4569_s13 + $0x28] sm:$0xff] %v3486_v17  }
 0x190 PF: > { %s39_s11 = sadd.s32 1, %s3647_s11  }
 0x191   : > { %p36_p4 = scmp.ge.s32.totalorder %s39_s11, 4  }
 0x193   :  { %38 = sbr.rel (!%p36_p4) target bundleno = 3 (0x3), region = 192 }

// kernel: run.8
= control target key start
LH: loop header
LB: loop body
LE: loop exit
PB: predicated region body
PF: predicated region fallthrough
CT: control target
= control target key end

     0   :  { %s3863_s15 = smov 0   ;;  %s4769_s0 = inlined_call_operand.vmem [shape: bf16[3,128,128], index: 0, kind: input, shape index: {}]   ;;  %s4770_s1 = inlined_call_operand.vmem [shape: f32[1,128], index: 1, kind: input, shape index: {}]   ;;  %s4771_s2 = inlined_call_operand.vmem [shape: bf16[2,128,128], index: 2, kind: input, shape index: {}]   ;;  %s4772_s3 = inlined_call_operand.vmem [shape: bf16[2,160,32], index: 3, kind: input, shape index: {}]   ;;  %s4773_s4 = inlined_call_operand.<no memory space> [shape: bf16[], index: 4, kind: input, shape index: {}]   ;;  %s4774_s5 = inlined_call_operand.vmem [shape: bf16[2,160,32], index: 5, kind: input, shape index: {}]   ;;  %s4775_s6 = inlined_call_operand.<no memory space> [shape: s32[], index: 6, kind: input, shape index: {}]   ;;  %s4776_s7 = inlined_call_operand.vmem [shape: bf16[2,160,32], index: 7, kind: input, shape index: {}]   ;;  %s4777_s8 = inlined_call_operand.<no memory space> [shape: bf16[], index: 8, kind: input, shape index: {}]   ;;  %s4778_s9 = inlined_call_operand.vmem [shape: bf16[2,128,128], index: 9, kind: output, shape index: {}]  }
   0x1   :  { %v14_v0 = vstv %s4773_s4  ;;  %v24_v1 = vstv %s4775_s6  ;;  %v30_v2 = vstv %s4777_s8 }
   0x2   :  { %v3859_v3 = vunpack.i.l.bf16 %v14_v0  ;;  %v3861_v4 = vunpack.i.l.bf16 %v30_v2 }
   0x3 LB: > { %s3258_s4 = sadd.s32 4294967295, %s3796_s15   ;;  %p3262_p0 = scmp.ge.s32.totalorder %s3796_s15, 1  ;;  %s3796_s15 = sphi %s3863_s15, %s40_s15  }
   0x4   : > { %p292_p1 = scmp.lt.s32.totalorder %s3796_s15, 3 }
   0x6   : > { %p293_p2 = pnand %p3262_p0, %p292_p1 }
   0x8   : > { %296 = sbr.rel (%p293_p2) target bundleno = 402 (0x192), region = 44 }
   0xd   : > { %p352_p3 = scmp.lt.s32.totalorder %s3258_s4, 1  ;;  %v407_v5 = vlaneseq  ;;  %s3798_s22 = smov 32  }
   0xe   : > { %s3799_s23 = smov 64  }
   0xf   : > { %s4782_s4 = smov (!%p352_p3, %s3258_s4), 1  ;;  %v3873_v6 = vand.u32 127, %v407_v5 }
  0x10   : > { %s3876_s8 = smul.u32 80, %s4782_s4 }
  0x11   : > { %v3879_v7 = vadd.s32 128, %v3873_v6  ;;  %vm440_vm1 = vcmp.lt.s32.totalorder %v3873_v6, 96  ;;  %vm414_vm2 = vcmp.lt.s32.totalorder %v3873_v6, 64  ;;  %vm4082_vm3 = vcmp.lt.s32.totalorder %v3873_v6, %v24_v1 }
  0x12   : > { %s3885_s18 = scalar_lea.vmem %s4774_s5, %s3876_s8  ;;  %s3891_s21 = scalar_lea.vmem %s4772_s3, %s3876_s8  ;;  %vm459_vm4 = vcmp.lt.s32.totalorder %v3873_v6, 32 }
  0x13   : > { %vm410_vm0 = vcmp.lt.s32.totalorder %v3879_v7, 160  ;;  %v3280_v8 = vld [vmem:[%s3885_s18 + $0x10] sm:$0xff]   ;;  %v3310_v10 = vld [vmem:[%s3885_s18 + $0x38] sm:$0xff]   ;;  %v3273_v32 = vld [vmem:[%s3891_s21 + $0x8] sm:$0xff]   ;;  %s4054_s26 = scalar_lea.vmem %s4776_s7, %s3876_s8 }
  0x14   : > { %v3279_v9 = vld [vmem:[%s3891_s21 + $0x10] sm:$0xff]   ;;  %v860_v11 = vunpack.c.l.bf16 %v3280_v8  ;;  %v968_v12 = vunpack.c.h.bf16 %v3280_v8  ;;  %v3309_v15 = vld [vmem:[%s3891_s21 + $0x38] sm:$0xff]   ;;  %v1940_v16 = vunpack.c.l.bf16 %v3310_v10  ;;  %v2048_v17 = vunpack.c.h.bf16 %v3310_v10  ;;  %v404_v35 = vld [vmem:[%s3891_s21] sm:$0xff]  }
  0x15   : > { %v832_v13 = vunpack.c.l.bf16 %v3279_v9  ;;  %v940_v14 = vunpack.c.h.bf16 %v3279_v9  ;;  %v1912_v18 = vunpack.c.l.bf16 %v3309_v15  ;;  %v2020_v19 = vunpack.c.h.bf16 %v3309_v15  ;;  %v3285_v44 = vld [vmem:[%s3891_s21 + $0x18] sm:$0xff]   ;;  %v430_v45 = vld [vmem:[%s3885_s18] sm:$0xff]   ;;  %v3274_v49 = vld [vmem:[%s3885_s18 + $0x8] sm:$0xff]  }
  0x16   : > { %v867_v20 = vsel %vm410_vm0, %v860_v11, %v3859_v3  ;;  %v975_v21 = vsel %vm410_vm0, %v968_v12, %v3859_v3  ;;  %v1947_v30 = vsel %vm410_vm0, %v1940_v16, %v3859_v3  ;;  %v2055_v31 = vsel %vm410_vm0, %v2048_v17, %v3859_v3  ;;  %v3316_v48 = vld [vmem:[%s3885_s18 + $0x40] sm:$0xff]   ;;  %v3286_v17 = vld [vmem:[%s3885_s18 + $0x18] sm:$0xff]   ;;  %v3550_v7 = vld [vmem:[%s4769_s0 + $0x70] sm:$0xff] }
  0x17   : > { %v839_v22 = vsel %vm410_vm0, %v832_v13, %v3859_v3  ;;  %v947_v23 = vsel %vm410_vm0, %v940_v14, %v3859_v3  ;;  %v871_v24 = vsel %vm440_vm1, %v867_v20, %v3859_v3  ;;  %v979_v25 = vsel %vm440_vm1, %v975_v21, %v3859_v3  ;;  %v3292_v20 = vld [vmem:[%s3885_s18 + $0x20] sm:$0xff]  }
  0x18   : > { %v843_v26 = vsel %vm414_vm2, %v839_v22, %v3859_v3  ;;  %v951_v27 = vsel %vm414_vm2, %v947_v23, %v3859_v3  ;;  %v3689_v28 = vpack.i.bf16 %v979_v25, %v871_v24  ;;  %v1919_v33 = vsel %vm410_vm0, %v1912_v18, %v3859_v3  ;;  %v3304_v24 = vld [vmem:[%s3885_s18 + $0x30] sm:$0xff]  }
  0x19   : > { %v3699_v29 = vpack.i.bf16 %v951_v27, %v843_v26  ;;  %v2027_v34 = vsel %vm410_vm0, %v2020_v19, %v3859_v3  ;;  %v1951_v36 = vsel %vm440_vm1, %v1947_v30, %v3859_v3  ;;  %v2059_v37 = vsel %vm440_vm1, %v2055_v31, %v3859_v3 }
  0x1a   : > { %3690 = vrot.lane.b32.xlu0 %v3689_v28, %s3798_s22  ;;  %v1923_v38 = vsel %vm414_vm2, %v1919_v33, %v3859_v3  ;;  %v2031_v39 = vsel %vm414_vm2, %v2027_v34, %v3859_v3  ;;  %v616_v40 = vunpack.c.l.bf16 %v3273_v32  ;;  %v724_v41 = vunpack.c.h.bf16 %v3273_v32 }
  0x1b   : > { %3700 = vrot.lane.b32.xlu1 %v3699_v29, %s3799_s23  ;;  %v405_v42 = vunpack.c.l.bf16 %v404_v35  ;;  %v508_v43 = vunpack.c.h.bf16 %v404_v35  ;;  %v3694_v46 = vpack.i.bf16 %v2059_v37, %v1951_v36  ;;  %v3704_v47 = vpack.i.bf16 %v2031_v39, %v1923_v38  ;;  %v3315_v36 = vld [vmem:[%s3891_s21 + $0x40] sm:$0xff]  }
  0x1c   : > { %v623_v50 = vsel %vm410_vm0, %v616_v40, %v3859_v3  ;;  %v731_v51 = vsel %vm410_vm0, %v724_v41, %v3859_v3  ;;  %v1048_v54 = vunpack.c.l.bf16 %v3285_v44  ;;  %v431_v55 = vunpack.c.l.bf16 %v430_v45 }
  0x1d   : > { %v411_v52 = vsel %vm410_vm0, %v405_v42, %v3859_v3  ;;  %v515_v53 = vsel %vm410_vm0, %v508_v43, %v3859_v3  ;;  %v1156_v56 = vunpack.c.h.bf16 %v3285_v44  ;;  %v2156_v57 = vunpack.c.l.bf16 %v3316_v48  ;;  %v3303_v43 = vld [vmem:[%s3891_s21 + $0x30] sm:$0xff]  }
  0x1e   : > { %v536_v58 = vunpack.c.h.bf16 %v430_v45  ;;  %v644_v59 = vunpack.c.l.bf16 %v3274_v49  ;;  %v627_v60 = vsel %vm414_vm2, %v623_v50, %v3859_v3  ;;  %v735_v61 = vsel %vm414_vm2, %v731_v51, %v3859_v3  ;;  %v3551_v51 = vld [vmem:[%s4769_s0 + $0x78] sm:$0xff] }
  0x1f   : > { %v437_v62 = vsel %vm410_vm0, %v431_v55, %v3859_v3  ;;  %v752_v63 = vunpack.c.h.bf16 %v3274_v49  ;;  %v415_v0 = vsel %vm414_vm2, %v411_v52, %v3859_v3  ;;  %v519_v2 = vsel %vm414_vm2, %v515_v53, %v3859_v3  ;;  %v3298_v55 = vld [vmem:[%s3885_s18 + $0x28] sm:$0xff]   ;;  %3654 = vmatpush.bf16.msra.mxu3 %v3551_v51  ;;  %2693 = vmatpush.bf16.msra.mxu0 %v3551_v51 }
  0x20   : > { %v441_v5 = vsel %vm440_vm1, %v437_v62, %v3859_v3  ;;  %v543_v8 = vsel %vm410_vm0, %v536_v58, %v3859_v3  ;;  %v2264_v9 = vunpack.c.h.bf16 %v3316_v48  ;;  %v651_v12 = vsel %vm410_vm0, %v644_v59, %v3859_v3  ;;  %v4066_v48 = vld [vmem:[%s4769_s0 + $0xb8] sm:$0xff] }
  0x21   : > { %v547_v10 = vsel %vm440_vm1, %v543_v8, %v3859_v3  ;;  %v759_v13 = vsel %vm410_vm0, %v752_v63, %v3859_v3  ;;  %v3724_v14 = vpack.i.bf16 %v735_v61, %v627_v60  ;;  %v3719_v15 = vpack.i.bf16 %v519_v2, %v415_v0  ;;  %2974 = vmatpush.bf16.msra.mxu2 %v4066_v48  ;;  %v3291_v8 = vld [vmem:[%s3891_s21 + $0x20] sm:$0xff]  }
  0x22   : > { %3695 = vrot.lane.b32.xlu0 %v3694_v46, %s3798_s22  ;;  %v3709_v11 = vpack.i.bf16 %v547_v10, %v441_v5  ;;  %v1055_v16 = vsel %vm410_vm0, %v1048_v54, %v3859_v3  ;;  %v1163_v18 = vsel %vm410_vm0, %v1156_v56, %v3859_v3  ;;  %v2163_v19 = vsel %vm410_vm0, %v2156_v57, %v3859_v3  ;;  %v4094_v56 = vld [vmem:[%s4769_s0 + $0xb0] sm:$0xff] }
  0x23   : > { %3705 = vrot.lane.b32.xlu1 %v3704_v47, %s3799_s23  ;;  %v2271_v21 = vsel %vm410_vm0, %v2264_v9, %v3859_v3  ;;  %v655_v22 = vsel %vm440_vm1, %v651_v12, %v3859_v3  ;;  %v763_v23 = vsel %vm440_vm1, %v759_v13, %v3859_v3  ;;  %v1059_v25 = vsel %vm414_vm2, %v1055_v16, %v3859_v3  ;;  %v3281_v57 = vld [vmem:[%s4054_s26 + $0x10] sm:$0xff]   ;;  %v4123_v13 = vld [vmem:[%s4769_s0 + $0xa8] sm:$0xff] }
  0x24   : > { %3710 = vrot.lane.b32.xlu2 %v3709_v11, %s3798_s22  ;;  %v1076_v26 = vunpack.c.l.bf16 %v3286_v17  ;;  %v1184_v27 = vunpack.c.h.bf16 %v3286_v17  ;;  %v1167_v28 = vsel %vm414_vm2, %v1163_v18, %v3859_v3  ;;  %v2167_v29 = vsel %vm440_vm1, %v2163_v19, %v3859_v3  ;;  %3655 = vmatpush.bf16.msra.mxu3 %v3550_v7 }
  0x25   : > { %v1292_v30 = vunpack.c.l.bf16 %v3292_v20  ;;  %v1400_v31 = vunpack.c.h.bf16 %v3292_v20  ;;  %v2275_v32 = vsel %vm440_vm1, %v2271_v21, %v3859_v3  ;;  %v3714_v33 = vpack.i.bf16 %v763_v23, %v655_v22  ;;  %2975 = vmatpush.bf16.msra.mxu2 %v4094_v56  ;;  %2694 = vmatpush.bf16.msra.mxu0 %v3550_v7 }
  0x26   : > { %v1724_v34 = vunpack.c.l.bf16 %v3304_v24  ;;  %v1832_v35 = vunpack.c.h.bf16 %v3304_v24  ;;  %v1083_v37 = vsel %vm410_vm0, %v1076_v26, %v3859_v3  ;;  %v1191_v38 = vsel %vm410_vm0, %v1184_v27, %v3859_v3  ;;  %v3321_v26 = vld [vmem:[%s3891_s21 + $0x48] sm:$0xff]  }
  0x27   : > { %v3739_v39 = vpack.i.bf16 %v1167_v28, %v1059_v25  ;;  %v3734_v40 = vpack.i.bf16 %v2275_v32, %v2167_v29  ;;  %v1299_v41 = vsel %vm410_vm0, %v1292_v30, %v3859_v3  ;;  %v1407_v42 = vsel %vm410_vm0, %v1400_v31, %v3859_v3  ;;  %v3322_v25 = vld [vmem:[%s3885_s18 + $0x48] sm:$0xff]  }
  0x28   : > { %v1731_v44 = vsel %vm410_vm0, %v1724_v34, %v3859_v3  ;;  %v1839_v45 = vsel %vm410_vm0, %v1832_v35, %v3859_v3  ;;  %v2128_v46 = vunpack.c.l.bf16 %v3315_v36  ;;  %v2236_v47 = vunpack.c.h.bf16 %v3315_v36 }
  0x29   : > { %v1087_v49 = vsel %vm440_vm1, %v1083_v37, %v3859_v3  ;;  %v1195_v50 = vsel %vm440_vm1, %v1191_v38, %v3859_v3  ;;  %v1303_v53 = vsel %vm440_vm1, %v1299_v41, %v3859_v3  ;;  %v1696_v54 = vunpack.c.l.bf16 %v3303_v43  ;;  %2976 = vmatpush.bf16.msra.mxu2 %v4123_v13  ;;  %v3297_v41 = vld [vmem:[%s3891_s21 + $0x28] sm:$0xff]  }
  0x2a   : > { %3720 = vrot.lane.b32.xlu0 %v3719_v15, %s3799_s23  ;;  %v1411_v58 = vsel %vm440_vm1, %v1407_v42, %v3859_v3  ;;  %v1735_v59 = vsel %vm440_vm1, %v1731_v44, %v3859_v3  ;;  %v1843_v60 = vsel %vm440_vm1, %v1839_v45, %v3859_v3  ;;  %v1804_v61 = vunpack.c.h.bf16 %v3303_v43 }
  0x2b   : > { %3725 = vrot.lane.b32.xlu1 %v3724_v14, %s3799_s23  ;;  %v3729_v62 = vpack.i.bf16 %v1195_v50, %v1087_v49  ;;  %v2135_v63 = vsel %vm410_vm0, %v2128_v46, %v3859_v3  ;;  %v2243_v0 = vsel %vm410_vm0, %v2236_v47, %v3859_v3  ;;  %v1508_v2 = vunpack.c.l.bf16 %v3298_v55 }
  0x2c   : > { %3715 = vrot.lane.b32.xlu2 %v3714_v33, %s3798_s22  ;;  %v1616_v5 = vunpack.c.h.bf16 %v3298_v55  ;;  %v885_v9 = vunpack.c.l.bf16 %v3281_v57  ;;  %v3749_v10 = vpack.i.bf16 %v1411_v58, %v1303_v53  ;;  %v3754_v11 = vpack.i.bf16 %v1843_v60, %v1735_v59 }
  0x2d   : > { %v1703_v12 = vsel %vm410_vm0, %v1696_v54, %v3859_v3  ;;  %v1811_v14 = vsel %vm410_vm0, %v1804_v61, %v3859_v3  ;;  %v2139_v15 = vsel %vm414_vm2, %v2135_v63, %v3859_v3  ;;  %v2247_v16 = vsel %vm414_vm2, %v2243_v0, %v3859_v3 }
  0x2e   : > { %v4137_v17 = vsel %vm459_vm4, %v885_v9, %v3859_v3  ;;  %v1264_v18 = vunpack.c.l.bf16 %v3291_v8  ;;  %v1372_v19 = vunpack.c.h.bf16 %v3291_v8  ;;  %v993_v21 = vunpack.c.h.bf16 %v3281_v57  ;;  %v3549_v8 = vld [vmem:[%s4769_s0 + $0x68] sm:$0xff]  ;;  %v4253_v9 = vld [vmem:[%s4769_s0 + $0x98] sm:$0xff] }
  0x2f   : > { %v903_v20 = vsel %vm4082_vm3, %v4137_v17, %v3861_v4  ;;  %v1515_v22 = vsel %vm410_vm0, %v1508_v2, %v3859_v3  ;;  %v1623_v23 = vsel %vm410_vm0, %v1616_v5, %v3859_v3  ;;  %v1707_v24 = vsel %vm414_vm2, %v1703_v12, %v3859_v3  ;;  %v4238_v2 = vld [vmem:[%s4769_s0 + $0xa0] sm:$0xff]  ;;  %v4244_v5 = vld [vmem:[%s4769_s0 + $0x38] sm:$0xff]  ;;  %3656 = vmatpush.bf16.msra.mxu3 %v3549_v8 }
  0x30   : > { %v4159_v27 = vsel %vm459_vm4, %v993_v21, %v3859_v3  ;;  %v1815_v28 = vsel %vm414_vm2, %v1811_v14, %v3859_v3  ;;  %v3744_v29 = vpack.i.bf16 %v2247_v16, %v2139_v15  ;;  %v1519_v31 = vsel %vm440_vm1, %v1515_v22, %v3859_v3  ;;  %2977 = vmatpush.bf16.msra.mxu2 %v4238_v2  ;;  %v4260_v14 = vld [vmem:[%s4769_s0 + $0x30] sm:$0xff] }
  0x31   : > { %v1011_v30 = vsel %vm4082_vm3, %v4159_v27, %v3861_v4  ;;  %v1627_v32 = vsel %vm440_vm1, %v1623_v23, %v3859_v3  ;;  %v1271_v33 = vsel %vm410_vm0, %v1264_v18, %v3859_v3  ;;  %v1379_v34 = vsel %vm410_vm0, %v1372_v19, %v3859_v3  ;;  %2796 = vmatpush.bf16.msra.mxu1 %v4244_v5  ;;  %v3548_v18 = vld [vmem:[%s4769_s0 + $0x60] sm:$0xff]  ;;  %v4275_v19 = vld [vmem:[%s4769_s0 + $0x90] sm:$0xff]  ;;  %v3311_v23 = vld [vmem:[%s4054_s26 + $0x38] sm:$0xff]  }
  0x32   : > { %3735 = vrot.lane.b32.xlu0 %v3734_v40, %s3798_s22  ;;  %v2372_v35 = vunpack.c.l.bf16 %v3322_v25  ;;  %v2480_v36 = vunpack.c.h.bf16 %v3322_v25  ;;  %v2344_v37 = vunpack.c.l.bf16 %v3321_v26  ;;  %v2452_v38 = vunpack.c.h.bf16 %v3321_v26  ;;  %2695 = vmatpush.bf16.msra.mxu0 %v3549_v8  ;;  %v4288_v26 = vld [vmem:[%s4769_s0 + $0x28] sm:$0xff]  ;;  %v3317_v8 = vld [vmem:[%s4054_s26 + $0x40] sm:$0xff]  }
  0x33   : > { %3740 = vrot.lane.b32.xlu1 %v3739_v39, %s3799_s23  ;;  %v3764_v39 = vpack.i.bf16 %v1815_v28, %v1707_v24  ;;  %v3769_v40 = vpack.i.bf16 %v1627_v32, %v1519_v31  ;;  %v1275_v42 = vsel %vm414_vm2, %v1271_v33, %v3859_v3  ;;  %v1383_v43 = vsel %vm414_vm2, %v1379_v34, %v3859_v3  ;;  %v3547_v31 = vld [vmem:[%s4769_s0 + $0x58] sm:$0xff]  ;;  %v4307_v32 = vld [vmem:[%s4769_s0 + $0x88] sm:$0xff] }
  0x34   : > { %3730 = vrot.lane.b32.xlu2 %v3729_v62, %s3798_s22  ;;  %v2379_v44 = vsel %vm410_vm0, %v2372_v35, %v3859_v3  ;;  %v2487_v45 = vsel %vm410_vm0, %v2480_v36, %v3859_v3  ;;  %v2351_v46 = vsel %vm410_vm0, %v2344_v37, %v3859_v3  ;;  %v2459_v47 = vsel %vm410_vm0, %v2452_v38, %v3859_v3  ;;  %v3275_v35 = vld [vmem:[%s4054_s26 + $0x8] sm:$0xff]   ;;  %v4322_v38 = vld [vmem:[%s4769_s0 + $0x20] sm:$0xff] }
  0x35   : > { %v1480_v49 = vunpack.c.l.bf16 %v3297_v41  ;;  %v1588_v50 = vunpack.c.h.bf16 %v3297_v41  ;;  %v3759_v51 = vpack.i.bf16 %v1383_v43, %v1275_v42  ;;  %v2383_v53 = vsel %vm440_vm1, %v2379_v44, %v3859_v3  ;;  %2978 = vmatpush.bf16.msra.mxu2 %v4253_v9  ;;  %2797 = vmatpush.bf16.msra.mxu1 %v4260_v14  ;;  %v3546_v43 = vld [vmem:[%s4769_s0 + $0x50] sm:$0xff]  ;;  %v4343_v44 = vld [vmem:[%s4769_s0 + $0x80] sm:$0xff] }
  0x36   : > { %v2491_v54 = vsel %vm440_vm1, %v2487_v45, %v3859_v3  ;;  %v2355_v55 = vsel %vm414_vm2, %v2351_v46, %v3859_v3  ;;  %v2463_v57 = vsel %vm414_vm2, %v2459_v47, %v3859_v3  ;;  %v1965_v24 = vunpack.c.l.bf16 %v3311_v23  ;;  %3657 = vmatpush.bf16.msra.mxu3 %v3548_v18  ;;  %2696 = vmatpush.bf16.msra.mxu0 %v3548_v18  ;;  %v4349_v45 = vld [vmem:[%s4769_s0 + $0x18] sm:$0xff]  ;;  %v3545_v47 = vld [vmem:[%s4769_s0 + $0x48] sm:$0xff] }
  0x37   : > { %v1487_v58 = vsel %vm410_vm0, %v1480_v49, %v3859_v3  ;;  %v1595_v59 = vsel %vm410_vm0, %v1588_v50, %v3859_v3  ;;  %v3779_v60 = vpack.i.bf16 %v2491_v54, %v2383_v53  ;;  %v3784_v61 = vpack.i.bf16 %v2463_v57, %v2355_v55  ;;  %v4359_v55 = vld [vmem:[%s4769_s0 + $0x10] sm:$0xff] }
  0x38   : > { %v1491_v62 = vsel %vm414_vm2, %v1487_v58, %v3859_v3  ;;  %v1599_v63 = vsel %vm414_vm2, %v1595_v59, %v3859_v3  ;;  %v2073_v25 = vunpack.c.h.bf16 %v3311_v23  ;;  %v4293_v28 = vsel %vm459_vm4, %v1965_v24, %v3859_v3  ;;  %v4422_v24 = vld [vmem:[%s4769_s0] sm:$0xff] }
  0x39   : > { %v3774_v0 = vpack.i.bf16 %v1599_v63, %v1491_v62  ;;  %2979 = vmatpush.bf16.msra.mxu2 %v4275_v19  ;;  %2798 = vmatpush.bf16.msra.mxu1 %v4288_v26  ;;  %v1983_v33 = vsel %vm4082_vm3, %v4293_v28, %v3861_v4  ;;  %v669_v36 = vunpack.c.l.bf16 %v3275_v35  ;;  %v777_v37 = vunpack.c.h.bf16 %v3275_v35  ;;  %v3544_v63 = vld [vmem:[%s4769_s0 + $0x40] sm:$0xff] }
  0x3a   : > { %3750 = vrot.lane.b32.xlu0 %v3749_v10, %s3798_s22  ;;  %v453_v10 = vld [vmem:[%s4054_s26] sm:$0xff]   ;;  %3658 = vmatpush.bf16.msra.mxu3 %v3547_v31 }
  0x3b   : > { %3755 = vrot.lane.b32.xlu1 %v3754_v11, %s3798_s22  ;;  %v454_v11 = vunpack.c.l.bf16 %v453_v10  ;;  %v561_v12 = vunpack.c.h.bf16 %v453_v10  ;;  %2697 = vmatpush.bf16.msra.mxu0 %v3547_v31  ;;  %v2181_v10 = vunpack.c.l.bf16 %v3317_v8 }
  0x3c   : > { %3745 = vrot.lane.b32.xlu2 %v3744_v29, %s3799_s23  ;;  %v4298_v29 = vsel %vm459_vm4, %v2073_v25, %v3859_v3 }
  0x3d   : > { %v460_v15 = vsel %vm459_vm4, %v454_v11, %v3859_v3  ;;  %v567_v16 = vsel %vm459_vm4, %v561_v12, %v3859_v3  ;;  %v2091_v34 = vsel %vm4082_vm3, %v4298_v29, %v3861_v4  ;;  %2980 = vmatpush.bf16.msra.mxu2 %v4307_v32  ;;  %2799 = vmatpush.bf16.msra.mxu1 %v4322_v38  ;;  %v2289_v11 = vunpack.c.h.bf16 %v3317_v8  ;;  %v4397_v12 = vld [vmem:[%s4769_s0 + $0x8] sm:$0xff] }
  0x3e   : > { %v472_v21 = vsel %vm4082_vm3, %v460_v15, %v3861_v4  ;;  %v579_v22 = vsel %vm4082_vm3, %v567_v16, %v3861_v4  ;;  %3659 = vmatpush.bf16.msra.mxu3 %v3546_v43  ;;  %v4403_v16 = vsel %vm459_vm4, %v2181_v10, %v3859_v3 }
  0x3f   : > { %2698 = vmatpush.bf16.msra.mxu0 %v3546_v43  ;;  %v4408_v18 = vsel %vm459_vm4, %v2289_v11, %v3859_v3 }
  0x40   : > { %v2307_v23 = vsel %vm4082_vm3, %v4408_v18, %v3861_v4 }
  0x41   : > { %2981 = vmatpush.bf16.msra.mxu2 %v4343_v44  ;;  %2800 = vmatpush.bf16.msra.mxu1 %v4349_v45 }
  0x42   : > { %3765 = vrot.lane.b32.xlu0 %v3764_v39, %s3799_s23  ;;  %v675_v39 = vsel %vm459_vm4, %v669_v36, %v3859_v3  ;;  %3660 = vmatpush.bf16.msra.mxu3 %v3545_v47 }
  0x43   : > { %3770 = vrot.lane.b32.xlu1 %v3769_v40, %s3798_s22  ;;  %v783_v40 = vsel %vm459_vm4, %v777_v37, %v3859_v3  ;;  %v687_v41 = vsel %vm4082_vm3, %v675_v39, %v3861_v4  ;;  %2699 = vmatpush.bf16.msra.mxu0 %v3545_v47 }
  0x44   : > { %3760 = vrot.lane.b32.xlu2 %v3759_v51, %s3799_s23  ;;  %v795_v42 = vsel %vm4082_vm3, %v783_v40, %v3861_v4  ;;  %v3287_v51 = vld [vmem:[%s4054_s26 + $0x18] sm:$0xff]  }
  0x45   : > { %v1101_v53 = vunpack.c.l.bf16 %v3287_v51  ;;  %v1209_v54 = vunpack.c.h.bf16 %v3287_v51  ;;  %2801 = vmatpush.bf16.msra.mxu1 %v4359_v55  ;;  %v3293_v51 = vld [vmem:[%s4054_s26 + $0x20] sm:$0xff]  }
  0x46   : > { %3661 = vmatpush.bf16.msra.mxu3 %v3544_v63 }
  0x47   : > { %v4379_v62 = vsel %vm459_vm4, %v1209_v54, %v3859_v3  ;;  %2700 = vmatpush.bf16.msra.mxu0 %v3544_v63 }
  0x48   : > { %v1227_v7 = vsel %vm4082_vm3, %v4379_v62, %v3861_v4 }
  0x49   : > { %2802 = vmatpush.bf16.msra.mxu1 %v4397_v12 }
  0x4a   : > { %3780 = vrot.lane.b32.xlu0 %v3779_v60, %s3798_s22  ;;  %3662 = vmatpush.bf16.msrb.mxu3 %v4244_v5  ;;  %v2199_v5 = vsel %vm4082_vm3, %v4403_v16, %v3861_v4 }
  0x4b   : > { %3785 = vrot.lane.b32.xlu1 %v3784_v61, %s3799_s23  ;;  %v4374_v61 = vsel %vm459_vm4, %v1101_v53, %v3859_v3  ;;  %v1425_v53 = vunpack.c.h.bf16 %v3293_v51 }
  0x4c   : > { %3775 = vrot.lane.b32.xlu2 %v3774_v0, %s3799_s23  ;;  %v1119_v0 = vsel %vm4082_vm3, %v4374_v61, %v3861_v4 }
  0x4d   : > { %2803 = vmatpush.bf16.msra.mxu1 %v4422_v24 }
  0x4e   : > { %3663 = vmatpush.bf16.msrb.mxu3 %v4260_v14 }
  0x52   : > { %3664 = vmatpush.bf16.msrb.mxu3 %v4288_v26 }
  0x56   : > { %3665 = vmatpush.bf16.msrb.mxu3 %v4322_v38  ;;  %v3305_v38 = vld [vmem:[%s4054_s26 + $0x30] sm:$0xff]  }
  0x5a   : > { %3666 = vmatpush.bf16.msrb.mxu3 %v4349_v45 }
  0x5e   : > { %3667 = vmatpush.bf16.msrb.mxu3 %v4359_v55 }
  0x62   : > { %3668 = vmatpush.bf16.msrb.mxu3 %v4397_v12 }
  0x66   : > { %3669 = vmatpush.bf16.msrb.mxu3 %v4422_v24 }
  0x7e   : > { %v3711_v46 = vpop.permute.xlu2 %3710 }
  0x7f   : > { %v3713_v49 = vunpack.i.h.bf16 %v3711_v46  ;;  %v3712_v50 = vunpack.i.l.bf16 %v3711_v46 }
  0x81   : > { %v583_v57 = vsel %vm4082_vm3, %v3713_v49, %v3861_v4  ;;  %v476_v58 = vsel %vm4082_vm3, %v3712_v50, %v3861_v4 }
  0x82   : > { %v4367_v59 = vmax.f32 %v579_v22, %v583_v57  ;;  %v4369_v60 = vmax.f32 %v472_v21, %v476_v58 }
  0x86   : > { %v3716_v15 = vpop.permute.xlu2 %3715 }
  0x87   : > { %v3718_v21 = vunpack.i.h.bf16 %v3716_v15  ;;  %v3717_v22 = vunpack.i.l.bf16 %v3716_v15 }
  0x89   : > { %v799_v35 = vsel %vm4082_vm3, %v3718_v21, %v3861_v4  ;;  %v691_v36 = vsel %vm4082_vm3, %v3717_v22, %v3861_v4 }
  0x8a   : > { %v4432_v46 = vmax.f32 %v795_v42, %v799_v35  ;;  %v4434_v47 = vmax.f32 %v687_v41, %v691_v36  ;;  %v1317_v42 = vunpack.c.l.bf16 %v3293_v51 }
  0x8c   : > { %v3691_v25 = vpop.permute.xlu0 %3690  ;;  %v4463_v17 = vsel %vm459_vm4, %v1317_v42, %v3859_v3 }
  0x8d   : > { %v3701_v31 = vpop.permute.xlu1 %3700  ;;  %v3693_v37 = vunpack.i.h.bf16 %v3691_v25  ;;  %v3692_v39 = vunpack.i.l.bf16 %v3691_v25 }
  0x8e   : > { %v3703_v40 = vunpack.i.h.bf16 %v3701_v31  ;;  %v3702_v43 = vunpack.i.l.bf16 %v3701_v31  ;;  %v3731_v27 = vpop.permute.xlu2 %3730 }
  0x8f   : > { %v1015_v49 = vsel %vm4082_vm3, %v3693_v37, %v3861_v4  ;;  %v907_v50 = vsel %vm4082_vm3, %v3692_v39, %v3861_v4  ;;  %v3733_v61 = vunpack.i.h.bf16 %v3731_v27  ;;  %v3732_v62 = vunpack.i.l.bf16 %v3731_v27 }
  0x90   : > { %v1019_v14 = vmax.f32 %v1011_v30, %v1015_v49  ;;  %v911_v41 = vmax.f32 %v903_v20, %v907_v50  ;;  %v1023_v54 = vsel %vm4082_vm3, %v3703_v40, %v3861_v4  ;;  %v915_v57 = vsel %vm4082_vm3, %v3702_v43, %v3861_v4 }
  0x91   : > { %v4468_v20 = vsel %vm459_vm4, %v1425_v53, %v3859_v3  ;;  %v1231_v11 = vsel %vm4082_vm3, %v3733_v61, %v3861_v4  ;;  %v1123_v15 = vsel %vm4082_vm3, %v3732_v62, %v3861_v4  ;;  %v1335_v37 = vsel %vm4082_vm3, %v4463_v17, %v3861_v4 }
  0x92   : > { %v1027_v30 = vmax.f32 %v1019_v14, %v1023_v54  ;;  %v919_v58 = vmax.f32 %v911_v41, %v915_v57  ;;  %v4477_v35 = vmax.f32 %v1227_v7, %v1231_v11  ;;  %v4479_v36 = vmax.f32 %v1119_v0, %v1123_v15 }
  0x93   : > { %v1443_v39 = vsel %vm4082_vm3, %v4468_v20, %v3861_v4  ;;  %v1749_v49 = vunpack.c.l.bf16 %v3305_v38  ;;  %v1857_v50 = vunpack.c.h.bf16 %v3305_v38 }
  0x94   : > { %v1030_v26 = vpack.c.bf16 0.0, %v1027_v30  ;;  %v922_v63 = vpack.c.bf16 0.0, %v919_v58  ;;  %v3696_v8 = vpop.permute.xlu0 %3695 }
  0x95   : > { %v3706_v10 = vpop.permute.xlu1 %3705  ;;  %v3698_v21 = vunpack.i.h.bf16 %v3696_v8  ;;  %v3697_v22 = vunpack.i.l.bf16 %v3696_v8  ;;  %v4516_v41 = vsel %vm459_vm4, %v1749_v49, %v3859_v3  ;;  %v4521_v28 = vsel %vm459_vm4, %v1857_v50, %v3859_v3 }
  0x96   : > { %v3708_v25 = vunpack.i.h.bf16 %v3706_v10  ;;  %v3707_v31 = vunpack.i.l.bf16 %v3706_v10  ;;  %1033 = vst [vmem:[#allocation17 + $0x14] sm:$0xf] %v1030_v26  ;;  %v3746_v61 = vpop.permute.xlu2 %3745  ;;  %v1767_v62 = vsel %vm4082_vm3, %v4516_v41, %v3861_v4  ;;  %v1875_v26 = vsel %vm4082_vm3, %v4521_v28, %v3861_v4 }
  0x97   : > { %925 = vst [vmem:[#allocation17 + $0x10] sm:$0xf] %v922_v63  ;;  %v2095_v40 = vsel %vm4082_vm3, %v3698_v21, %v3861_v4  ;;  %v1987_v0 = vsel %vm4082_vm3, %v3697_v22, %v3861_v4  ;;  %v3747_v49 = vunpack.i.l.bf16 %v3746_v61 }
  0x98   : > { %v2099_v7 = vmax.f32 %v2091_v34, %v2095_v40  ;;  %v1991_v43 = vmax.f32 %v1983_v33, %v1987_v0  ;;  %v2103_v51 = vsel %vm4082_vm3, %v3708_v25, %v3861_v4  ;;  %v1995_v14 = vsel %vm4082_vm3, %v3707_v31, %v3861_v4  ;;  %v3299_v25 = vld [vmem:[%s4054_s26 + $0x28] sm:$0xff]  }
  0x99   : > { %v3748_v31 = vunpack.i.h.bf16 %v3746_v61  ;;  %v1533_v38 = vunpack.c.l.bf16 %v3299_v25  ;;  %v1641_v40 = vunpack.c.h.bf16 %v3299_v25 }
  0x9a   : > { %v2107_v29 = vmax.f32 %v2099_v7, %v2103_v51  ;;  %v1999_v34 = vmax.f32 %v1991_v43, %v1995_v14 }
  0x9c   : > { %v2110_v33 = vpack.c.bf16 0.0, %v2107_v29  ;;  %v2002_v45 = vpack.c.bf16 0.0, %v1999_v34  ;;  %v3721_v53 = vpop.permute.xlu0 %3720 }
  0x9d   : > { %v3726_v42 = vpop.permute.xlu1 %3725  ;;  %v3723_v27 = vunpack.i.h.bf16 %v3721_v53  ;;  %v3722_v30 = vunpack.i.l.bf16 %v3721_v53 }
  0x9e   : > { %v3728_v54 = vunpack.i.h.bf16 %v3726_v42  ;;  %v3727_v57 = vunpack.i.l.bf16 %v3726_v42  ;;  %2113 = vst [vmem:[#allocation17 + $0x3c] sm:$0xf] %v2110_v33  ;;  %v3552_v58 = vld [vmem:[#allocation17 + $0x10] sm:$0xff]  ;;  %v2211_v42 = vsel %vm4082_vm3, %v3747_v49, %v3861_v4 }
  0x9f   : > { %2005 = vst [vmem:[#allocation17 + $0x38] sm:$0xf] %v2002_v45  ;;  %v591_v8 = vsel %vm4082_vm3, %v3723_v27, %v3861_v4  ;;  %v484_v10 = vsel %vm4082_vm3, %v3722_v30, %v3861_v4  ;;  %2982 = vmatmul.bf16.vlgmr.msra.gmra.mxu2 %v3552_v58  ;;  %v2319_v45 = vsel %vm4082_vm3, %v3748_v31, %v3861_v4 }
  0xa0   : > { %v807_v55 = vsel %vm4082_vm3, %v3728_v54, %v3861_v4  ;;  %v699_v63 = vsel %vm4082_vm3, %v3727_v57, %v3861_v4  ;;  %v595_v21 = vmax.f32 %v4367_v59, %v591_v8  ;;  %v488_v22 = vmax.f32 %v4369_v60, %v484_v10  ;;  %v3761_v54 = vpop.permute.xlu2 %3760 }
  0xa1   : > { %v811_v11 = vmax.f32 %v4432_v46, %v807_v55  ;;  %v703_v15 = vmax.f32 %v4434_v47, %v699_v63  ;;  %v4553_v46 = vsel %vm459_vm4, %v1533_v38, %v3859_v3  ;;  %v4558_v59 = vsel %vm459_vm4, %v1641_v40, %v3859_v3 }
  0xa2   : > { %v598_v43 = vpack.c.bf16 0.0, %v595_v21  ;;  %v490_v50 = vpack.c.bf16 0.0, %v488_v22  ;;  %v1551_v47 = vsel %vm4082_vm3, %v4553_v46, %v3861_v4  ;;  %v1659_v51 = vsel %vm4082_vm3, %v4558_v59, %v3861_v4  ;;  %v3323_v46 = vld [vmem:[%s4054_s26 + $0x48] sm:$0xff]   ;;  %s3525_s26 = sshll.u32 %s4782_s4, 6 }
  0xa3   : > { %v814_v0 = vpack.c.bf16 0.0, %v811_v11  ;;  %v706_v7 = vpack.c.bf16 0.0, %v703_v15  ;;  %v3763_v8 = vunpack.i.h.bf16 %v3761_v54  ;;  %v3762_v10 = vunpack.i.l.bf16 %v3761_v54  ;;  %s4712_s18 = scalar_lea.vmem %s4771_s2, %s3525_s26  ;;  %s4729_s22 = scalar_lea.vmem %s4778_s9, %s3525_s26 }
  0xa4   : > { %v3736_v12 = vpop.permute.xlu0 %3735  ;;  %601 = vst [vmem:[#allocation17 + $0x4] sm:$0xf] %v598_v43 }
  0xa5   : > { %817 = vst [vmem:[#allocation17 + $0xc] sm:$0xf] %v814_v0  ;;  %v3741_v60 = vpop.permute.xlu1 %3740  ;;  %v3738_v34 = vunpack.i.h.bf16 %v3736_v12  ;;  %v3737_v33 = vunpack.i.l.bf16 %v3736_v12  ;;  %v1455_v40 = vsel %vm4082_vm3, %v3763_v8, %v3861_v4  ;;  %v1347_v0 = vsel %vm4082_vm3, %v3762_v10, %v3861_v4 }
  0xa6   : > { %709 = vst [vmem:[#allocation17 + $0x8] sm:$0xf] %v706_v7  ;;  %v3743_v14 = vunpack.i.h.bf16 %v3741_v60  ;;  %v3742_v29 = vunpack.i.l.bf16 %v3741_v60  ;;  %v4575_v53 = vld [vmem:[#allocation17 + $0x38] sm:$0xff] }
  0xa7   : > { %493 = vst [vmem:[#allocation17] sm:$0xf] %v490_v50  ;;  %v2311_v27 = vsel %vm4082_vm3, %v3738_v34, %v3861_v4  ;;  %v2203_v30 = vsel %vm4082_vm3, %v3737_v33, %v3861_v4  ;;  %2731 = vmatmul.bf16.vlgmr.msra.gmra.mxu3 %v4575_v53 }
  0xa8   : > { %v1239_v57 = vsel %vm4082_vm3, %v3743_v14, %v3861_v4  ;;  %v1131_v24 = vsel %vm4082_vm3, %v3742_v29, %v3861_v4  ;;  %v2315_v55 = vmax.f32 %v2307_v23, %v2311_v27  ;;  %v2207_v63 = vmax.f32 %v2199_v5, %v2203_v30  ;;  %3670 = vmatpush.bf16.msra.mxu3 %v4066_v48  ;;  %v3776_v50 = vpop.permute.xlu2 %3775 }
  0xa9   : > { %v1243_v58 = vmax.f32 %v4477_v35, %v1239_v57  ;;  %v1135_v61 = vmax.f32 %v4479_v36, %v1131_v24  ;;  %v3778_v34 = vunpack.i.h.bf16 %v3776_v50  ;;  %v3777_v17 = vunpack.i.l.bf16 %v3776_v50 }
  0xaa   : > { %v2215_v11 = vmax.f32 %v2207_v63, %v2211_v42  ;;  %v2323_v15 = vmax.f32 %v2315_v55, %v2319_v45 }
  0xab   : > { %v1246_v35 = vpack.c.bf16 0.0, %v1243_v58  ;;  %v1138_v36 = vpack.c.bf16 0.0, %v1135_v61 }
  0xac   : > { %v2218_v21 = vpack.c.bf16 0.0, %v2215_v11  ;;  %v2326_v18 = vpack.c.bf16 0.0, %v2323_v15  ;;  %v3751_v22 = vpop.permute.xlu0 %3750  ;;  %3671 = vmatpush.bf16.msra.mxu3 %v4094_v56  ;;  %v3529_v15 = vld [vmem:[#allocation17 + $0x10] sm:$0xff] }
  0xad   : > { %1249 = vst [vmem:[#allocation17 + $0x1c] sm:$0xf] %v1246_v35  ;;  %v4603_v23 = vld [vmem:[#allocation17 + $0x8] sm:$0xff]  ;;  %v3756_v25 = vpop.permute.xlu1 %3755  ;;  %v3753_v16 = vunpack.i.h.bf16 %v3751_v22  ;;  %v3752_v5 = vunpack.i.l.bf16 %v3751_v22 }
  0xae   : > { %1141 = vst [vmem:[#allocation17 + $0x18] sm:$0xf] %v1138_v36  ;;  %v3758_v31 = vunpack.i.h.bf16 %v3756_v25  ;;  %v3757_v38 = vunpack.i.l.bf16 %v3756_v25  ;;  %2701 = vmatmul.bf16.vlgmr.msra.gmra.mxu0 %v4603_v23  ;;  %v3527_v48 = vld [vmem:[#allocation17] sm:$0xff] }
  0xaf   : > { %2221 = vst [vmem:[#allocation17 + $0x40] sm:$0xf] %v2218_v21  ;;  %v1447_v7 = vsel %vm4082_vm3, %v3753_v16, %v3861_v4  ;;  %v1339_v56 = vsel %vm4082_vm3, %v3752_v5, %v3861_v4  ;;  %2804 = vmatmul.bf16.vlgmr.msra.gmra.mxu1 %v3527_v48 }
  0xb0   : > { %2329 = vst [vmem:[#allocation17 + $0x44] sm:$0xf] %v2326_v18  ;;  %v1879_v43 = vsel %vm4082_vm3, %v3758_v31, %v3861_v4  ;;  %v1771_v49 = vsel %vm4082_vm3, %v3757_v38, %v3861_v4  ;;  %v1451_v60 = vmax.f32 %v1443_v39, %v1447_v7  ;;  %v1343_v12 = vmax.f32 %v1335_v37, %v1339_v56 }
  0xb1   : > { %v1883_v14 = vmax.f32 %v1875_v26, %v1879_v43  ;;  %v1775_v20 = vmax.f32 %v1767_v62, %v1771_v49  ;;  %3672 = vmatpush.bf16.msra.mxu3 %v4123_v13  ;;  %v1671_v13 = vsel %vm4082_vm3, %v3778_v34, %v3861_v4  ;;  %v1563_v62 = vsel %vm4082_vm3, %v3777_v17, %v3861_v4  ;;  %v3557_v34 = vld [vmem:[#allocation17 + $0x38] sm:$0xff] }
  0xb2   : > { %v1351_v39 = vmax.f32 %v1343_v12, %v1347_v0  ;;  %v1459_v29 = vmax.f32 %v1451_v60, %v1455_v40 }
  0xb4   : > { %v1354_v37 = vpack.c.bf16 0.0, %v1351_v39  ;;  %v1462_v33 = vpack.c.bf16 0.0, %v1459_v29  ;;  %v3766_v42 = vpop.permute.xlu0 %3765 }
  0xb5   : > { %v3553_v45 = vld [vmem:[#allocation17 + $0x18] sm:$0xff]  ;;  %v3771_v54 = vpop.permute.xlu1 %3770  ;;  %v3768_v57 = vunpack.i.h.bf16 %v3766_v42  ;;  %v3767_v28 = vunpack.i.l.bf16 %v3766_v42  ;;  %3673 = vmatpush.bf16.msra.mxu3 %v4238_v2 }
  0xb6   : > { %v3773_v26 = vunpack.i.h.bf16 %v3771_v54  ;;  %v3772_v24 = vunpack.i.l.bf16 %v3771_v54  ;;  %1357 = vst [vmem:[#allocation17 + $0x20] sm:$0xf] %v1354_v37  ;;  %2987 = vmatmul.bf16.gmra.mxu2 %v3553_v45 }
  0xb7   : > { %v3543_v41 = vld [vmem:[#allocation17 + $0x40] sm:$0xff]  ;;  %1465 = vst [vmem:[#allocation17 + $0x24] sm:$0xf] %v1462_v33  ;;  %v1887_v27 = vsel %vm4082_vm3, %v3768_v57, %v3861_v4  ;;  %v1779_v2 = vsel %vm4082_vm3, %v3767_v28, %v3861_v4 }
  0xb8   : > { %v1663_v30 = vsel %vm4082_vm3, %v3773_v26, %v3861_v4  ;;  %v1555_v58 = vsel %vm4082_vm3, %v3772_v24, %v3861_v4  ;;  %v1891_v61 = vmax.f32 %v1883_v14, %v1887_v27  ;;  %v1783_v55 = vmax.f32 %v1775_v20, %v1779_v2  ;;  %2736 = vmatmul.bf16.gmra.mxu3 %v3543_v41  ;;  %v3530_v14 = vld [vmem:[#allocation17 + $0x18] sm:$0xff]  ;;  %v4717_v28 = vld [vmem:[%s4770_s1] ss:$0 sm:$0xff] }
  0xb9   : > { %v1667_v63 = vmax.f32 %v1659_v51, %v1663_v30  ;;  %v1559_v8 = vmax.f32 %v1551_v47, %v1555_v58  ;;  %3674 = vmatpush.bf16.msra.mxu3 %v4253_v9  ;;  %v2397_v9 = vunpack.c.l.bf16 %v3323_v46  ;;  %v2505_v51 = vunpack.c.h.bf16 %v3323_v46  ;;  %v3569_v26 = vld [vmem:[%s4712_s18] sm:$0xff]  }
  0xba   : > { %v1894_v10 = vpack.c.bf16 0.0, %v1891_v61  ;;  %v1786_v35 = vpack.c.bf16 0.0, %v1783_v55  ;;  %v3570_v27 = vunpack.c.l.bf16 %v3569_v26  ;;  %v3571_v58 = vunpack.c.h.bf16 %v3569_v26 }
  0xbb   : > { %v1567_v36 = vmax.f32 %v1559_v8, %v1563_v62  ;;  %v1675_v11 = vmax.f32 %v1667_v63, %v1671_v13  ;;  %v2511_v31 = vsel %vm459_vm4, %v2505_v51, %v3859_v3 }
  0xbc   : > { %1897 = vst [vmem:[#allocation17 + $0x34] sm:$0xf] %v1894_v10  ;;  %v3781_v59 = vpop.permute.xlu0 %3780  ;;  %v2523_v0 = vsel %vm4082_vm3, %v2511_v31, %v3861_v4 }
  0xbd   : > { %v1570_v21 = vpack.c.bf16 0.0, %v1567_v36  ;;  %v1678_v18 = vpack.c.bf16 0.0, %v1675_v11  ;;  %1789 = vst [vmem:[#allocation17 + $0x30] sm:$0xf] %v1786_v35  ;;  %3675 = vmatpush.bf16.msra.mxu3 %v4275_v19  ;;  %v3786_v47 = vpop.permute.xlu1 %3785  ;;  %v3783_v22 = vunpack.i.h.bf16 %v3781_v59  ;;  %v3782_v25 = vunpack.i.l.bf16 %v3781_v59 }
  0xbe   : > { %2706 = vmatmul.bf16.gmra.mxu0 %v3529_v15  ;;  %v3788_v16 = vunpack.i.h.bf16 %v3786_v47  ;;  %v3787_v5 = vunpack.i.l.bf16 %v3786_v47  ;;  %v2403_v19 = vsel %vm459_vm4, %v2397_v9, %v3859_v3  ;;  %v3554_v38 = vld [vmem:[#allocation17 + $0x20] sm:$0xff]  ;;  %v3640_v47 = vld [vmem:[%s4712_s18 + $0x8] sm:$0xff]  }
  0xbf   : > { %1573 = vst [vmem:[#allocation17 + $0x28] sm:$0xf] %v1570_v21  ;;  %2809 = vmatmul.bf16.gmra.mxu1 %v4603_v23  ;;  %v2527_v23 = vsel %vm4082_vm3, %v3783_v22, %v3861_v4  ;;  %v2415_v40 = vsel %vm4082_vm3, %v2403_v19, %v3861_v4  ;;  %v3531_v52 = vld [vmem:[#allocation17 + $0x20] sm:$0xff]  ;;  %v3575_v31 = vunpack.c.h.bf16 %v3640_v47 }
  0xc0   : > { %1681 = vst [vmem:[#allocation17 + $0x2c] sm:$0xf] %v1678_v18  ;;  %v2535_v6 = vsel %vm4082_vm3, %v3788_v16, %v3861_v4  ;;  %v2427_v7 = vsel %vm4082_vm3, %v3787_v5, %v3861_v4  ;;  %v2531_v56 = vmax.f32 %v2523_v0, %v2527_v23  ;;  %v3574_v16 = vunpack.c.l.bf16 %v3640_v47 }
  0xc1   : > { %3676 = vmatpush.bf16.msra.mxu3 %v4307_v32  ;;  %v2419_v32 = vsel %vm4082_vm3, %v3782_v25, %v3861_v4 }
  0xc2   : > { %v2423_v43 = vmax.f32 %v2415_v40, %v2419_v32  ;;  %v2539_v50 = vmax.f32 %v2531_v56, %v2535_v6 }
  0xc4   : > { %v3533_v48 = vld [vmem:[#allocation17 + $0x30] sm:$0xff]  ;;  %v2431_v49 = vmax.f32 %v2423_v43, %v2427_v7  ;;  %v2542_v12 = vpack.c.bf16 0.0, %v2539_v50 }
  0xc5   : > { %3677 = vmatpush.bf16.msra.mxu3 %v4343_v44  ;;  %v3556_v39 = vld [vmem:[#allocation17 + $0x30] sm:$0xff]  ;;  %v3558_v44 = vld [vmem:[#allocation17 + $0x40] sm:$0xff] }
  0xc6   : > { %2992 = vmatmul.bf16.gmra.mxu2 %v3554_v38  ;;  %v2434_v60 = vpack.c.bf16 0.0, %v2431_v49  ;;  %2545 = vst [vmem:[#allocation17 + $0x4c] sm:$0xf] %v2542_v12  ;;  %v3641_v12 = vld [vmem:[%s4712_s18 + $0x10] sm:$0xff]  }
  0xc7   : > { %v3555_v20 = vld [vmem:[#allocation17 + $0x28] sm:$0xff] }
  0xc8   : > { %2834 = vmatmul.bf16.vlgmr.msrb.gmra.mxu3 %v3533_v48  ;;  %2437 = vst [vmem:[#allocation17 + $0x48] sm:$0xf] %v2434_v60  ;;  %v3532_v29 = vld [vmem:[#allocation17 + $0x28] sm:$0xff] }
  0xce   : > { %2711 = vmatmul.bf16.gmra.mxu0 %v3530_v14 }
  0xcf   : > { %2814 = vmatmul.bf16.gmra.mxu1 %v3529_v15  ;;  %v3559_v17 = vld [vmem:[#allocation17 + $0x48] sm:$0xff] }
  0xd6   : > { %2997 = vmatmul.bf16.gmra.mxu2 %v3555_v20 }
  0xd8   : > { %2839 = vmatmul.bf16.gmra.mxu3 %v4575_v53 }
  0xde   : > { %2716 = vmatmul.bf16.gmra.mxu0 %v3531_v52 }
  0xdf   : > { %2819 = vmatmul.bf16.gmra.mxu1 %v3530_v14 }
  0xe6   : > { %3002 = vmatmul.bf16.gmra.mxu2 %v3556_v39 }
  0xe8   : > { %3012 = vmatmul.bf16.vlgmr.msra.gmra.mxu3 %v3558_v44  ;;  %v3578_v44 = vunpack.c.l.bf16 %v3641_v12 }
  0xee   : > { %2721 = vmatmul.bf16.gmra.mxu0 %v3532_v29 }
  0xef   : > { %2824 = vmatmul.bf16.gmra.mxu1 %v3531_v52 }
  0xf6   : > { %3007 = vmatmul.bf16.gmra.mxu2 %v3557_v34 }
  0xf8   : > { %3017 = vmatmul.bf16.gmra.mxu3 %v3559_v17  ;;  %v3579_v17 = vunpack.c.h.bf16 %v3641_v12 }
  0xfe   : > { %2726 = vmatmul.bf16.gmra.mxu0 %v3533_v48 }
  0xff   : > { %2829 = vmatmul.bf16.gmra.mxu1 %v3532_v29 }
 0x122   : > { %v2983_v37 = vpop.f32.mrf.mxu2 }
 0x12a   : > { %v4706_v53 = vpop.f32.mrf.mxu3  ;;  %v2985_v54 = vpop.f32.mrf.mxu2 }
 0x12b   : > { %v2702_v33 = vpop.f32.mrf.mxu0 }
 0x12c   : > { %v2805_v45 = vpop.f32.mrf.mxu1 }
 0x12d   : > { %v2806_v42 = vadd.f32 %v2805_v45, %v2702_v33 }
 0x12f   : > { %v3023_v57 = vadd.f32 %v2983_v37, %v2806_v42 }
 0x131   : > { %v3043_v62 = vadd.f32 %v4717_v28, %v3023_v57 }
 0x132   : > { %v4720_v41 = vpop.f32.mrf.mxu3 }
 0x133   : > { %v2704_v24 = vpop.f32.mrf.mxu0  ;;  %v3091_v55 = vadd.f32 %v3570_v27, %v3043_v62 }
 0x134   : > { %v2807_v13 = vpop.f32.mrf.mxu1 }
 0x135   : > { %v2808_v2 = vadd.f32 %v2807_v13, %v2704_v24  ;;  %v3107_v11 = vmax.f32 %v3091_v55, 0.0 }
 0x137   : > { %v3024_v30 = vadd.f32 %v2985_v54, %v2808_v2 }
 0x139   : > { %v2988_v61 = vpop.f32.mrf.mxu2  ;;  %v3044_v63 = vadd.f32 %v4717_v28, %v3024_v30 }
 0x13b   : > { %v2707_v8 = vpop.f32.mrf.mxu0  ;;  %v4724_v10 = vpop.f32.mrf.mxu3  ;;  %v3092_v35 = vadd.f32 %v3571_v58, %v3044_v63  ;;  %v3642_v58 = vld [vmem:[%s4712_s18 + $0x18] sm:$0xff]  }
 0x13c   : > { %v2810_v36 = vpop.f32.mrf.mxu1 }
 0x13d   : > { %v3108_v15 = vmax.f32 %v3092_v35, 0.0  ;;  %v2811_v21 = vadd.f32 %v2810_v36, %v2707_v8  ;;  %v3582_v35 = vunpack.c.l.bf16 %v3642_v58 }
 0x13f   : > { %v3603_v18 = vpack.c.bf16 %v3108_v15, %v3107_v11  ;;  %v3025_v59 = vadd.f32 %v2988_v61, %v2811_v21  ;;  %v3583_v15 = vunpack.c.h.bf16 %v3642_v58  ;;  %v3646_v58 = vld [vmem:[%s4712_s18 + $0x38] sm:$0xff]  }
 0x141   : > { %v2990_v46 = vpop.f32.mrf.mxu2  ;;  %3604 = vst [vmem:[%s4729_s22] sm:$0xff] %v3603_v18   ;;  %v3045_v25 = vadd.f32 %v4717_v28, %v3025_v59 }
 0x143   : > { %v2709_v9 = vpop.f32.mrf.mxu0  ;;  %v4733_v51 = vpop.f32.mrf.mxu3  ;;  %v3093_v32 = vadd.f32 %v3574_v16, %v3045_v25 }
 0x144   : > { %v2812_v22 = vpop.f32.mrf.mxu1 }
 0x145   : > { %v2813_v5 = vadd.f32 %v2812_v22, %v2709_v9  ;;  %v3109_v7 = vmax.f32 %v3093_v32, 0.0 }
 0x147   : > { %v3026_v19 = vadd.f32 %v2990_v46, %v2813_v5 }
 0x149   : > { %v2993_v23 = vpop.f32.mrf.mxu2  ;;  %v3046_v38 = vadd.f32 %v4717_v28, %v3026_v19 }
 0x14b   : > { %v2712_v48 = vpop.f32.mrf.mxu0  ;;  %v2835_v40 = vpop.f32.mrf.mxu3  ;;  %v3094_v0 = vadd.f32 %v3575_v31, %v3046_v38 }
 0x14c   : > { %v2815_v6 = vpop.f32.mrf.mxu1  ;;  %v2836_v9 = vadd.f32 %v2835_v40, %v4706_v53 }
 0x14d   : > { %v3110_v56 = vmax.f32 %v3094_v0, 0.0  ;;  %v2816_v43 = vadd.f32 %v2815_v6, %v2712_v48  ;;  %v3643_v0 = vld [vmem:[%s4712_s18 + $0x20] sm:$0xff]  }
 0x14f   : > { %v3608_v49 = vpack.c.bf16 %v3110_v56, %v3109_v7  ;;  %v3027_v60 = vadd.f32 %v2993_v23, %v2816_v43  ;;  %v3645_v23 = vld [vmem:[%s4712_s18 + $0x30] sm:$0xff]  }
 0x150   : > { %v3594_v7 = vunpack.c.l.bf16 %v3645_v23  ;;  %v3595_v40 = vunpack.c.h.bf16 %v3645_v23 }
 0x151   : > { %v2995_v50 = vpop.f32.mrf.mxu2  ;;  %3647 = vst [vmem:[%s4729_s22 + $0x8] sm:$0xff] %v3608_v49   ;;  %v3047_v39 = vadd.f32 %v4717_v28, %v3027_v60 }
 0x153   : > { %v2714_v14 = vpop.f32.mrf.mxu0  ;;  %v2837_v20 = vpop.f32.mrf.mxu3  ;;  %v3095_v33 = vadd.f32 %v3578_v44, %v3047_v39 }
 0x154   : > { %v2817_v52 = vpop.f32.mrf.mxu1  ;;  %v2838_v38 = vadd.f32 %v2837_v20, %v4720_v41  ;;  %v3587_v20 = vunpack.c.h.bf16 %v3643_v0 }
 0x155   : > { %v2818_v29 = vadd.f32 %v2817_v52, %v2714_v14  ;;  %v3111_v24 = vmax.f32 %v3095_v33, 0.0 }
 0x157   : > { %v3028_v34 = vadd.f32 %v2995_v50, %v2818_v29  ;;  %v3586_v50 = vunpack.c.l.bf16 %v3643_v0 }
 0x159   : > { %v2998_v37 = vpop.f32.mrf.mxu2  ;;  %v3048_v45 = vadd.f32 %v4717_v28, %v3028_v34 }
 0x15b   : > { %v2717_v42 = vpop.f32.mrf.mxu0  ;;  %v2840_v54 = vpop.f32.mrf.mxu3  ;;  %v3096_v57 = vadd.f32 %v3579_v17, %v3048_v45 }
 0x15c   : > { %v2820_v26 = vpop.f32.mrf.mxu1 }
 0x15d   : > { %v3112_v13 = vmax.f32 %v3096_v57, 0.0  ;;  %v2821_v62 = vadd.f32 %v2820_v26, %v2717_v42  ;;  %v2841_v42 = vadd.f32 %v2840_v54, %v4724_v10 }
 0x15f   : > { %v3613_v27 = vpack.c.bf16 %v3112_v13, %v3111_v24  ;;  %v3029_v30 = vadd.f32 %v2998_v37, %v2821_v62 }
 0x161   : > { %v3000_v2 = vpop.f32.mrf.mxu2  ;;  %3648 = vst [vmem:[%s4729_s22 + $0x10] sm:$0xff] %v3613_v27   ;;  %v3049_v8 = vadd.f32 %v4717_v28, %v3029_v30 }
 0x163   : > { %v2719_v61 = vpop.f32.mrf.mxu0  ;;  %v2842_v55 = vpop.f32.mrf.mxu3  ;;  %v3097_v18 = vadd.f32 %v3582_v35, %v3049_v8  ;;  %v3644_v35 = vld [vmem:[%s4712_s18 + $0x28] sm:$0xff]  }
 0x164   : > { %v2822_v63 = vpop.f32.mrf.mxu1 }
 0x165   : > { %v2823_v36 = vadd.f32 %v2822_v63, %v2719_v61  ;;  %v3113_v16 = vmax.f32 %v3097_v18, 0.0  ;;  %v2843_v63 = vadd.f32 %v2842_v55, %v4733_v51  ;;  %v3590_v18 = vunpack.c.l.bf16 %v3644_v35 }
 0x167   : > { %v3030_v11 = vadd.f32 %v3000_v2, %v2823_v36 }
 0x169   : > { %v3003_v21 = vpop.f32.mrf.mxu2  ;;  %v3050_v46 = vadd.f32 %v4717_v28, %v3030_v11  ;;  %v3598_v11 = vunpack.c.l.bf16 %v3646_v58 }
 0x16b   : > { %v2722_v59 = vpop.f32.mrf.mxu0  ;;  %v3013_v47 = vpop.f32.mrf.mxu3  ;;  %v3098_v22 = vadd.f32 %v3583_v15, %v3050_v46 }
 0x16c   : > { %v2825_v25 = vpop.f32.mrf.mxu1  ;;  %v3035_v31 = vadd.f32 %v3013_v47, %v2836_v9 }
 0x16d   : > { %v3114_v5 = vmax.f32 %v3098_v22, 0.0  ;;  %v2826_v19 = vadd.f32 %v2825_v25, %v2722_v59  ;;  %v3591_v25 = vunpack.c.h.bf16 %v3644_v35 }
 0x16e   : > { %v3055_v6 = vadd.f32 %v4717_v28, %v3035_v31 }
 0x16f   : > { %v3618_v32 = vpack.c.bf16 %v3114_v5, %v3113_v16  ;;  %v3031_v48 = vadd.f32 %v3003_v21, %v2826_v19  ;;  %v3599_v21 = vunpack.c.h.bf16 %v3646_v58 }
 0x170   : > { %v3103_v14 = vadd.f32 %v3594_v7, %v3055_v6 }
 0x171   : > { %3649 = vst [vmem:[%s4729_s22 + $0x18] sm:$0xff] %v3618_v32   ;;  %v3005_v56 = vpop.f32.mrf.mxu2  ;;  %v3051_v12 = vadd.f32 %v4717_v28, %v3031_v48 }
 0x172   : > { %v3119_v34 = vmax.f32 %v3103_v14, 0.0 }
 0x173   : > { %v2724_v43 = vpop.f32.mrf.mxu0  ;;  %v3015_v49 = vpop.f32.mrf.mxu3  ;;  %v3099_v29 = vadd.f32 %v3586_v50, %v3051_v12 }
 0x174   : > { %v3036_v53 = vadd.f32 %v3015_v49, %v2838_v38  ;;  %v2827_v60 = vpop.f32.mrf.mxu1 }
 0x175   : > { %v2828_v52 = vadd.f32 %v2827_v60, %v2724_v43  ;;  %v3115_v62 = vmax.f32 %v3099_v29, 0.0 }
 0x176   : > { %v3056_v39 = vadd.f32 %v4717_v28, %v3036_v53 }
 0x177   : > { %v3032_v41 = vadd.f32 %v3005_v56, %v2828_v52 }
 0x178   : > { %v3104_v44 = vadd.f32 %v3595_v40, %v3056_v39 }
 0x179   : > { %v3052_v17 = vadd.f32 %v4717_v28, %v3032_v41  ;;  %v3008_v24 = vpop.f32.mrf.mxu2 }
 0x17a   : > { %v3120_v37 = vmax.f32 %v3104_v44, 0.0 }
 0x17b   : > { %v2727_v33 = vpop.f32.mrf.mxu0  ;;  %v3018_v45 = vpop.f32.mrf.mxu3  ;;  %v3100_v57 = vadd.f32 %v3587_v20, %v3052_v17 }
 0x17c   : > { %v3633_v26 = vpack.c.bf16 %v3120_v37, %v3119_v34  ;;  %v2830_v13 = vpop.f32.mrf.mxu1  ;;  %v3037_v30 = vadd.f32 %v3018_v45, %v2841_v42 }
 0x17d   : > { %v3116_v27 = vmax.f32 %v3100_v57, 0.0  ;;  %v2831_v2 = vadd.f32 %v2830_v13, %v2727_v33 }
 0x17e   : > { %3652 = vst [vmem:[%s4729_s22 + $0x30] sm:$0xff] %v3633_v26   ;;  %v3057_v36 = vadd.f32 %v4717_v28, %v3037_v30 }
 0x17f   : > { %v3623_v61 = vpack.c.bf16 %v3116_v27, %v3115_v62  ;;  %v3033_v8 = vadd.f32 %v3008_v24, %v2831_v2 }
 0x180   : > { %v3105_v47 = vadd.f32 %v3598_v11, %v3057_v36 }
 0x181   : > { %3650 = vst [vmem:[%s4729_s22 + $0x20] sm:$0xff] %v3623_v61   ;;  %v3053_v59 = vadd.f32 %v4717_v28, %v3033_v8  ;;  %v3010_v55 = vpop.f32.mrf.mxu2 }
 0x182   : > { %v3121_v19 = vmax.f32 %v3105_v47, 0.0 }
 0x183   : > { %v2729_v10 = vpop.f32.mrf.mxu0  ;;  %v3020_v54 = vpop.f32.mrf.mxu3  ;;  %v3101_v5 = vadd.f32 %v3590_v18, %v3053_v59 }
 0x184   : > { %v3038_v15 = vadd.f32 %v3020_v54, %v2843_v63  ;;  %v2832_v46 = vpop.f32.mrf.mxu1 }
 0x185   : > { %v2833_v9 = vadd.f32 %v2832_v46, %v2729_v10  ;;  %v3117_v48 = vmax.f32 %v3101_v5, 0.0 }
 0x186   : > { %v3058_v51 = vadd.f32 %v4717_v28, %v3038_v15 }
 0x187   : > { %v3034_v22 = vadd.f32 %v3010_v55, %v2833_v9 }
 0x188   : > { %v3106_v16 = vadd.f32 %v3599_v21, %v3058_v51 }
 0x189   : > { %v3054_v31 = vadd.f32 %v4717_v28, %v3034_v22 }
 0x18a   : > { %v3122_v23 = vmax.f32 %v3106_v16, 0.0 }
 0x18b   : > { %v3102_v32 = vadd.f32 %v3591_v25, %v3054_v31 }
 0x18c   : > { %v3638_v38 = vpack.c.bf16 %v3122_v23, %v3121_v19 }
 0x18d   : > { %v3118_v0 = vmax.f32 %v3102_v32, 0.0 }
 0x18e   : > { %3653 = vst [vmem:[%s4729_s22 + $0x38] sm:$0xff] %v3638_v38  }
 0x18f   : > { %v3628_v6 = vpack.c.bf16 %v3118_v0, %v3117_v48 }
 0x191   : > { %3651 = vst [vmem:[%s4729_s22 + $0x28] sm:$0xff] %v3628_v6  }
 0x192 PF: > { %s40_s15 = sadd.s32 1, %s3796_s15  }
 0x193   : > { %p37_p4 = scmp.ge.s32.totalorder %s40_s15, 4  }
 0x195   :  { %39 = sbr.rel (!%p37_p4) target bundleno = 3 (0x3), region = 199 }

</bundles_post_ra>
